<compile_context>
chip_gen: v7x
topology: tpu7x:2x2x1
jax: 0.10.0
libtpu: 0.0.40
codegen_flags: <defaults>
</compile_context>

<pallas_src>
import functools
import math

import jax
import jax.numpy as jnp
from jax.experimental import pallas as pl
from jax.experimental.pallas import tpu as pltpu

EPS = 1e-5  # BatchNorm eps (PyTorch default)


# --------------------------- in-kernel helpers ------------------------------

def _affine_from_stats(s, q, g, b, count):
    """Per-channel BN scale/shift from accumulated sum / sum-of-squares."""
    mean = s * (1.0 / count)
    var = q * (1.0 / count) - mean * mean
    scale = jax.lax.rsqrt(var + EPS) * g
    shift = b - mean * scale
    return scale, shift


def _bn(x, s, q, g, b, count, relu=True):
    scale, shift = _affine_from_stats(s, q, g, b, count)
    y = x * scale + shift
    return jnp.maximum(y, 0.0) if relu else y


# ------------------------------ Pallas kernels ------------------------------

def _stats_kernel(x_ref, sum_ref, ssq_ref):
    x = x_ref[...]

    @pl.when(pl.program_id(0) == 0)
    def _():
        sum_ref[...] = jnp.zeros_like(sum_ref)
        ssq_ref[...] = jnp.zeros_like(ssq_ref)

    sum_ref[...] += jnp.sum(x, axis=1, keepdims=True)
    ssq_ref[...] += jnp.sum(x * x, axis=1, keepdims=True)


def row_stats(x2d, tm):
    """Per-channel sum / sumsq over the lane axis of a (C, M) view."""
    C, M = x2d.shape
    return pl.pallas_call(
        _stats_kernel,
        out_shape=(jax.ShapeDtypeStruct((C, 1), jnp.float32),
                   jax.ShapeDtypeStruct((C, 1), jnp.float32)),
        grid=(M // tm,),
        in_specs=[pl.BlockSpec((C, tm), lambda i: (0, i))],
        out_specs=(pl.BlockSpec((C, 1), lambda i: (0, 0)),
                   pl.BlockSpec((C, 1), lambda i: (0, 0))),
        compiler_params=pltpu.CompilerParams(dimension_semantics=("arbitrary",)),
    )(x2d)


def _pool_kernel(*refs, prenorm, count):
    if prenorm:
        x_ref, s_ref, q_ref, g_ref, b_ref, o_ref = refs
        x = _bn(x_ref[...], s_ref[...], q_ref[...], g_ref[...], b_ref[...], count)
    else:
        x_ref, o_ref = refs
        x = x_ref[...]

    @pl.when(pl.program_id(1) == 0)
    def _():
        o_ref[...] = jnp.zeros_like(o_ref)

    o_ref[...] += jnp.sum(x, axis=1, keepdims=True)[None]


def pool_per_image(x2d, N, HW, tm, prenorm=None, bn_count=1.0):
    """Per-image, per-channel spatial mean; optional fused BN+ReLU prologue."""
    C, _ = x2d.shape
    J = HW // tm
    vec = pl.BlockSpec((C, 1), lambda n, j: (0, 0))
    in_specs = [pl.BlockSpec((C, tm), lambda n, j: (0, n * J + j))]
    args = [x2d]
    if prenorm is not None:
        in_specs += [vec] * 4
        args += list(prenorm)
    sums = pl.pallas_call(
        functools.partial(_pool_kernel, prenorm=prenorm is not None,
                          count=float(bn_count)),
        out_shape=jax.ShapeDtypeStruct((N, C, 1), jnp.float32),
        grid=(N, J),
        in_specs=in_specs,
        out_specs=pl.BlockSpec((1, C, 1), lambda n, j: (n, 0, 0)),
        compiler_params=pltpu.CompilerParams(
            dimension_semantics=("arbitrary", "arbitrary")),
    )(*args)
    return sums[..., 0] / float(HW)                         # (N, C) means


def _preamble_kernel(x2_ref, x1_ref, mask_ref, ns_ref, nq_ref, ng_ref, nb_ref,
                     saw_ref, sab_ref, eca_ref, wa_ref, wb_ref, bias_ref,
                     o_ref, *, norm_count):
    x2 = x2_ref[...]
    # spatial attention: per-pixel sigmoid of a 1-channel 1x1 conv (sublane sum)
    sa = jax.nn.sigmoid(jnp.sum(saw_ref[...] * x2, axis=0, keepdims=True)
                        + sab_ref[...])
    g = eca_ref[0]                                           # (C, 1) per-image ECA gate
    x2a = x2 + (x2 * sa) * (x2 * g)                          # x2 + SA(x2)*ECA(x2)
    # BN affine of the raw upsampled+zero-padded x1 (affine commutes with the
    # bilinear interp); the mask restores the exact-zero F.pad border.
    x1n = _bn(x1_ref[...], ns_ref[...], nq_ref[...], ng_ref[...], nb_ref[...],
              norm_count, relu=False) * mask_ref[...]
    # concat([x2', x1n]) @ W  ==  Wa @ x2' + Wb @ x1n
    o_ref[...] = (jnp.dot(wa_ref[...], x2a, preferred_element_type=jnp.float32)
                  + jnp.dot(wb_ref[...], x1n, preferred_element_type=jnp.float32)
                  + bias_ref[...])


def preamble_conv(x2_2d, x1u, mask, norm_stats, sa_w, sa_b, eca, wa, wb, bias,
                  *, N, HW, tm, norm_count):
    C2, M = x2_2d.shape
    C1 = x1u.shape[0]
    Cout = wa.shape[0]
    J = HW // tm

    def big(C):
        return pl.BlockSpec((C, tm), lambda n, j: (0, n * J + j))

    def vec(C):
        return pl.BlockSpec((C, 1), lambda n, j: (0, 0))

    in_specs = [big(C2), big(C1), big(1),
                vec(C1), vec(C1), vec(C1), vec(C1),
                vec(C2), vec(1),
                pl.BlockSpec((1, C2, 1), lambda n, j: (n, 0, 0)),
                pl.BlockSpec((Cout, C2), lambda n, j: (0, 0)),
                pl.BlockSpec((Cout, C1), lambda n, j: (0, 0)),
                vec(Cout)]
    args = [x2_2d, x1u, mask, *norm_stats, sa_w, sa_b, eca, wa, wb, bias]
    return pl.pallas_call(
        functools.partial(_preamble_kernel, norm_count=float(norm_count)),
        out_shape=jax.ShapeDtypeStruct((Cout, M), jnp.float32),
        grid=(N, J),
        in_specs=in_specs,
        out_specs=big(Cout),
        compiler_params=pltpu.CompilerParams(
            dimension_semantics=("parallel", "arbitrary")),
    )(*args)


def _conv_block_kernel(*refs, n_taps, depthwise, prenorm, gated, act_relu, count):
    i = 0
    x_ref = refs[i]; i += 1
    if prenorm:
        ps, pq, pg, pb = refs[i:i + 4]; i += 4
    if gated:
        gate_ref = refs[i]; i += 1
    w_ref = refs[i]; i += 1
    b_ref = refs[i]; i += 1
    o_ref, sum_ref, ssq_ref = refs[i:i + 3]

    if prenorm:                              # hoisted out of the tap loop
        scale, shift = _affine_from_stats(ps[...], pq[...], pg[...], pb[...], count)

    acc = None
    for k in range(n_taps):                  # static unroll over the 3x3 taps
        x = x_ref[k]
        if prenorm:                          # fused BN+ReLU of the previous conv
            x = jnp.maximum(x * scale + shift, 0.0)
        if gated:                            # fused SE channel gate (per image)
            x = x * gate_ref[0]
        if depthwise:
            c = w_ref[k] * x                 # VPU per-channel tap
        else:
            c = jnp.dot(w_ref[k], x, preferred_element_type=jnp.float32)  # MXU
        acc = c if acc is None else acc + c
    y = acc + b_ref[...]
    if act_relu:
        y = jnp.maximum(y, 0.0)
    o_ref[...] = y

    # epilogue: accumulate the statistics for the *next* BatchNorm
    @pl.when((pl.program_id(0) == 0) & (pl.program_id(1) == 0))
    def _():
        sum_ref[...] = jnp.zeros_like(sum_ref)
        ssq_ref[...] = jnp.zeros_like(ssq_ref)

    sum_ref[...] += jnp.sum(y, axis=1, keepdims=True)
    ssq_ref[...] += jnp.sum(y * y, axis=1, keepdims=True)


def conv_block(x_taps, w, bias, *, N, HW, tm, prenorm=None, gate=None,
               depthwise=False, act_relu=False):
    """y = conv(prologue(x)) over a lane-dense (taps, Cin, M) view; also emits
    per-channel sum / sumsq of y (for the following BatchNorm)."""
    n_taps, Cin, M = x_taps.shape
    Cout = w.shape[1]
    J = HW // tm

    def vec(C):
        return pl.BlockSpec((C, 1), lambda n, j: (0, 0))

    in_specs = [pl.BlockSpec((n_taps, Cin, tm), lambda n, j: (0, 0, n * J + j))]
    args = [x_taps]
    if prenorm is not None:
        in_specs += [vec(Cin)] * 4
        args += list(prenorm)
    if gate is not None:
        in_specs.append(pl.BlockSpec((1, Cin, 1), lambda n, j: (n, 0, 0)))
        args.append(gate)
    in_specs += [pl.BlockSpec(w.shape, lambda n, j: (0, 0, 0)), vec(Cout)]
    args += [w, bias]

    return pl.pallas_call(
        functools.partial(_conv_block_kernel, n_taps=n_taps, depthwise=depthwise,
                          prenorm=prenorm is not None, gated=gate is not None,
                          act_relu=act_relu, count=float(M)),
        out_shape=(jax.ShapeDtypeStruct((Cout, M), jnp.float32),
                   jax.ShapeDtypeStruct((Cout, 1), jnp.float32),
                   jax.ShapeDtypeStruct((Cout, 1), jnp.float32)),
        grid=(N, J),
        in_specs=in_specs,
        out_specs=(pl.BlockSpec((Cout, tm), lambda n, j: (0, n * J + j)),
                   pl.BlockSpec((Cout, 1), lambda n, j: (0, 0)),
                   pl.BlockSpec((Cout, 1), lambda n, j: (0, 0))),
        compiler_params=pltpu.CompilerParams(
            dimension_semantics=("arbitrary", "arbitrary")),
    )(*args)


def _residual_kernel(y4_ref, s4, q4, g3, b3, x0_ref,
                     y2_ref, s2, q2, ga, ba,
                     y3_ref, s3, q3, g2, b2, o_ref, *, count):
    bn3 = _bn(y4_ref[...], s4[...], q4[...], g3[...], b3[...], count, relu=False)
    r_add1 = _bn(y2_ref[...], s2[...], q2[...], ga[...], ba[...], count)
    r_d = _bn(y3_ref[...], s3[...], q3[...], g2[...], b2[...], count)
    o_ref[...] = jnp.maximum(bn3 + x0_ref[...] + r_add1 + r_d, 0.0)


def residual_add(y4, bn3p, x0, y2, bnA1p, y3, bn2p, *, tm):
    C, M = y4.shape
    big = pl.BlockSpec((C, tm), lambda i: (0, i))
    vec = pl.BlockSpec((C, 1), lambda i: (0, 0))
    in_specs = [big] + [vec] * 4 + [big, big] + [vec] * 4 + [big] + [vec] * 4
    args = [y4, *bn3p, x0, y2, *bnA1p, y3, *bn2p]
    return pl.pallas_call(
        functools.partial(_residual_kernel, count=float(M)),
        out_shape=jax.ShapeDtypeStruct((C, M), jnp.float32),
        grid=(M // tm,),
        in_specs=in_specs,
        out_specs=big,
        compiler_params=pltpu.CompilerParams(dimension_semantics=("parallel",)),
    )(*args)


# ------------------------------ JAX glue ------------------------------------

def pick_tile(m):
    for t in (512, 256, 128):
        if m % t == 0:
            return t
    return m                                    # single full block (block == array dims)


def pick_spatial_tile(hw, n):
    for t in (512, 256, 128):
        if hw % t == 0:
            return t
    if n == 1:
        return hw
    raise ValueError("H*W must be a multiple of 128 (or batch size 1).")


def bilinear_up2x(x):
    """align_corners=True bilinear 2x upsample of (C, N, H, W) (gather+lerp)."""
    _, _, H, W = x.shape

    def taps(n_in, n_out):
        if n_in == 1:
            z = jnp.zeros((n_out,), jnp.int32)
            return z, z, jnp.zeros((n_out,), jnp.float32)
        src = jnp.arange(n_out, dtype=jnp.float32) * ((n_in - 1) / (n_out - 1))
        lo = jnp.clip(jnp.floor(src).astype(jnp.int32), 0, n_in - 2)
        return lo, lo + 1, src - lo.astype(jnp.float32)

    lo, hi, f = taps(H, 2 * H)
    x = (x[:, :, lo, :] * (1.0 - f)[None, None, :, None]
         + x[:, :, hi, :] * f[None, None, :, None])
    lo, hi, f = taps(W, 2 * W)
    x = x[..., lo] * (1.0 - f) + x[..., hi] * f
    return x


def extract_taps(x2d, N, H, W, dilation):
    """Reflect-padded 3x3 tap slabs of a (C, N*H*W) view -> (9, C, N*H*W)."""
    # TODO(synk): replace with an in-kernel halo DMA (memory_space=pl.ANY) to
    # avoid materializing 9x the activation in HBM for the two 3x3 convs.
    C = x2d.shape[0]
    d = dilation
    x = x2d.reshape(C, N, H, W)
    xp = jnp.pad(x, ((0, 0), (0, 0), (d, d), (d, d)), mode="reflect")
    taps = [xp[:, :, kh * d:kh * d + H, kw * d:kw * d + W]
            for kh in range(3) for kw in range(3)]
    return jnp.stack(taps, axis=0).reshape(9, C, N * H * W)


def eca_gates(pooled, w, b):
    """ECA 1-D conv (reflect padded) + sigmoid on (N, C) pooled means (tiny)."""
    Cdim = pooled.shape[1]
    k = w.shape[0]
    p = k // 2
    x = jnp.pad(pooled, ((0, 0), (p, p)), mode="reflect") if p > 0 else pooled
    out = sum(w[t] * x[:, t:t + Cdim] for t in range(k)) + b[0]
    return jax.nn.sigmoid(out)                              # (N, C)


def mmd_forward(x0, N, H, W, p, tm, dilation):
    """One MMD block on a channel-major, lane-dense (C, N*H*W) view."""
    C, M = x0.shape
    HW = H * W
    # conv1 (1x1, no bias) + bn1-stats epilogue
    y1, s1, q1 = conv_block(x0[None], p["w1"], jnp.zeros((C, 1), jnp.float32),
                            N=N, HW=HW, tm=tm)
    # conv_add1: depthwise 3x3 (reflect), fused bn1+relu prologue, VPU path
    y2, s2, q2 = conv_block(extract_taps(y1, N, H, W, 1), p["w_dw"], p["b_dw"],
                            N=N, HW=HW, tm=tm, depthwise=True,
                            prenorm=(s1, q1, p["bn1_g"], p["bn1_b"]))
    # conv2: grouped 3x3 (reflect, dilation), fused bn_add1+relu prologue
    y3, s3, q3 = conv_block(extract_taps(y2, N, H, W, dilation),
                            p["w_g"], p["b_g"], N=N, HW=HW, tm=tm,
                            prenorm=(s2, q2, p["bnA_g"], p["bnA_b"]))
    # SE: per-image pooled mean of relu(bn2(y3)) (fused prologue), then the two
    # (N, C)-sized FC layers in plain JAX (negligible).
    pooled = pool_per_image(y3, N, HW, tm,
                            prenorm=(s3, q3, p["bn2_g"], p["bn2_b"]),
                            bn_count=float(M))
    h = jnp.maximum(pooled @ p["se_w1"].T + p["se_b1"], 0.0)
    gate = jax.nn.sigmoid(h @ p["se_w2"].T + p["se_b2"])    # (N, C)
    # conv3 (1x1): fused bn2+relu + SE-gate prologue, bn3-stats epilogue
    y4, s4, q4 = conv_block(y3[None], p["w3"], p["b3"], N=N, HW=HW, tm=tm,
                            prenorm=(s3, q3, p["bn2_g"], p["bn2_b"]),
                            gate=gate[..., None])
    # relu(bn3(y4) + shortcut + residual_add1 + residual_d); the two residuals
    # are re-derived from raw y2/y3 via the cheap per-channel BN affine.
    return residual_add(y4, (s4, q4, p["bn3_g"], p["bn3_b"]), x0,
                        y2, (s2, q2, p["bnA_g"], p["bnA_b"]),
                        y3, (s3, q3, p["bn2_g"], p["bn2_b"]), tm=tm)


def up_forward(x1_nchw, x2_nchw, params, dilations=(1,)):
    assert len(dilations) == 1  # TODO(synk): multi-dilation DilatedConv branch
    # channel-major, lane-dense internal layout: (C, N*H*W)
    x1 = jnp.transpose(x1_nchw.astype(jnp.float32), (1, 0, 2, 3))   # (C,N,H1,W1)
    x2 = jnp.transpose(x2_nchw.astype(jnp.float32), (1, 0, 2, 3))   # (C,N,H2,W2)
    C, N, H1, W1 = x1.shape
    _, _, H2, W2 = x2.shape
    HW2 = H2 * W2
    M2 = N * HW2
    tm = pick_spatial_tile(HW2, N)

    # training-mode batch statistics for `norm` (BatchNorm2d on x1)
    m1 = N * H1 * W1
    ns, nq = row_stats(x1.reshape(C, m1), pick_tile(m1))

    # bilinear 2x upsample of the *raw* x1 (BN affine applied in-kernel), F.pad
    x1u = bilinear_up2x(x1)
    dy, dx = H2 - x1u.shape[2], W2 - x1u.shape[3]
    pad = ((0, 0), (0, 0), (dy // 2, dy - dy // 2), (dx // 2, dx - dx // 2))
    mask = jnp.pad(jnp.ones((1, N) + x1u.shape[2:], jnp.float32), pad)
    x1u = jnp.pad(x1u, pad).reshape(C, M2)
    mask = mask.reshape(1, M2)

    # ECA gate on x2: per-image pooled mean (Pallas) + tiny 1-D conv (plain JAX)
    x2_2d = x2.reshape(C, M2)
    eca = eca_gates(pool_per_image(x2_2d, N, HW2, tm),
                    params["eca_w"], params["eca_b"])               # (N, C)

    # fused: x2 + SA(x2)*ECA(x2), BN-affine + pad-mask on x1, concat + 1x1 conv
    x = preamble_conv(x2_2d, x1u, mask,
                      (ns, nq, params["norm_g"], params["norm_b"]),
                      params["sa_w"], params["sa_b"], eca[..., None],
                      params["wa"], params["wb"], params["conv1x1_b"],
                      N=N, HW=HW2, tm=tm, norm_count=m1)

    for p in params["mmd_layers"]:
        x = mmd_forward(x, N, H2, W2, p, tm, dilations[0])

    return jnp.transpose(x.reshape(-1, N, H2, W2), (1, 0, 2, 3))


# --------------------------- parameter init ---------------------------------

def init_up_params(key, in_channels, out_channels, group_width,
                   layer_num=1, dilations=(1,)):
    C = in_channels // 2
    oc = out_channels
    groups = oc // group_width
    keys = iter(jax.random.split(key, 8 + 24 * layer_num))

    def nrm(shape, scale=0.1):
        return scale * jax.random.normal(next(keys), shape, jnp.float32)

    # ECA kernel size (same formula as the torch module)
    k = int(abs((math.log(C, 2) + 1) / 2))
    eca_k = k if k % 2 else k + 1

    w1x1 = nrm((oc, in_channels))                       # conv1x1 on cat([x2, x1])
    params = dict(
        norm_g=1.0 + nrm((C, 1)), norm_b=nrm((C, 1)),
        sa_w=nrm((C, 1)), sa_b=nrm((1, 1)),
        eca_w=nrm((eca_k,)), eca_b=nrm((1,)),
        wa=w1x1[:, :C], wb=w1x1[:, C:], conv1x1_b=nrm((oc, 1)),
    )

    def grouped_weight(w_t, g):
        # torch (Cout, Cin//g, 3, 3) -> per-tap block-diagonal (9, Cout, Cin)
        Cout, gin = w_t.shape[0], w_t.shape[1]
        gout, Cin = Cout // g, gin * g
        w = jnp.zeros((9, Cout, Cin), jnp.float32)
        for gi in range(g):
            blk = jnp.transpose(w_t[gi * gout:(gi + 1) * gout], (2, 3, 0, 1))
            w = w.at[:, gi * gout:(gi + 1) * gout, gi * gin:(gi + 1) * gin].set(
                blk.reshape(9, gout, gin))
        return w

    layers = []
    for _ in range(layer_num):
        w_dw_t = nrm((oc, 1, 3, 3))                     # depthwise, torch layout
        w_g_t = nrm((oc, oc // groups, 3, 3))           # grouped, torch layout
        layers.append(dict(
            w1=nrm((1, oc, oc)),                        # conv1 1x1, no bias
            bn1_g=1.0 + nrm((oc, 1)), bn1_b=nrm((oc, 1)),
            w_dw=jnp.transpose(w_dw_t[:, 0], (1, 2, 0)).reshape(9, oc, 1),
            b_dw=nrm((oc, 1)),
            bnA_g=1.0 + nrm((oc, 1)), bnA_b=nrm((oc, 1)),
            w_g=grouped_weight(w_g_t, groups), b_g=nrm((oc, 1)),
            bn2_g=1.0 + nrm((oc, 1)), bn2_b=nrm((oc, 1)),
            se_w1=nrm((oc // 4, oc)), se_b1=nrm((oc // 4,)),
            se_w2=nrm((oc, oc // 4)), se_b2=nrm((oc,)),
            w3=nrm((1, oc, oc)), b3=nrm((oc, 1)),
            bn3_g=1.0 + nrm((oc, 1)), bn3_b=nrm((oc, 1)),
        ))
    params["mmd_layers"] = layers
    return params


# --------------------------------- main --------------------------------------

if __name__ == "__main__":
    in_channels, out_channels, group_width = 8, 8, 4
    N, H1, W1 = 2, 8, 8
    C = in_channels // 2                      # x1 / x2 channel count

    key = jax.random.PRNGKey(0)
    k1, k2, kp = jax.random.split(key, 3)
    x1 = jax.random.normal(k1, (N, C, H1, W1), jnp.float32)          # low-res
    x2 = jax.random.normal(k2, (N, C, 2 * H1, 2 * W1), jnp.float32)  # skip

    params = init_up_params(kp, in_channels, out_channels, group_width,
                            layer_num=1, dilations=(1,))

    fwd = jax.jit(up_forward)
    out = fwd(x1, x2, params)
    jax.block_until_ready(out)
    assert out.shape == (N, out_channels, 2 * H1, 2 * W1), out.shape
    print("KERNEL_OK")
</pallas_src>

<mosaic_0001>
module attributes {stable_mosaic.version = 11 : i64} {
  func.func @_stats_kernel(%arg0: i32, %arg1: memref<4x128xf32, #tpu.memory_space<vmem>>, %arg2: memref<4x1xf32, #tpu.memory_space<vmem>>, %arg3: memref<4x1xf32, #tpu.memory_space<vmem>>) attributes {dimension_semantics = [#tpu.dimension_semantics<arbitrary>], iteration_bounds = array<i64: 1>, scalar_prefetch = 0 : i64, scratch_operands = 0 : i64, tpu.core_type = #tpu.core_type<tc>, window_params = [{transform_indices = @transform_0, window_bounds = array<i64: 4, 128>}, {pipeline_mode = #tpu.pipeline_mode<synchronous>, transform_indices = @transform_1, window_bounds = array<i64: 4, 1>}, {pipeline_mode = #tpu.pipeline_mode<synchronous>, transform_indices = @transform_2, window_bounds = array<i64: 4, 1>}]} {
    %c0 = arith.constant 0 : index
    %c0_0 = arith.constant 0 : index
    %0 = vector.load %arg1[%c0, %c0_0] : memref<4x128xf32, #tpu.memory_space<vmem>>, vector<4x128xf32>
    %c0_i32 = arith.constant 0 : i32
    %1 = arith.cmpi eq, %arg0, %c0_i32 : i32
    %2 = arith.extui %1 : i1 to i32
    %c0_i32_1 = arith.constant 0 : i32
    %3 = arith.cmpi ne, %2, %c0_i32_1 : i32
    scf.if %3 {
      %cst_11 = arith.constant 0.000000e+00 : f32
      %15 = vector.broadcast %cst_11 : f32 to vector<4x1xf32>
      %c0_12 = arith.constant 0 : index
      %c0_13 = arith.constant 0 : index
      %16 = vector.load %arg2[%c0_12, %c0_13] : memref<4x1xf32, #tpu.memory_space<vmem>>, vector<4x1xf32>
      tpu.vector_store %arg2[%c0_12, %c0_13], %15 {strides = array<i32>} : memref<4x1xf32, #tpu.memory_space<vmem>>, vector<4x1xf32>,
      %cst_14 = arith.constant 0.000000e+00 : f32
      %17 = vector.broadcast %cst_14 : f32 to vector<4x1xf32>
      %c0_15 = arith.constant 0 : index
      %c0_16 = arith.constant 0 : index
      %18 = vector.load %arg3[%c0_15, %c0_16] : memref<4x1xf32, #tpu.memory_space<vmem>>, vector<4x1xf32>
      tpu.vector_store %arg3[%c0_15, %c0_16], %17 {strides = array<i32>} : memref<4x1xf32, #tpu.memory_space<vmem>>, vector<4x1xf32>,
    } else {
    }
    %c0_2 = arith.constant 0 : index
    %c0_3 = arith.constant 0 : index
    %4 = vector.load %arg2[%c0_2, %c0_3] : memref<4x1xf32, #tpu.memory_space<vmem>>, vector<4x1xf32>
    %cst = arith.constant dense<0.000000e+00> : vector<4xf32>
    %5 = vector.multi_reduction <add>, %0, %cst [1] : vector<4x128xf32> to vector<4xf32>
    %6 = vector.shape_cast %5 : vector<4xf32> to vector<4x1xf32>
    %7 = arith.addf %4, %6 : vector<4x1xf32>
    %c0_4 = arith.constant 0 : index
    %c0_5 = arith.constant 0 : index
    %8 = vector.load %arg2[%c0_4, %c0_5] : memref<4x1xf32, #tpu.memory_space<vmem>>, vector<4x1xf32>
    tpu.vector_store %arg2[%c0_4, %c0_5], %7 {strides = array<i32>} : memref<4x1xf32, #tpu.memory_space<vmem>>, vector<4x1xf32>,
    %c0_6 = arith.constant 0 : index
    %c0_7 = arith.constant 0 : index
    %9 = vector.load %arg3[%c0_6, %c0_7] : memref<4x1xf32, #tpu.memory_space<vmem>>, vector<4x1xf32>
    %10 = arith.mulf %0, %0 : vector<4x128xf32>
    %cst_8 = arith.constant dense<0.000000e+00> : vector<4xf32>
    %11 = vector.multi_reduction <add>, %10, %cst_8 [1] : vector<4x128xf32> to vector<4xf32>
    %12 = vector.shape_cast %11 : vector<4xf32> to vector<4x1xf32>
    %13 = arith.addf %9, %12 : vector<4x1xf32>
    %c0_9 = arith.constant 0 : index
    %c0_10 = arith.constant 0 : index
    %14 = vector.load %arg3[%c0_9, %c0_10] : memref<4x1xf32, #tpu.memory_space<vmem>>, vector<4x1xf32>
    tpu.vector_store %arg3[%c0_9, %c0_10], %13 {strides = array<i32>} : memref<4x1xf32, #tpu.memory_space<vmem>>, vector<4x1xf32>,
    return
  }
  func.func @transform_0(%arg0: i32) -> (i32, i32) {
    %c0_i32 = arith.constant 0 : i32
    %c0_i32_0 = arith.constant 0 : i32
    return %c0_i32, %arg0 : i32, i32
  }
  func.func @transform_1(%arg0: i32) -> (i32, i32) {
    %c0_i32 = arith.constant 0 : i32
    %c0_i32_0 = arith.constant 0 : i32
    %c0_i32_1 = arith.constant 0 : i32
    return %c0_i32, %c0_i32_0 : i32, i32
  }
  func.func @transform_2(%arg0: i32) -> (i32, i32) {
    %c0_i32 = arith.constant 0 : i32
    %c0_i32_0 = arith.constant 0 : i32
    %c0_i32_1 = arith.constant 0 : i32
    return %c0_i32, %c0_i32_0 : i32, i32
  }
}

module attributes {stable_mosaic.version = 11 : i64} {
  func.func @_preamble_kernel(%arg0: i32, %arg1: i32, %arg2: memref<4x256xf32, #tpu.memory_space<vmem>>, %arg3: memref<4x256xf32, #tpu.memory_space<vmem>>, %arg4: memref<1x256xf32, #tpu.memory_space<vmem>>, %arg5: memref<4x1xf32, #tpu.memory_space<vmem>>, %arg6: memref<4x1xf32, #tpu.memory_space<vmem>>, %arg7: memref<4x1xf32, #tpu.memory_space<vmem>>, %arg8: memref<4x1xf32, #tpu.memory_space<vmem>>, %arg9: memref<4x1xf32, #tpu.memory_space<vmem>>, %arg10: memref<1x1xf32, #tpu.memory_space<vmem>>, %arg11: memref<1x4x1xf32, #tpu.memory_space<vmem>>, %arg12: memref<8x4xf32, #tpu.memory_space<vmem>>, %arg13: memref<8x4xf32, #tpu.memory_space<vmem>>, %arg14: memref<8x1xf32, #tpu.memory_space<vmem>>, %arg15: memref<8x256xf32, #tpu.memory_space<vmem>>) attributes {dimension_semantics = [#tpu.dimension_semantics<parallel>, #tpu.dimension_semantics<arbitrary>], iteration_bounds = array<i64: 2, 1>, scalar_prefetch = 0 : i64, scratch_operands = 0 : i64, tpu.core_type = #tpu.core_type<tc>, window_params = [{transform_indices = @transform_0, window_bounds = array<i64: 4, 256>}, {transform_indices = @transform_1, window_bounds = array<i64: 4, 256>}, {transform_indices = @transform_2, window_bounds = array<i64: 1, 256>}, {pipeline_mode = #tpu.pipeline_mode<synchronous>, transform_indices = @transform_3, window_bounds = array<i64: 4, 1>}, {pipeline_mode = #tpu.pipeline_mode<synchronous>, transform_indices = @transform_4, window_bounds = array<i64: 4, 1>}, {pipeline_mode = #tpu.pipeline_mode<synchronous>, transform_indices = @transform_5, window_bounds = array<i64: 4, 1>}, {pipeline_mode = #tpu.pipeline_mode<synchronous>, transform_indices = @transform_6, window_bounds = array<i64: 4, 1>}, {pipeline_mode = #tpu.pipeline_mode<synchronous>, transform_indices = @transform_7, window_bounds = array<i64: 4, 1>}, {pipeline_mode = #tpu.pipeline_mode<synchronous>, transform_indices = @transform_8, window_bounds = array<i64: 1, 1>}, {transform_indices = @transform_9, window_bounds = array<i64: 1, 4, 1>}, {pipeline_mode = #tpu.pipeline_mode<synchronous>, transform_indices = @transform_10, window_bounds = array<i64: 8, 4>}, {pipeline_mode = #tpu.pipeline_mode<synchronous>, transform_indices = @transform_11, window_bounds = array<i64: 8, 4>}, {pipeline_mode = #tpu.pipeline_mode<synchronous>, transform_indices = @transform_12, window_bounds = array<i64: 8, 1>}, {transform_indices = @transform_13, window_bounds = array<i64: 8, 256>}]} {
    %c0 = arith.constant 0 : index
    %c0_0 = arith.constant 0 : index
    %0 = vector.load %arg2[%c0, %c0_0] : memref<4x256xf32, #tpu.memory_space<vmem>>, vector<4x256xf32>
    %c0_1 = arith.constant 0 : index
    %c0_2 = arith.constant 0 : index
    %1 = vector.load %arg9[%c0_1, %c0_2] : memref<4x1xf32, #tpu.memory_space<vmem>>, vector<4x1xf32>
    %2 = vector.broadcast %1 : vector<4x1xf32> to vector<4x256xf32>
    %3 = arith.mulf %2, %0 : vector<4x256xf32>
    %cst = arith.constant dense<0.000000e+00> : vector<256xf32>
    %4 = vector.multi_reduction <add>, %3, %cst [0] : vector<4x256xf32> to vector<256xf32>
    %5 = vector.shape_cast %4 : vector<256xf32> to vector<1x256xf32>
    %c0_3 = arith.constant 0 : index
    %c0_4 = arith.constant 0 : index
    %6 = vector.load %arg10[%c0_3, %c0_4] : memref<1x1xf32, #tpu.memory_space<vmem>>, vector<1x1xf32>
    %7 = vector.broadcast %6 : vector<1x1xf32> to vector<1x256xf32>
    %8 = arith.addf %5, %7 : vector<1x256xf32>
    %9 = arith.negf %8 : vector<1x256xf32>
    %10 = math.exp %9 : vector<1x256xf32>
    %cst_5 = arith.constant 1.000000e+00 : f32
    %11 = vector.broadcast %cst_5 : f32 to vector<1x256xf32>
    %12 = arith.addf %11, %10 : vector<1x256xf32>
    %13 = arith.divf %11, %12 : vector<1x256xf32>
    %c0_6 = arith.constant 0 : index
    %c0_7 = arith.constant 0 : index
    %c0_8 = arith.constant 0 : index
    %14 = vector.load %arg11[%c0_6, %c0_7, %c0_8] : memref<1x4x1xf32, #tpu.memory_space<vmem>>, vector<1x4x1xf32>
    %15 = vector.shape_cast %14 : vector<1x4x1xf32> to vector<4x1xf32>
    %16 = vector.broadcast %13 : vector<1x256xf32> to vector<4x256xf32>
    %17 = arith.mulf %0, %16 : vector<4x256xf32>
    %18 = vector.broadcast %15 : vector<4x1xf32> to vector<4x256xf32>
    %19 = arith.mulf %0, %18 : vector<4x256xf32>
    %20 = arith.mulf %17, %19 : vector<4x256xf32>
    %21 = arith.addf %0, %20 : vector<4x256xf32>
    %c0_9 = arith.constant 0 : index
    %c0_10 = arith.constant 0 : index
    %22 = vector.load %arg3[%c0_9, %c0_10] : memref<4x256xf32, #tpu.memory_space<vmem>>, vector<4x256xf32>
    %c0_11 = arith.constant 0 : index
    %c0_12 = arith.constant 0 : index
    %23 = vector.load %arg5[%c0_11, %c0_12] : memref<4x1xf32, #tpu.memory_space<vmem>>, vector<4x1xf32>
    %c0_13 = arith.constant 0 : index
    %c0_14 = arith.constant 0 : index
    %24 = vector.load %arg6[%c0_13, %c0_14] : memref<4x1xf32, #tpu.memory_space<vmem>>, vector<4x1xf32>
    %c0_15 = arith.constant 0 : index
    %c0_16 = arith.constant 0 : index
    %25 = vector.load %arg7[%c0_15, %c0_16] : memref<4x1xf32, #tpu.memory_space<vmem>>, vector<4x1xf32>
    %c0_17 = arith.constant 0 : index
    %c0_18 = arith.constant 0 : index
    %26 = vector.load %arg8[%c0_17, %c0_18] : memref<4x1xf32, #tpu.memory_space<vmem>>, vector<4x1xf32>
    %cst_19 = arith.constant 7.812500e-03 : f32
    %27 = vector.broadcast %cst_19 : f32 to vector<4x1xf32>
    %28 = arith.mulf %23, %27 : vector<4x1xf32>
    %cst_20 = arith.constant 7.812500e-03 : f32
    %29 = vector.broadcast %cst_20 : f32 to vector<4x1xf32>
    %30 = arith.mulf %24, %29 : vector<4x1xf32>
    %31 = arith.mulf %28, %28 : vector<4x1xf32>
    %32 = arith.subf %30, %31 : vector<4x1xf32>
    %cst_21 = arith.constant 9.99999974E-6 : f32
    %33 = vector.broadcast %cst_21 : f32 to vector<4x1xf32>
    %34 = arith.addf %32, %33 : vector<4x1xf32>
    %35 = math.rsqrt %34 : vector<4x1xf32>
    %36 = arith.mulf %35, %25 : vector<4x1xf32>
    %37 = arith.mulf %28, %36 : vector<4x1xf32>
    %38 = arith.subf %26, %37 : vector<4x1xf32>
    %39 = vector.broadcast %36 : vector<4x1xf32> to vector<4x256xf32>
    %40 = arith.mulf %22, %39 : vector<4x256xf32>
    %41 = vector.broadcast %38 : vector<4x1xf32> to vector<4x256xf32>
    %42 = arith.addf %40, %41 : vector<4x256xf32>
    %c0_22 = arith.constant 0 : index
    %c0_23 = arith.constant 0 : index
    %43 = vector.load %arg4[%c0_22, %c0_23] : memref<1x256xf32, #tpu.memory_space<vmem>>, vector<1x256xf32>
    %44 = vector.broadcast %43 : vector<1x256xf32> to vector<4x256xf32>
    %45 = arith.mulf %42, %44 : vector<4x256xf32>
    %c0_24 = arith.constant 0 : index
    %c0_25 = arith.constant 0 : index
    %46 = vector.load %arg12[%c0_24, %c0_25] : memref<8x4xf32, #tpu.memory_space<vmem>>, vector<8x4xf32>
    %cst_26 = arith.constant dense<0.000000e+00> : vector<8x256xf32>
    %47 = tpu.matmul %46, %21, %cst_26 {dimension_numbers = #tpu.dot_dimension_numbers<[1], [0], [0], [1], [0, 0, 1, 1], [], []>} : vector<8x4xf32>, vector<4x256xf32>, vector<8x256xf32> -> vector<8x256xf32>
    %c0_27 = arith.constant 0 : index
    %c0_28 = arith.constant 0 : index
    %48 = vector.load %arg13[%c0_27, %c0_28] : memref<8x4xf32, #tpu.memory_space<vmem>>, vector<8x4xf32>
    %cst_29 = arith.constant dense<0.000000e+00> : vector<8x256xf32>
    %49 = tpu.matmul %48, %45, %cst_29 {dimension_numbers = #tpu.dot_dimension_numbers<[1], [0], [0], [1], [0, 0, 1, 1], [], []>} : vector<8x4xf32>, vector<4x256xf32>, vector<8x256xf32> -> vector<8x256xf32>
    %50 = arith.addf %47, %49 : vector<8x256xf32>
    %c0_30 = arith.constant 0 : index
    %c0_31 = arith.constant 0 : index
    %51 = vector.load %arg14[%c0_30, %c0_31] : memref<8x1xf32, #tpu.memory_space<vmem>>, vector<8x1xf32>
    %52 = vector.broadcast %51 : vector<8x1xf32> to vector<8x256xf32>
    %53 = arith.addf %50, %52 : vector<8x256xf32>
    %c0_32 = arith.constant 0 : index
    %c0_33 = arith.constant 0 : index
    %54 = vector.load %arg15[%c0_32, %c0_33] : memref<8x256xf32, #tpu.memory_space<vmem>>, vector<8x256xf32>
    tpu.vector_store %arg15[%c0_32, %c0_33], %53 {strides = array<i32>} : memref<8x256xf32, #tpu.memory_space<vmem>>, vector<8x256xf32>,
    return
  }
  func.func @transform_0(%arg0: i32, %arg1: i32) -> (i32, i32) {
    %c1_i32 = arith.constant 1 : i32
    %0 = arith.muli %arg0, %c1_i32 : i32
    %1 = arith.addi %0, %arg1 : i32
    %c0_i32 = arith.constant 0 : i32
    %c0_i32_0 = arith.constant 0 : i32
    return %c0_i32, %1 : i32, i32
  }
  func.func @transform_1(%arg0: i32, %arg1: i32) -> (i32, i32) {
    %c1_i32 = arith.constant 1 : i32
    %0 = arith.muli %arg0, %c1_i32 : i32
    %1 = arith.addi %0, %arg1 : i32
    %c0_i32 = arith.constant 0 : i32
    %c0_i32_0 = arith.constant 0 : i32
    return %c0_i32, %1 : i32, i32
  }
  func.func @transform_2(%arg0: i32, %arg1: i32) -> (i32, i32) {
    %c1_i32 = arith.constant 1 : i32
    %0 = arith.muli %arg0, %c1_i32 : i32
    %1 = arith.addi %0, %arg1 : i32
    %c0_i32 = arith.constant 0 : i32
    %c0_i32_0 = arith.constant 0 : i32
    return %c0_i32, %1 : i32, i32
  }
  func.func @transform_3(%arg0: i32, %arg1: i32) -> (i32, i32) {
    %c0_i32 = arith.constant 0 : i32
    %c0_i32_0 = arith.constant 0 : i32
    %c0_i32_1 = arith.constant 0 : i32
    return %c0_i32, %c0_i32_0 : i32, i32
  }
  func.func @transform_4(%arg0: i32, %arg1: i32) -> (i32, i32) {
    %c0_i32 = arith.constant 0 : i32
    %c0_i32_0 = arith.constant 0 : i32
    %c0_i32_1 = arith.constant 0 : i32
    return %c0_i32, %c0_i32_0 : i32, i32
  }
  func.func @transform_5(%arg0: i32, %arg1: i32) -> (i32, i32) {
    %c0_i32 = arith.constant 0 : i32
    %c0_i32_0 = arith.constant 0 : i32
    %c0_i32_1 = arith.constant 0 : i32
    return %c0_i32, %c0_i32_0 : i32, i32
  }
  func.func @transform_6(%arg0: i32, %arg1: i32) -> (i32, i32) {
    %c0_i32 = arith.constant 0 : i32
    %c0_i32_0 = arith.constant 0 : i32
    %c0_i32_1 = arith.constant 0 : i32
    return %c0_i32, %c0_i32_0 : i32, i32
  }
  func.func @transform_7(%arg0: i32, %arg1: i32) -> (i32, i32) {
    %c0_i32 = arith.constant 0 : i32
    %c0_i32_0 = arith.constant 0 : i32
    %c0_i32_1 = arith.constant 0 : i32
    return %c0_i32, %c0_i32_0 : i32, i32
  }
  func.func @transform_8(%arg0: i32, %arg1: i32) -> (i32, i32) {
    %c0_i32 = arith.constant 0 : i32
    %c0_i32_0 = arith.constant 0 : i32
    %c0_i32_1 = arith.constant 0 : i32
    return %c0_i32, %c0_i32_0 : i32, i32
  }
  func.func @transform_9(%arg0: i32, %arg1: i32) -> (i32, i32, i32) {
    %c0_i32 = arith.constant 0 : i32
    %c0_i32_0 = arith.constant 0 : i32
    %c0_i32_1 = arith.constant 0 : i32
    return %arg0, %c0_i32, %c0_i32_0 : i32, i32, i32
  }
  func.func @transform_10(%arg0: i32, %arg1: i32) -> (i32, i32) {
    %c0_i32 = arith.constant 0 : i32
    %c0_i32_0 = arith.constant 0 : i32
    %c0_i32_1 = arith.constant 0 : i32
    return %c0_i32, %c0_i32_0 : i32, i32
  }
  func.func @transform_11(%arg0: i32, %arg1: i32) -> (i32, i32) {
    %c0_i32 = arith.constant 0 : i32
    %c0_i32_0 = arith.constant 0 : i32
    %c0_i32_1 = arith.constant 0 : i32
    return %c0_i32, %c0_i32_0 : i32, i32
  }
  func.func @transform_12(%arg0: i32, %arg1: i32) -> (i32, i32) {
    %c0_i32 = arith.constant 0 : i32
    %c0_i32_0 = arith.constant 0 : i32
    %c0_i32_1 = arith.constant 0 : i32
    return %c0_i32, %c0_i32_0 : i32, i32
  }
  func.func @transform_13(%arg0: i32, %arg1: i32) -> (i32, i32) {
    %c1_i32 = arith.constant 1 : i32
    %0 = arith.muli %arg0, %c1_i32 : i32
    %1 = arith.addi %0, %arg1 : i32
    %c0_i32 = arith.constant 0 : i32
    %c0_i32_0 = arith.constant 0 : i32
    return %c0_i32, %1 : i32, i32
  }
}

module attributes {stable_mosaic.version = 11 : i64} {
  func.func @_pool_kernel(%arg0: i32, %arg1: i32, %arg2: memref<4x256xf32, #tpu.memory_space<vmem>>, %arg3: memref<1x4x1xf32, #tpu.memory_space<vmem>>) attributes {dimension_semantics = [#tpu.dimension_semantics<arbitrary>, #tpu.dimension_semantics<arbitrary>], iteration_bounds = array<i64: 2, 1>, scalar_prefetch = 0 : i64, scratch_operands = 0 : i64, tpu.core_type = #tpu.core_type<tc>, window_params = [{transform_indices = @transform_0, window_bounds = array<i64: 4, 256>}, {transform_indices = @transform_1, window_bounds = array<i64: 1, 4, 1>}]} {
    %c0 = arith.constant 0 : index
    %c0_0 = arith.constant 0 : index
    %0 = vector.load %arg2[%c0, %c0_0] : memref<4x256xf32, #tpu.memory_space<vmem>>, vector<4x256xf32>
    %c0_i32 = arith.constant 0 : i32
    %1 = arith.cmpi eq, %arg1, %c0_i32 : i32
    %2 = arith.extui %1 : i1 to i32
    %c0_i32_1 = arith.constant 0 : i32
    %3 = arith.cmpi ne, %2, %c0_i32_1 : i32
    scf.if %3 {
      %cst_8 = arith.constant 0.000000e+00 : f32
      %10 = vector.broadcast %cst_8 : f32 to vector<1x4x1xf32>
      %c0_9 = arith.constant 0 : index
      %c0_10 = arith.constant 0 : index
      %c0_11 = arith.constant 0 : index
      %11 = vector.load %arg3[%c0_9, %c0_10, %c0_11] : memref<1x4x1xf32, #tpu.memory_space<vmem>>, vector<1x4x1xf32>
      tpu.vector_store %arg3[%c0_9, %c0_10, %c0_11], %10 {strides = array<i32>} : memref<1x4x1xf32, #tpu.memory_space<vmem>>, vector<1x4x1xf32>,
    } else {
    }
    %c0_2 = arith.constant 0 : index
    %c0_3 = arith.constant 0 : index
    %c0_4 = arith.constant 0 : index
    %4 = vector.load %arg3[%c0_2, %c0_3, %c0_4] : memref<1x4x1xf32, #tpu.memory_space<vmem>>, vector<1x4x1xf32>
    %cst = arith.constant dense<0.000000e+00> : vector<4xf32>
    %5 = vector.multi_reduction <add>, %0, %cst [1] : vector<4x256xf32> to vector<4xf32>
    %6 = vector.shape_cast %5 : vector<4xf32> to vector<4x1xf32>
    %7 = vector.shape_cast %6 : vector<4x1xf32> to vector<1x4x1xf32>
    %8 = arith.addf %4, %7 : vector<1x4x1xf32>
    %c0_5 = arith.constant 0 : index
    %c0_6 = arith.constant 0 : index
    %c0_7 = arith.constant 0 : index
    %9 = vector.load %arg3[%c0_5, %c0_6, %c0_7] : memref<1x4x1xf32, #tpu.memory_space<vmem>>, vector<1x4x1xf32>
    tpu.vector_store %arg3[%c0_5, %c0_6, %c0_7], %8 {strides = array<i32>} : memref<1x4x1xf32, #tpu.memory_space<vmem>>, vector<1x4x1xf32>,
    return
  }
  func.func @transform_0(%arg0: i32, %arg1: i32) -> (i32, i32) {
    %c1_i32 = arith.constant 1 : i32
    %0 = arith.muli %arg0, %c1_i32 : i32
    %1 = arith.addi %0, %arg1 : i32
    %c0_i32 = arith.constant 0 : i32
    %c0_i32_0 = arith.constant 0 : i32
    return %c0_i32, %1 : i32, i32
  }
  func.func @transform_1(%arg0: i32, %arg1: i32) -> (i32, i32, i32) {
    %c0_i32 = arith.constant 0 : i32
    %c0_i32_0 = arith.constant 0 : i32
    %c0_i32_1 = arith.constant 0 : i32
    return %arg0, %c0_i32, %c0_i32_0 : i32, i32, i32
  }
}

module attributes {stable_mosaic.version = 11 : i64} {
  func.func @_conv_block_kernel(%arg0: i32, %arg1: i32, %arg2: memref<1x8x256xf32, #tpu.memory_space<vmem>>, %arg3: memref<1x8x8xf32, #tpu.memory_space<vmem>>, %arg4: memref<8x1xf32, #tpu.memory_space<vmem>>, %arg5: memref<8x256xf32, #tpu.memory_space<vmem>>, %arg6: memref<8x1xf32, #tpu.memory_space<vmem>>, %arg7: memref<8x1xf32, #tpu.memory_space<vmem>>) attributes {dimension_semantics = [#tpu.dimension_semantics<arbitrary>, #tpu.dimension_semantics<arbitrary>], iteration_bounds = array<i64: 2, 1>, scalar_prefetch = 0 : i64, scratch_operands = 0 : i64, tpu.core_type = #tpu.core_type<tc>, window_params = [{transform_indices = @transform_0, window_bounds = array<i64: 1, 8, 256>}, {pipeline_mode = #tpu.pipeline_mode<synchronous>, transform_indices = @transform_1, window_bounds = array<i64: 1, 8, 8>}, {pipeline_mode = #tpu.pipeline_mode<synchronous>, transform_indices = @transform_2, window_bounds = array<i64: 8, 1>}, {transform_indices = @transform_3, window_bounds = array<i64: 8, 256>}, {pipeline_mode = #tpu.pipeline_mode<synchronous>, transform_indices = @transform_4, window_bounds = array<i64: 8, 1>}, {pipeline_mode = #tpu.pipeline_mode<synchronous>, transform_indices = @transform_5, window_bounds = array<i64: 8, 1>}]} {
    %c0 = arith.constant 0 : index
    %c0_0 = arith.constant 0 : index
    %c0_1 = arith.constant 0 : index
    %0 = vector.load %arg2[%c0, %c0_0, %c0_1] : memref<1x8x256xf32, #tpu.memory_space<vmem>>, vector<1x8x256xf32>
    %1 = vector.shape_cast %0 : vector<1x8x256xf32> to vector<8x256xf32>
    %c0_2 = arith.constant 0 : index
    %c0_3 = arith.constant 0 : index
    %c0_4 = arith.constant 0 : index
    %2 = vector.load %arg3[%c0_2, %c0_3, %c0_4] : memref<1x8x8xf32, #tpu.memory_space<vmem>>, vector<1x8x8xf32>
    %3 = vector.shape_cast %2 : vector<1x8x8xf32> to vector<8x8xf32>
    %cst = arith.constant dense<0.000000e+00> : vector<8x256xf32>
    %4 = tpu.matmul %3, %1, %cst {dimension_numbers = #tpu.dot_dimension_numbers<[1], [0], [0], [1], [0, 0, 1, 1], [], []>} : vector<8x8xf32>, vector<8x256xf32>, vector<8x256xf32> -> vector<8x256xf32>
    %c0_5 = arith.constant 0 : index
    %c0_6 = arith.constant 0 : index
    %5 = vector.load %arg4[%c0_5, %c0_6] : memref<8x1xf32, #tpu.memory_space<vmem>>, vector<8x1xf32>
    %6 = vector.broadcast %5 : vector<8x1xf32> to vector<8x256xf32>
    %7 = arith.addf %4, %6 : vector<8x256xf32>
    %c0_7 = arith.constant 0 : index
    %c0_8 = arith.constant 0 : index
    %8 = vector.load %arg5[%c0_7, %c0_8] : memref<8x256xf32, #tpu.memory_space<vmem>>, vector<8x256xf32>
    tpu.vector_store %arg5[%c0_7, %c0_8], %7 {strides = array<i32>} : memref<8x256xf32, #tpu.memory_space<vmem>>, vector<8x256xf32>,
    %c0_i32 = arith.constant 0 : i32
    %9 = arith.cmpi eq, %arg0, %c0_i32 : i32
    %c0_i32_9 = arith.constant 0 : i32
    %10 = arith.cmpi eq, %arg1, %c0_i32_9 : i32
    %11 = arith.andi %9, %10 : i1
    %12 = arith.extui %11 : i1 to i32
    %c0_i32_10 = arith.constant 0 : i32
    %13 = arith.cmpi ne, %12, %c0_i32_10 : i32
    scf.if %13 {
      %cst_21 = arith.constant 0.000000e+00 : f32
      %25 = vector.broadcast %cst_21 : f32 to vector<8x1xf32>
      %c0_22 = arith.constant 0 : index
      %c0_23 = arith.constant 0 : index
      %26 = vector.load %arg6[%c0_22, %c0_23] : memref<8x1xf32, #tpu.memory_space<vmem>>, vector<8x1xf32>
      tpu.vector_store %arg6[%c0_22, %c0_23], %25 {strides = array<i32>} : memref<8x1xf32, #tpu.memory_space<vmem>>, vector<8x1xf32>,
      %cst_24 = arith.constant 0.000000e+00 : f32
      %27 = vector.broadcast %cst_24 : f32 to vector<8x1xf32>
      %c0_25 = arith.constant 0 : index
      %c0_26 = arith.constant 0 : index
      %28 = vector.load %arg7[%c0_25, %c0_26] : memref<8x1xf32, #tpu.memory_space<vmem>>, vector<8x1xf32>
      tpu.vector_store %arg7[%c0_25, %c0_26], %27 {strides = array<i32>} : memref<8x1xf32, #tpu.memory_space<vmem>>, vector<8x1xf32>,
    } else {
    }
    %c0_11 = arith.constant 0 : index
    %c0_12 = arith.constant 0 : index
    %14 = vector.load %arg6[%c0_11, %c0_12] : memref<8x1xf32, #tpu.memory_space<vmem>>, vector<8x1xf32>
    %cst_13 = arith.constant dense<0.000000e+00> : vector<8xf32>
    %15 = vector.multi_reduction <add>, %7, %cst_13 [1] : vector<8x256xf32> to vector<8xf32>
    %16 = vector.shape_cast %15 : vector<8xf32> to vector<8x1xf32>
    %17 = arith.addf %14, %16 : vector<8x1xf32>
    %c0_14 = arith.constant 0 : index
    %c0_15 = arith.constant 0 : index
    %18 = vector.load %arg6[%c0_14, %c0_15] : memref<8x1xf32, #tpu.memory_space<vmem>>, vector<8x1xf32>
    tpu.vector_store %arg6[%c0_14, %c0_15], %17 {strides = array<i32>} : memref<8x1xf32, #tpu.memory_space<vmem>>, vector<8x1xf32>,
    %c0_16 = arith.constant 0 : index
    %c0_17 = arith.constant 0 : index
    %19 = vector.load %arg7[%c0_16, %c0_17] : memref<8x1xf32, #tpu.memory_space<vmem>>, vector<8x1xf32>
    %20 = arith.mulf %7, %7 : vector<8x256xf32>
    %cst_18 = arith.constant dense<0.000000e+00> : vector<8xf32>
    %21 = vector.multi_reduction <add>, %20, %cst_18 [1] : vector<8x256xf32> to vector<8xf32>
    %22 = vector.shape_cast %21 : vector<8xf32> to vector<8x1xf32>
    %23 = arith.addf %19, %22 : vector<8x1xf32>
    %c0_19 = arith.constant 0 : index
    %c0_20 = arith.constant 0 : index
    %24 = vector.load %arg7[%c0_19, %c0_20] : memref<8x1xf32, #tpu.memory_space<vmem>>, vector<8x1xf32>
    tpu.vector_store %arg7[%c0_19, %c0_20], %23 {strides = array<i32>} : memref<8x1xf32, #tpu.memory_space<vmem>>, vector<8x1xf32>,
    return
  }
  func.func @transform_0(%arg0: i32, %arg1: i32) -> (i32, i32, i32) {
    %c1_i32 = arith.constant 1 : i32
    %0 = arith.muli %arg0, %c1_i32 : i32
    %1 = arith.addi %0, %arg1 : i32
    %c0_i32 = arith.constant 0 : i32
    %c0_i32_0 = arith.constant 0 : i32
    %c0_i32_1 = arith.constant 0 : i32
    return %c0_i32, %c0_i32_0, %1 : i32, i32, i32
  }
  func.func @transform_1(%arg0: i32, %arg1: i32) -> (i32, i32, i32) {
    %c0_i32 = arith.constant 0 : i32
    %c0_i32_0 = arith.constant 0 : i32
    %c0_i32_1 = arith.constant 0 : i32
    %c0_i32_2 = arith.constant 0 : i32
    return %c0_i32, %c0_i32_0, %c0_i32_1 : i32, i32, i32
  }
  func.func @transform_2(%arg0: i32, %arg1: i32) -> (i32, i32) {
    %c0_i32 = arith.constant 0 : i32
    %c0_i32_0 = arith.constant 0 : i32
    %c0_i32_1 = arith.constant 0 : i32
    return %c0_i32, %c0_i32_0 : i32, i32
  }
  func.func @transform_3(%arg0: i32, %arg1: i32) -> (i32, i32) {
    %c1_i32 = arith.constant 1 : i32
    %0 = arith.muli %arg0, %c1_i32 : i32
    %1 = arith.addi %0, %arg1 : i32
    %c0_i32 = arith.constant 0 : i32
    %c0_i32_0 = arith.constant 0 : i32
    return %c0_i32, %1 : i32, i32
  }
  func.func @transform_4(%arg0: i32, %arg1: i32) -> (i32, i32) {
    %c0_i32 = arith.constant 0 : i32
    %c0_i32_0 = arith.constant 0 : i32
    %c0_i32_1 = arith.constant 0 : i32
    return %c0_i32, %c0_i32_0 : i32, i32
  }
  func.func @transform_5(%arg0: i32, %arg1: i32) -> (i32, i32) {
    %c0_i32 = arith.constant 0 : i32
    %c0_i32_0 = arith.constant 0 : i32
    %c0_i32_1 = arith.constant 0 : i32
    return %c0_i32, %c0_i32_0 : i32, i32
  }
}

module attributes {stable_mosaic.version = 11 : i64} {
  func.func @_pool_kernel(%arg0: i32, %arg1: i32, %arg2: memref<8x256xf32, #tpu.memory_space<vmem>>, %arg3: memref<8x1xf32, #tpu.memory_space<vmem>>, %arg4: memref<8x1xf32, #tpu.memory_space<vmem>>, %arg5: memref<8x1xf32, #tpu.memory_space<vmem>>, %arg6: memref<8x1xf32, #tpu.memory_space<vmem>>, %arg7: memref<1x8x1xf32, #tpu.memory_space<vmem>>) attributes {dimension_semantics = [#tpu.dimension_semantics<arbitrary>, #tpu.dimension_semantics<arbitrary>], iteration_bounds = array<i64: 2, 1>, scalar_prefetch = 0 : i64, scratch_operands = 0 : i64, tpu.core_type = #tpu.core_type<tc>, window_params = [{transform_indices = @transform_0, window_bounds = array<i64: 8, 256>}, {pipeline_mode = #tpu.pipeline_mode<synchronous>, transform_indices = @transform_1, window_bounds = array<i64: 8, 1>}, {pipeline_mode = #tpu.pipeline_mode<synchronous>, transform_indices = @transform_2, window_bounds = array<i64: 8, 1>}, {pipeline_mode = #tpu.pipeline_mode<synchronous>, transform_indices = @transform_3, window_bounds = array<i64: 8, 1>}, {pipeline_mode = #tpu.pipeline_mode<synchronous>, transform_indices = @transform_4, window_bounds = array<i64: 8, 1>}, {transform_indices = @transform_5, window_bounds = array<i64: 1, 8, 1>}]} {
    %c0 = arith.constant 0 : index
    %c0_0 = arith.constant 0 : index
    %0 = vector.load %arg2[%c0, %c0_0] : memref<8x256xf32, #tpu.memory_space<vmem>>, vector<8x256xf32>
    %c0_1 = arith.constant 0 : index
    %c0_2 = arith.constant 0 : index
    %1 = vector.load %arg3[%c0_1, %c0_2] : memref<8x1xf32, #tpu.memory_space<vmem>>, vector<8x1xf32>
    %c0_3 = arith.constant 0 : index
    %c0_4 = arith.constant 0 : index
    %2 = vector.load %arg4[%c0_3, %c0_4] : memref<8x1xf32, #tpu.memory_space<vmem>>, vector<8x1xf32>
    %c0_5 = arith.constant 0 : index
    %c0_6 = arith.constant 0 : index
    %3 = vector.load %arg5[%c0_5, %c0_6] : memref<8x1xf32, #tpu.memory_space<vmem>>, vector<8x1xf32>
    %c0_7 = arith.constant 0 : index
    %c0_8 = arith.constant 0 : index
    %4 = vector.load %arg6[%c0_7, %c0_8] : memref<8x1xf32, #tpu.memory_space<vmem>>, vector<8x1xf32>
    %cst = arith.constant 0.001953125 : f32
    %5 = vector.broadcast %cst : f32 to vector<8x1xf32>
    %6 = arith.mulf %1, %5 : vector<8x1xf32>
    %cst_9 = arith.constant 0.001953125 : f32
    %7 = vector.broadcast %cst_9 : f32 to vector<8x1xf32>
    %8 = arith.mulf %2, %7 : vector<8x1xf32>
    %9 = arith.mulf %6, %6 : vector<8x1xf32>
    %10 = arith.subf %8, %9 : vector<8x1xf32>
    %cst_10 = arith.constant 9.99999974E-6 : f32
    %11 = vector.broadcast %cst_10 : f32 to vector<8x1xf32>
    %12 = arith.addf %10, %11 : vector<8x1xf32>
    %13 = math.rsqrt %12 : vector<8x1xf32>
    %14 = arith.mulf %13, %3 : vector<8x1xf32>
    %15 = arith.mulf %6, %14 : vector<8x1xf32>
    %16 = arith.subf %4, %15 : vector<8x1xf32>
    %17 = vector.broadcast %14 : vector<8x1xf32> to vector<8x256xf32>
    %18 = arith.mulf %0, %17 : vector<8x256xf32>
    %19 = vector.broadcast %16 : vector<8x1xf32> to vector<8x256xf32>
    %20 = arith.addf %18, %19 : vector<8x256xf32>
    %cst_11 = arith.constant 0.000000e+00 : f32
    %21 = vector.broadcast %cst_11 : f32 to vector<8x256xf32>
    %22 = arith.maximumf %20, %21 : vector<8x256xf32>
    %c0_i32 = arith.constant 0 : i32
    %23 = arith.cmpi eq, %arg1, %c0_i32 : i32
    %24 = arith.extui %23 : i1 to i32
    %c0_i32_12 = arith.constant 0 : i32
    %25 = arith.cmpi ne, %24, %c0_i32_12 : i32
    scf.if %25 {
      %cst_20 = arith.constant 0.000000e+00 : f32
      %32 = vector.broadcast %cst_20 : f32 to vector<1x8x1xf32>
      %c0_21 = arith.constant 0 : index
      %c0_22 = arith.constant 0 : index
      %c0_23 = arith.constant 0 : index
      %33 = vector.load %arg7[%c0_21, %c0_22, %c0_23] : memref<1x8x1xf32, #tpu.memory_space<vmem>>, vector<1x8x1xf32>
      tpu.vector_store %arg7[%c0_21, %c0_22, %c0_23], %32 {strides = array<i32>} : memref<1x8x1xf32, #tpu.memory_space<vmem>>, vector<1x8x1xf32>,
    } else {
    }
    %c0_13 = arith.constant 0 : index
    %c0_14 = arith.constant 0 : index
    %c0_15 = arith.constant 0 : index
    %26 = vector.load %arg7[%c0_13, %c0_14, %c0_15] : memref<1x8x1xf32, #tpu.memory_space<vmem>>, vector<1x8x1xf32>
    %cst_16 = arith.constant dense<0.000000e+00> : vector<8xf32>
    %27 = vector.multi_reduction <add>, %22, %cst_16 [1] : vector<8x256xf32> to vector<8xf32>
    %28 = vector.shape_cast %27 : vector<8xf32> to vector<8x1xf32>
    %29 = vector.shape_cast %28 : vector<8x1xf32> to vector<1x8x1xf32>
    %30 = arith.addf %26, %29 : vector<1x8x1xf32>
    %c0_17 = arith.constant 0 : index
    %c0_18 = arith.constant 0 : index
    %c0_19 = arith.constant 0 : index
    %31 = vector.load %arg7[%c0_17, %c0_18, %c0_19] : memref<1x8x1xf32, #tpu.memory_space<vmem>>, vector<1x8x1xf32>
    tpu.vector_store %arg7[%c0_17, %c0_18, %c0_19], %30 {strides = array<i32>} : memref<1x8x1xf32, #tpu.memory_space<vmem>>, vector<1x8x1xf32>,
    return
  }
  func.func @transform_0(%arg0: i32, %arg1: i32) -> (i32, i32) {
    %c1_i32 = arith.constant 1 : i32
    %0 = arith.muli %arg0, %c1_i32 : i32
    %1 = arith.addi %0, %arg1 : i32
    %c0_i32 = arith.constant 0 : i32
    %c0_i32_0 = arith.constant 0 : i32
    return %c0_i32, %1 : i32, i32
  }
  func.func @transform_1(%arg0: i32, %arg1: i32) -> (i32, i32) {
    %c0_i32 = arith.constant 0 : i32
    %c0_i32_0 = arith.constant 0 : i32
    %c0_i32_1 = arith.constant 0 : i32
    return %c0_i32, %c0_i32_0 : i32, i32
  }
  func.func @transform_2(%arg0: i32, %arg1: i32) -> (i32, i32) {
    %c0_i32 = arith.constant 0 : i32
    %c0_i32_0 = arith.constant 0 : i32
    %c0_i32_1 = arith.constant 0 : i32
    return %c0_i32, %c0_i32_0 : i32, i32
  }
  func.func @transform_3(%arg0: i32, %arg1: i32) -> (i32, i32) {
    %c0_i32 = arith.constant 0 : i32
    %c0_i32_0 = arith.constant 0 : i32
    %c0_i32_1 = arith.constant 0 : i32
    return %c0_i32, %c0_i32_0 : i32, i32
  }
  func.func @transform_4(%arg0: i32, %arg1: i32) -> (i32, i32) {
    %c0_i32 = arith.constant 0 : i32
    %c0_i32_0 = arith.constant 0 : i32
    %c0_i32_1 = arith.constant 0 : i32
    return %c0_i32, %c0_i32_0 : i32, i32
  }
  func.func @transform_5(%arg0: i32, %arg1: i32) -> (i32, i32, i32) {
    %c0_i32 = arith.constant 0 : i32
    %c0_i32_0 = arith.constant 0 : i32
    %c0_i32_1 = arith.constant 0 : i32
    return %arg0, %c0_i32, %c0_i32_0 : i32, i32, i32
  }
}

module attributes {stable_mosaic.version = 11 : i64} {
  func.func @_conv_block_kernel(%arg0: i32, %arg1: i32, %arg2: memref<9x8x256xf32, #tpu.memory_space<vmem>>, %arg3: memref<8x1xf32, #tpu.memory_space<vmem>>, %arg4: memref<8x1xf32, #tpu.memory_space<vmem>>, %arg5: memref<8x1xf32, #tpu.memory_space<vmem>>, %arg6: memref<8x1xf32, #tpu.memory_space<vmem>>, %arg7: memref<9x8x1xf32, #tpu.memory_space<vmem>>, %arg8: memref<8x1xf32, #tpu.memory_space<vmem>>, %arg9: memref<8x256xf32, #tpu.memory_space<vmem>>, %arg10: memref<8x1xf32, #tpu.memory_space<vmem>>, %arg11: memref<8x1xf32, #tpu.memory_space<vmem>>) attributes {dimension_semantics = [#tpu.dimension_semantics<arbitrary>, #tpu.dimension_semantics<arbitrary>], iteration_bounds = array<i64: 2, 1>, scalar_prefetch = 0 : i64, scratch_operands = 0 : i64, tpu.core_type = #tpu.core_type<tc>, window_params = [{transform_indices = @transform_0, window_bounds = array<i64: 9, 8, 256>}, {pipeline_mode = #tpu.pipeline_mode<synchronous>, transform_indices = @transform_1, window_bounds = array<i64: 8, 1>}, {pipeline_mode = #tpu.pipeline_mode<synchronous>, transform_indices = @transform_2, window_bounds = array<i64: 8, 1>}, {pipeline_mode = #tpu.pipeline_mode<synchronous>, transform_indices = @transform_3, window_bounds = array<i64: 8, 1>}, {pipeline_mode = #tpu.pipeline_mode<synchronous>, transform_indices = @transform_4, window_bounds = array<i64: 8, 1>}, {pipeline_mode = #tpu.pipeline_mode<synchronous>, transform_indices = @transform_5, window_bounds = array<i64: 9, 8, 1>}, {pipeline_mode = #tpu.pipeline_mode<synchronous>, transform_indices = @transform_6, window_bounds = array<i64: 8, 1>}, {transform_indices = @transform_7, window_bounds = array<i64: 8, 256>}, {pipeline_mode = #tpu.pipeline_mode<synchronous>, transform_indices = @transform_8, window_bounds = array<i64: 8, 1>}, {pipeline_mode = #tpu.pipeline_mode<synchronous>, transform_indices = @transform_9, window_bounds = array<i64: 8, 1>}]} {
    %c0 = arith.constant 0 : index
    %c0_0 = arith.constant 0 : index
    %0 = vector.load %arg3[%c0, %c0_0] : memref<8x1xf32, #tpu.memory_space<vmem>>, vector<8x1xf32>
    %c0_1 = arith.constant 0 : index
    %c0_2 = arith.constant 0 : index
    %1 = vector.load %arg4[%c0_1, %c0_2] : memref<8x1xf32, #tpu.memory_space<vmem>>, vector<8x1xf32>
    %c0_3 = arith.constant 0 : index
    %c0_4 = arith.constant 0 : index
    %2 = vector.load %arg5[%c0_3, %c0_4] : memref<8x1xf32, #tpu.memory_space<vmem>>, vector<8x1xf32>
    %c0_5 = arith.constant 0 : index
    %c0_6 = arith.constant 0 : index
    %3 = vector.load %arg6[%c0_5, %c0_6] : memref<8x1xf32, #tpu.memory_space<vmem>>, vector<8x1xf32>
    %cst = arith.constant 0.001953125 : f32
    %4 = vector.broadcast %cst : f32 to vector<8x1xf32>
    %5 = arith.mulf %0, %4 : vector<8x1xf32>
    %cst_7 = arith.constant 0.001953125 : f32
    %6 = vector.broadcast %cst_7 : f32 to vector<8x1xf32>
    %7 = arith.mulf %1, %6 : vector<8x1xf32>
    %8 = arith.mulf %5, %5 : vector<8x1xf32>
    %9 = arith.subf %7, %8 : vector<8x1xf32>
    %cst_8 = arith.constant 9.99999974E-6 : f32
    %10 = vector.broadcast %cst_8 : f32 to vector<8x1xf32>
    %11 = arith.addf %9, %10 : vector<8x1xf32>
    %12 = math.rsqrt %11 : vector<8x1xf32>
    %13 = arith.mulf %12, %2 : vector<8x1xf32>
    %14 = arith.mulf %5, %13 : vector<8x1xf32>
    %15 = arith.subf %3, %14 : vector<8x1xf32>
    %c0_9 = arith.constant 0 : index
    %c0_10 = arith.constant 0 : index
    %c0_11 = arith.constant 0 : index
    %16 = vector.load %arg2[%c0_9, %c0_10, %c0_11] : memref<9x8x256xf32, #tpu.memory_space<vmem>>, vector<1x8x256xf32>
    %17 = vector.shape_cast %16 : vector<1x8x256xf32> to vector<8x256xf32>
    %18 = vector.broadcast %13 : vector<8x1xf32> to vector<8x256xf32>
    %19 = arith.mulf %17, %18 : vector<8x256xf32>
    %20 = vector.broadcast %15 : vector<8x1xf32> to vector<8x256xf32>
    %21 = arith.addf %19, %20 : vector<8x256xf32>
    %cst_12 = arith.constant 0.000000e+00 : f32
    %22 = vector.broadcast %cst_12 : f32 to vector<8x256xf32>
    %23 = arith.maximumf %21, %22 : vector<8x256xf32>
    %c0_13 = arith.constant 0 : index
    %c0_14 = arith.constant 0 : index
    %c0_15 = arith.constant 0 : index
    %24 = vector.load %arg7[%c0_13, %c0_14, %c0_15] : memref<9x8x1xf32, #tpu.memory_space<vmem>>, vector<1x8x1xf32>
    %25 = vector.shape_cast %24 : vector<1x8x1xf32> to vector<8x1xf32>
    %26 = vector.broadcast %25 : vector<8x1xf32> to vector<8x256xf32>
    %27 = arith.mulf %26, %23 : vector<8x256xf32>
    %c1 = arith.constant 1 : index
    %c0_16 = arith.constant 0 : index
    %c0_17 = arith.constant 0 : index
    %28 = vector.load %arg2[%c1, %c0_16, %c0_17] : memref<9x8x256xf32, #tpu.memory_space<vmem>>, vector<1x8x256xf32>
    %29 = vector.shape_cast %28 : vector<1x8x256xf32> to vector<8x256xf32>
    %30 = vector.broadcast %13 : vector<8x1xf32> to vector<8x256xf32>
    %31 = arith.mulf %29, %30 : vector<8x256xf32>
    %32 = vector.broadcast %15 : vector<8x1xf32> to vector<8x256xf32>
    %33 = arith.addf %31, %32 : vector<8x256xf32>
    %cst_18 = arith.constant 0.000000e+00 : f32
    %34 = vector.broadcast %cst_18 : f32 to vector<8x256xf32>
    %35 = arith.maximumf %33, %34 : vector<8x256xf32>
    %c1_19 = arith.constant 1 : index
    %c0_20 = arith.constant 0 : index
    %c0_21 = arith.constant 0 : index
    %36 = vector.load %arg7[%c1_19, %c0_20, %c0_21] : memref<9x8x1xf32, #tpu.memory_space<vmem>>, vector<1x8x1xf32>
    %37 = vector.shape_cast %36 : vector<1x8x1xf32> to vector<8x1xf32>
    %38 = vector.broadcast %37 : vector<8x1xf32> to vector<8x256xf32>
    %39 = arith.mulf %38, %35 : vector<8x256xf32>
    %40 = arith.addf %27, %39 : vector<8x256xf32>
    %c2 = arith.constant 2 : index
    %c0_22 = arith.constant 0 : index
    %c0_23 = arith.constant 0 : index
    %41 = vector.load %arg2[%c2, %c0_22, %c0_23] : memref<9x8x256xf32, #tpu.memory_space<vmem>>, vector<1x8x256xf32>
    %42 = vector.shape_cast %41 : vector<1x8x256xf32> to vector<8x256xf32>
    %43 = vector.broadcast %13 : vector<8x1xf32> to vector<8x256xf32>
    %44 = arith.mulf %42, %43 : vector<8x256xf32>
    %45 = vector.broadcast %15 : vector<8x1xf32> to vector<8x256xf32>
    %46 = arith.addf %44, %45 : vector<8x256xf32>
    %cst_24 = arith.constant 0.000000e+00 : f32
    %47 = vector.broadcast %cst_24 : f32 to vector<8x256xf32>
    %48 = arith.maximumf %46, %47 : vector<8x256xf32>
    %c2_25 = arith.constant 2 : index
    %c0_26 = arith.constant 0 : index
    %c0_27 = arith.constant 0 : index
    %49 = vector.load %arg7[%c2_25, %c0_26, %c0_27] : memref<9x8x1xf32, #tpu.memory_space<vmem>>, vector<1x8x1xf32>
    %50 = vector.shape_cast %49 : vector<1x8x1xf32> to vector<8x1xf32>
    %51 = vector.broadcast %50 : vector<8x1xf32> to vector<8x256xf32>
    %52 = arith.mulf %51, %48 : vector<8x256xf32>
    %53 = arith.addf %40, %52 : vector<8x256xf32>
    %c3 = arith.constant 3 : index
    %c0_28 = arith.constant 0 : index
    %c0_29 = arith.constant 0 : index
    %54 = vector.load %arg2[%c3, %c0_28, %c0_29] : memref<9x8x256xf32, #tpu.memory_space<vmem>>, vector<1x8x256xf32>
    %55 = vector.shape_cast %54 : vector<1x8x256xf32> to vector<8x256xf32>
    %56 = vector.broadcast %13 : vector<8x1xf32> to vector<8x256xf32>
    %57 = arith.mulf %55, %56 : vector<8x256xf32>
    %58 = vector.broadcast %15 : vector<8x1xf32> to vector<8x256xf32>
    %59 = arith.addf %57, %58 : vector<8x256xf32>
    %cst_30 = arith.constant 0.000000e+00 : f32
    %60 = vector.broadcast %cst_30 : f32 to vector<8x256xf32>
    %61 = arith.maximumf %59, %60 : vector<8x256xf32>
    %c3_31 = arith.constant 3 : index
    %c0_32 = arith.constant 0 : index
    %c0_33 = arith.constant 0 : index
    %62 = vector.load %arg7[%c3_31, %c0_32, %c0_33] : memref<9x8x1xf32, #tpu.memory_space<vmem>>, vector<1x8x1xf32>
    %63 = vector.shape_cast %62 : vector<1x8x1xf32> to vector<8x1xf32>
    %64 = vector.broadcast %63 : vector<8x1xf32> to vector<8x256xf32>
    %65 = arith.mulf %64, %61 : vector<8x256xf32>
    %66 = arith.addf %53, %65 : vector<8x256xf32>
    %c4 = arith.constant 4 : index
    %c0_34 = arith.constant 0 : index
    %c0_35 = arith.constant 0 : index
    %67 = vector.load %arg2[%c4, %c0_34, %c0_35] : memref<9x8x256xf32, #tpu.memory_space<vmem>>, vector<1x8x256xf32>
    %68 = vector.shape_cast %67 : vector<1x8x256xf32> to vector<8x256xf32>
    %69 = vector.broadcast %13 : vector<8x1xf32> to vector<8x256xf32>
    %70 = arith.mulf %68, %69 : vector<8x256xf32>
    %71 = vector.broadcast %15 : vector<8x1xf32> to vector<8x256xf32>
    %72 = arith.addf %70, %71 : vector<8x256xf32>
    %cst_36 = arith.constant 0.000000e+00 : f32
    %73 = vector.broadcast %cst_36 : f32 to vector<8x256xf32>
    %74 = arith.maximumf %72, %73 : vector<8x256xf32>
    %c4_37 = arith.constant 4 : index
    %c0_38 = arith.constant 0 : index
    %c0_39 = arith.constant 0 : index
    %75 = vector.load %arg7[%c4_37, %c0_38, %c0_39] : memref<9x8x1xf32, #tpu.memory_space<vmem>>, vector<1x8x1xf32>
    %76 = vector.shape_cast %75 : vector<1x8x1xf32> to vector<8x1xf32>
    %77 = vector.broadcast %76 : vector<8x1xf32> to vector<8x256xf32>
    %78 = arith.mulf %77, %74 : vector<8x256xf32>
    %79 = arith.addf %66, %78 : vector<8x256xf32>
    %c5 = arith.constant 5 : index
    %c0_40 = arith.constant 0 : index
    %c0_41 = arith.constant 0 : index
    %80 = vector.load %arg2[%c5, %c0_40, %c0_41] : memref<9x8x256xf32, #tpu.memory_space<vmem>>, vector<1x8x256xf32>
    %81 = vector.shape_cast %80 : vector<1x8x256xf32> to vector<8x256xf32>
    %82 = vector.broadcast %13 : vector<8x1xf32> to vector<8x256xf32>
    %83 = arith.mulf %81, %82 : vector<8x256xf32>
    %84 = vector.broadcast %15 : vector<8x1xf32> to vector<8x256xf32>
    %85 = arith.addf %83, %84 : vector<8x256xf32>
    %cst_42 = arith.constant 0.000000e+00 : f32
    %86 = vector.broadcast %cst_42 : f32 to vector<8x256xf32>
    %87 = arith.maximumf %85, %86 : vector<8x256xf32>
    %c5_43 = arith.constant 5 : index
    %c0_44 = arith.constant 0 : index
    %c0_45 = arith.constant 0 : index
    %88 = vector.load %arg7[%c5_43, %c0_44, %c0_45] : memref<9x8x1xf32, #tpu.memory_space<vmem>>, vector<1x8x1xf32>
    %89 = vector.shape_cast %88 : vector<1x8x1xf32> to vector<8x1xf32>
    %90 = vector.broadcast %89 : vector<8x1xf32> to vector<8x256xf32>
    %91 = arith.mulf %90, %87 : vector<8x256xf32>
    %92 = arith.addf %79, %91 : vector<8x256xf32>
    %c6 = arith.constant 6 : index
    %c0_46 = arith.constant 0 : index
    %c0_47 = arith.constant 0 : index
    %93 = vector.load %arg2[%c6, %c0_46, %c0_47] : memref<9x8x256xf32, #tpu.memory_space<vmem>>, vector<1x8x256xf32>
    %94 = vector.shape_cast %93 : vector<1x8x256xf32> to vector<8x256xf32>
    %95 = vector.broadcast %13 : vector<8x1xf32> to vector<8x256xf32>
    %96 = arith.mulf %94, %95 : vector<8x256xf32>
    %97 = vector.broadcast %15 : vector<8x1xf32> to vector<8x256xf32>
    %98 = arith.addf %96, %97 : vector<8x256xf32>
    %cst_48 = arith.constant 0.000000e+00 : f32
    %99 = vector.broadcast %cst_48 : f32 to vector<8x256xf32>
    %100 = arith.maximumf %98, %99 : vector<8x256xf32>
    %c6_49 = arith.constant 6 : index
    %c0_50 = arith.constant 0 : index
    %c0_51 = arith.constant 0 : index
    %101 = vector.load %arg7[%c6_49, %c0_50, %c0_51] : memref<9x8x1xf32, #tpu.memory_space<vmem>>, vector<1x8x1xf32>
    %102 = vector.shape_cast %101 : vector<1x8x1xf32> to vector<8x1xf32>
    %103 = vector.broadcast %102 : vector<8x1xf32> to vector<8x256xf32>
    %104 = arith.mulf %103, %100 : vector<8x256xf32>
    %105 = arith.addf %92, %104 : vector<8x256xf32>
    %c7 = arith.constant 7 : index
    %c0_52 = arith.constant 0 : index
    %c0_53 = arith.constant 0 : index
    %106 = vector.load %arg2[%c7, %c0_52, %c0_53] : memref<9x8x256xf32, #tpu.memory_space<vmem>>, vector<1x8x256xf32>
    %107 = vector.shape_cast %106 : vector<1x8x256xf32> to vector<8x256xf32>
    %108 = vector.broadcast %13 : vector<8x1xf32> to vector<8x256xf32>
    %109 = arith.mulf %107, %108 : vector<8x256xf32>
    %110 = vector.broadcast %15 : vector<8x1xf32> to vector<8x256xf32>
    %111 = arith.addf %109, %110 : vector<8x256xf32>
    %cst_54 = arith.constant 0.000000e+00 : f32
    %112 = vector.broadcast %cst_54 : f32 to vector<8x256xf32>
    %113 = arith.maximumf %111, %112 : vector<8x256xf32>
    %c7_55 = arith.constant 7 : index
    %c0_56 = arith.constant 0 : index
    %c0_57 = arith.constant 0 : index
    %114 = vector.load %arg7[%c7_55, %c0_56, %c0_57] : memref<9x8x1xf32, #tpu.memory_space<vmem>>, vector<1x8x1xf32>
    %115 = vector.shape_cast %114 : vector<1x8x1xf32> to vector<8x1xf32>
    %116 = vector.broadcast %115 : vector<8x1xf32> to vector<8x256xf32>
    %117 = arith.mulf %116, %113 : vector<8x256xf32>
    %118 = arith.addf %105, %117 : vector<8x256xf32>
    %c8 = arith.constant 8 : index
    %c0_58 = arith.constant 0 : index
    %c0_59 = arith.constant 0 : index
    %119 = vector.load %arg2[%c8, %c0_58, %c0_59] : memref<9x8x256xf32, #tpu.memory_space<vmem>>, vector<1x8x256xf32>
    %120 = vector.shape_cast %119 : vector<1x8x256xf32> to vector<8x256xf32>
    %121 = vector.broadcast %13 : vector<8x1xf32> to vector<8x256xf32>
    %122 = arith.mulf %120, %121 : vector<8x256xf32>
    %123 = vector.broadcast %15 : vector<8x1xf32> to vector<8x256xf32>
    %124 = arith.addf %122, %123 : vector<8x256xf32>
    %cst_60 = arith.constant 0.000000e+00 : f32
    %125 = vector.broadcast %cst_60 : f32 to vector<8x256xf32>
    %126 = arith.maximumf %124, %125 : vector<8x256xf32>
    %c8_61 = arith.constant 8 : index
    %c0_62 = arith.constant 0 : index
    %c0_63 = arith.constant 0 : index
    %127 = vector.load %arg7[%c8_61, %c0_62, %c0_63] : memref<9x8x1xf32, #tpu.memory_space<vmem>>, vector<1x8x1xf32>
    %128 = vector.shape_cast %127 : vector<1x8x1xf32> to vector<8x1xf32>
    %129 = vector.broadcast %128 : vector<8x1xf32> to vector<8x256xf32>
    %130 = arith.mulf %129, %126 : vector<8x256xf32>
    %131 = arith.addf %118, %130 : vector<8x256xf32>
    %c0_64 = arith.constant 0 : index
    %c0_65 = arith.constant 0 : index
    %132 = vector.load %arg8[%c0_64, %c0_65] : memref<8x1xf32, #tpu.memory_space<vmem>>, vector<8x1xf32>
    %133 = vector.broadcast %132 : vector<8x1xf32> to vector<8x256xf32>
    %134 = arith.addf %131, %133 : vector<8x256xf32>
    %c0_66 = arith.constant 0 : index
    %c0_67 = arith.constant 0 : index
    %135 = vector.load %arg9[%c0_66, %c0_67] : memref<8x256xf32, #tpu.memory_space<vmem>>, vector<8x256xf32>
    tpu.vector_store %arg9[%c0_66, %c0_67], %134 {strides = array<i32>} : memref<8x256xf32, #tpu.memory_space<vmem>>, vector<8x256xf32>,
    %c0_i32 = arith.constant 0 : i32
    %136 = arith.cmpi eq, %arg0, %c0_i32 : i32
    %c0_i32_68 = arith.constant 0 : i32
    %137 = arith.cmpi eq, %arg1, %c0_i32_68 : i32
    %138 = arith.andi %136, %137 : i1
    %139 = arith.extui %138 : i1 to i32
    %c0_i32_69 = arith.constant 0 : i32
    %140 = arith.cmpi ne, %139, %c0_i32_69 : i32
    scf.if %140 {
      %cst_80 = arith.constant 0.000000e+00 : f32
      %152 = vector.broadcast %cst_80 : f32 to vector<8x1xf32>
      %c0_81 = arith.constant 0 : index
      %c0_82 = arith.constant 0 : index
      %153 = vector.load %arg10[%c0_81, %c0_82] : memref<8x1xf32, #tpu.memory_space<vmem>>, vector<8x1xf32>
      tpu.vector_store %arg10[%c0_81, %c0_82], %152 {strides = array<i32>} : memref<8x1xf32, #tpu.memory_space<vmem>>, vector<8x1xf32>,
      %cst_83 = arith.constant 0.000000e+00 : f32
      %154 = vector.broadcast %cst_83 : f32 to vector<8x1xf32>
      %c0_84 = arith.constant 0 : index
      %c0_85 = arith.constant 0 : index
      %155 = vector.load %arg11[%c0_84, %c0_85] : memref<8x1xf32, #tpu.memory_space<vmem>>, vector<8x1xf32>
      tpu.vector_store %arg11[%c0_84, %c0_85], %154 {strides = array<i32>} : memref<8x1xf32, #tpu.memory_space<vmem>>, vector<8x1xf32>,
    } else {
    }
    %c0_70 = arith.constant 0 : index
    %c0_71 = arith.constant 0 : index
    %141 = vector.load %arg10[%c0_70, %c0_71] : memref<8x1xf32, #tpu.memory_space<vmem>>, vector<8x1xf32>
    %cst_72 = arith.constant dense<0.000000e+00> : vector<8xf32>
    %142 = vector.multi_reduction <add>, %134, %cst_72 [1] : vector<8x256xf32> to vector<8xf32>
    %143 = vector.shape_cast %142 : vector<8xf32> to vector<8x1xf32>
    %144 = arith.addf %141, %143 : vector<8x1xf32>
    %c0_73 = arith.constant 0 : index
    %c0_74 = arith.constant 0 : index
    %145 = vector.load %arg10[%c0_73, %c0_74] : memref<8x1xf32, #tpu.memory_space<vmem>>, vector<8x1xf32>
    tpu.vector_store %arg10[%c0_73, %c0_74], %144 {strides = array<i32>} : memref<8x1xf32, #tpu.memory_space<vmem>>, vector<8x1xf32>,
    %c0_75 = arith.constant 0 : index
    %c0_76 = arith.constant 0 : index
    %146 = vector.load %arg11[%c0_75, %c0_76] : memref<8x1xf32, #tpu.memory_space<vmem>>, vector<8x1xf32>
    %147 = arith.mulf %134, %134 : vector<8x256xf32>
    %cst_77 = arith.constant dense<0.000000e+00> : vector<8xf32>
    %148 = vector.multi_reduction <add>, %147, %cst_77 [1] : vector<8x256xf32> to vector<8xf32>
    %149 = vector.shape_cast %148 : vector<8xf32> to vector<8x1xf32>
    %150 = arith.addf %146, %149 : vector<8x1xf32>
    %c0_78 = arith.constant 0 : index
    %c0_79 = arith.constant 0 : index
    %151 = vector.load %arg11[%c0_78, %c0_79] : memref<8x1xf32, #tpu.memory_space<vmem>>, vector<8x1xf32>
    tpu.vector_store %arg11[%c0_78, %c0_79], %150 {strides = array<i32>} : memref<8x1xf32, #tpu.memory_space<vmem>>, vector<8x1xf32>,
    return
  }
  func.func @transform_0(%arg0: i32, %arg1: i32) -> (i32, i32, i32) {
    %c1_i32 = arith.constant 1 : i32
    %0 = arith.muli %arg0, %c1_i32 : i32
    %1 = arith.addi %0, %arg1 : i32
    %c0_i32 = arith.constant 0 : i32
    %c0_i32_0 = arith.constant 0 : i32
    %c0_i32_1 = arith.constant 0 : i32
    return %c0_i32, %c0_i32_0, %1 : i32, i32, i32
  }
  func.func @transform_1(%arg0: i32, %arg1: i32) -> (i32, i32) {
    %c0_i32 = arith.constant 0 : i32
    %c0_i32_0 = arith.constant 0 : i32
    %c0_i32_1 = arith.constant 0 : i32
    return %c0_i32, %c0_i32_0 : i32, i32
  }
  func.func @transform_2(%arg0: i32, %arg1: i32) -> (i32, i32) {
    %c0_i32 = arith.constant 0 : i32
    %c0_i32_0 = arith.constant 0 : i32
    %c0_i32_1 = arith.constant 0 : i32
    return %c0_i32, %c0_i32_0 : i32, i32
  }
  func.func @transform_3(%arg0: i32, %arg1: i32) -> (i32, i32) {
    %c0_i32 = arith.constant 0 : i32
    %c0_i32_0 = arith.constant 0 : i32
    %c0_i32_1 = arith.constant 0 : i32
    return %c0_i32, %c0_i32_0 : i32, i32
  }
  func.func @transform_4(%arg0: i32, %arg1: i32) -> (i32, i32) {
    %c0_i32 = arith.constant 0 : i32
    %c0_i32_0 = arith.constant 0 : i32
    %c0_i32_1 = arith.constant 0 : i32
    return %c0_i32, %c0_i32_0 : i32, i32
  }
  func.func @transform_5(%arg0: i32, %arg1: i32) -> (i32, i32, i32) {
    %c0_i32 = arith.constant 0 : i32
    %c0_i32_0 = arith.constant 0 : i32
    %c0_i32_1 = arith.constant 0 : i32
    %c0_i32_2 = arith.constant 0 : i32
    return %c0_i32, %c0_i32_0, %c0_i32_1 : i32, i32, i32
  }
  func.func @transform_6(%arg0: i32, %arg1: i32) -> (i32, i32) {
    %c0_i32 = arith.constant 0 : i32
    %c0_i32_0 = arith.constant 0 : i32
    %c0_i32_1 = arith.constant 0 : i32
    return %c0_i32, %c0_i32_0 : i32, i32
  }
  func.func @transform_7(%arg0: i32, %arg1: i32) -> (i32, i32) {
    %c1_i32 = arith.constant 1 : i32
    %0 = arith.muli %arg0, %c1_i32 : i32
    %1 = arith.addi %0, %arg1 : i32
    %c0_i32 = arith.constant 0 : i32
    %c0_i32_0 = arith.constant 0 : i32
    return %c0_i32, %1 : i32, i32
  }
  func.func @transform_8(%arg0: i32, %arg1: i32) -> (i32, i32) {
    %c0_i32 = arith.constant 0 : i32
    %c0_i32_0 = arith.constant 0 : i32
    %c0_i32_1 = arith.constant 0 : i32
    return %c0_i32, %c0_i32_0 : i32, i32
  }
  func.func @transform_9(%arg0: i32, %arg1: i32) -> (i32, i32) {
    %c0_i32 = arith.constant 0 : i32
    %c0_i32_0 = arith.constant 0 : i32
    %c0_i32_1 = arith.constant 0 : i32
    return %c0_i32, %c0_i32_0 : i32, i32
  }
}

module attributes {stable_mosaic.version = 11 : i64} {
  func.func @_conv_block_kernel(%arg0: i32, %arg1: i32, %arg2: memref<9x8x256xf32, #tpu.memory_space<vmem>>, %arg3: memref<8x1xf32, #tpu.memory_space<vmem>>, %arg4: memref<8x1xf32, #tpu.memory_space<vmem>>, %arg5: memref<8x1xf32, #tpu.memory_space<vmem>>, %arg6: memref<8x1xf32, #tpu.memory_space<vmem>>, %arg7: memref<9x8x8xf32, #tpu.memory_space<vmem>>, %arg8: memref<8x1xf32, #tpu.memory_space<vmem>>, %arg9: memref<8x256xf32, #tpu.memory_space<vmem>>, %arg10: memref<8x1xf32, #tpu.memory_space<vmem>>, %arg11: memref<8x1xf32, #tpu.memory_space<vmem>>) attributes {dimension_semantics = [#tpu.dimension_semantics<arbitrary>, #tpu.dimension_semantics<arbitrary>], iteration_bounds = array<i64: 2, 1>, scalar_prefetch = 0 : i64, scratch_operands = 0 : i64, tpu.core_type = #tpu.core_type<tc>, window_params = [{transform_indices = @transform_0, window_bounds = array<i64: 9, 8, 256>}, {pipeline_mode = #tpu.pipeline_mode<synchronous>, transform_indices = @transform_1, window_bounds = array<i64: 8, 1>}, {pipeline_mode = #tpu.pipeline_mode<synchronous>, transform_indices = @transform_2, window_bounds = array<i64: 8, 1>}, {pipeline_mode = #tpu.pipeline_mode<synchronous>, transform_indices = @transform_3, window_bounds = array<i64: 8, 1>}, {pipeline_mode = #tpu.pipeline_mode<synchronous>, transform_indices = @transform_4, window_bounds = array<i64: 8, 1>}, {pipeline_mode = #tpu.pipeline_mode<synchronous>, transform_indices = @transform_5, window_bounds = array<i64: 9, 8, 8>}, {pipeline_mode = #tpu.pipeline_mode<synchronous>, transform_indices = @transform_6, window_bounds = array<i64: 8, 1>}, {transform_indices = @transform_7, window_bounds = array<i64: 8, 256>}, {pipeline_mode = #tpu.pipeline_mode<synchronous>, transform_indices = @transform_8, window_bounds = array<i64: 8, 1>}, {pipeline_mode = #tpu.pipeline_mode<synchronous>, transform_indices = @transform_9, window_bounds = array<i64: 8, 1>}]} {
    %c0 = arith.constant 0 : index
    %c0_0 = arith.constant 0 : index
    %0 = vector.load %arg3[%c0, %c0_0] : memref<8x1xf32, #tpu.memory_space<vmem>>, vector<8x1xf32>
    %c0_1 = arith.constant 0 : index
    %c0_2 = arith.constant 0 : index
    %1 = vector.load %arg4[%c0_1, %c0_2] : memref<8x1xf32, #tpu.memory_space<vmem>>, vector<8x1xf32>
    %c0_3 = arith.constant 0 : index
    %c0_4 = arith.constant 0 : index
    %2 = vector.load %arg5[%c0_3, %c0_4] : memref<8x1xf32, #tpu.memory_space<vmem>>, vector<8x1xf32>
    %c0_5 = arith.constant 0 : index
    %c0_6 = arith.constant 0 : index
    %3 = vector.load %arg6[%c0_5, %c0_6] : memref<8x1xf32, #tpu.memory_space<vmem>>, vector<8x1xf32>
    %cst = arith.constant 0.001953125 : f32
    %4 = vector.broadcast %cst : f32 to vector<8x1xf32>
    %5 = arith.mulf %0, %4 : vector<8x1xf32>
    %cst_7 = arith.constant 0.001953125 : f32
    %6 = vector.broadcast %cst_7 : f32 to vector<8x1xf32>
    %7 = arith.mulf %1, %6 : vector<8x1xf32>
    %8 = arith.mulf %5, %5 : vector<8x1xf32>
    %9 = arith.subf %7, %8 : vector<8x1xf32>
    %cst_8 = arith.constant 9.99999974E-6 : f32
    %10 = vector.broadcast %cst_8 : f32 to vector<8x1xf32>
    %11 = arith.addf %9, %10 : vector<8x1xf32>
    %12 = math.rsqrt %11 : vector<8x1xf32>
    %13 = arith.mulf %12, %2 : vector<8x1xf32>
    %14 = arith.mulf %5, %13 : vector<8x1xf32>
    %15 = arith.subf %3, %14 : vector<8x1xf32>
    %c0_9 = arith.constant 0 : index
    %c0_10 = arith.constant 0 : index
    %c0_11 = arith.constant 0 : index
    %16 = vector.load %arg2[%c0_9, %c0_10, %c0_11] : memref<9x8x256xf32, #tpu.memory_space<vmem>>, vector<1x8x256xf32>
    %17 = vector.shape_cast %16 : vector<1x8x256xf32> to vector<8x256xf32>
    %18 = vector.broadcast %13 : vector<8x1xf32> to vector<8x256xf32>
    %19 = arith.mulf %17, %18 : vector<8x256xf32>
    %20 = vector.broadcast %15 : vector<8x1xf32> to vector<8x256xf32>
    %21 = arith.addf %19, %20 : vector<8x256xf32>
    %cst_12 = arith.constant 0.000000e+00 : f32
    %22 = vector.broadcast %cst_12 : f32 to vector<8x256xf32>
    %23 = arith.maximumf %21, %22 : vector<8x256xf32>
    %c0_13 = arith.constant 0 : index
    %c0_14 = arith.constant 0 : index
    %c0_15 = arith.constant 0 : index
    %24 = vector.load %arg7[%c0_13, %c0_14, %c0_15] : memref<9x8x8xf32, #tpu.memory_space<vmem>>, vector<1x8x8xf32>
    %25 = vector.shape_cast %24 : vector<1x8x8xf32> to vector<8x8xf32>
    %cst_16 = arith.constant dense<0.000000e+00> : vector<8x256xf32>
    %26 = tpu.matmul %25, %23, %cst_16 {dimension_numbers = #tpu.dot_dimension_numbers<[1], [0], [0], [1], [0, 0, 1, 1], [], []>} : vector<8x8xf32>, vector<8x256xf32>, vector<8x256xf32> -> vector<8x256xf32>
    %c1 = arith.constant 1 : index
    %c0_17 = arith.constant 0 : index
    %c0_18 = arith.constant 0 : index
    %27 = vector.load %arg2[%c1, %c0_17, %c0_18] : memref<9x8x256xf32, #tpu.memory_space<vmem>>, vector<1x8x256xf32>
    %28 = vector.shape_cast %27 : vector<1x8x256xf32> to vector<8x256xf32>
    %29 = vector.broadcast %13 : vector<8x1xf32> to vector<8x256xf32>
    %30 = arith.mulf %28, %29 : vector<8x256xf32>
    %31 = vector.broadcast %15 : vector<8x1xf32> to vector<8x256xf32>
    %32 = arith.addf %30, %31 : vector<8x256xf32>
    %cst_19 = arith.constant 0.000000e+00 : f32
    %33 = vector.broadcast %cst_19 : f32 to vector<8x256xf32>
    %34 = arith.maximumf %32, %33 : vector<8x256xf32>
    %c1_20 = arith.constant 1 : index
    %c0_21 = arith.constant 0 : index
    %c0_22 = arith.constant 0 : index
    %35 = vector.load %arg7[%c1_20, %c0_21, %c0_22] : memref<9x8x8xf32, #tpu.memory_space<vmem>>, vector<1x8x8xf32>
    %36 = vector.shape_cast %35 : vector<1x8x8xf32> to vector<8x8xf32>
    %cst_23 = arith.constant dense<0.000000e+00> : vector<8x256xf32>
    %37 = tpu.matmul %36, %34, %cst_23 {dimension_numbers = #tpu.dot_dimension_numbers<[1], [0], [0], [1], [0, 0, 1, 1], [], []>} : vector<8x8xf32>, vector<8x256xf32>, vector<8x256xf32> -> vector<8x256xf32>
    %38 = arith.addf %26, %37 : vector<8x256xf32>
    %c2 = arith.constant 2 : index
    %c0_24 = arith.constant 0 : index
    %c0_25 = arith.constant 0 : index
    %39 = vector.load %arg2[%c2, %c0_24, %c0_25] : memref<9x8x256xf32, #tpu.memory_space<vmem>>, vector<1x8x256xf32>
    %40 = vector.shape_cast %39 : vector<1x8x256xf32> to vector<8x256xf32>
    %41 = vector.broadcast %13 : vector<8x1xf32> to vector<8x256xf32>
    %42 = arith.mulf %40, %41 : vector<8x256xf32>
    %43 = vector.broadcast %15 : vector<8x1xf32> to vector<8x256xf32>
    %44 = arith.addf %42, %43 : vector<8x256xf32>
    %cst_26 = arith.constant 0.000000e+00 : f32
    %45 = vector.broadcast %cst_26 : f32 to vector<8x256xf32>
    %46 = arith.maximumf %44, %45 : vector<8x256xf32>
    %c2_27 = arith.constant 2 : index
    %c0_28 = arith.constant 0 : index
    %c0_29 = arith.constant 0 : index
    %47 = vector.load %arg7[%c2_27, %c0_28, %c0_29] : memref<9x8x8xf32, #tpu.memory_space<vmem>>, vector<1x8x8xf32>
    %48 = vector.shape_cast %47 : vector<1x8x8xf32> to vector<8x8xf32>
    %cst_30 = arith.constant dense<0.000000e+00> : vector<8x256xf32>
    %49 = tpu.matmul %48, %46, %cst_30 {dimension_numbers = #tpu.dot_dimension_numbers<[1], [0], [0], [1], [0, 0, 1, 1], [], []>} : vector<8x8xf32>, vector<8x256xf32>, vector<8x256xf32> -> vector<8x256xf32>
    %50 = arith.addf %38, %49 : vector<8x256xf32>
    %c3 = arith.constant 3 : index
    %c0_31 = arith.constant 0 : index
    %c0_32 = arith.constant 0 : index
    %51 = vector.load %arg2[%c3, %c0_31, %c0_32] : memref<9x8x256xf32, #tpu.memory_space<vmem>>, vector<1x8x256xf32>
    %52 = vector.shape_cast %51 : vector<1x8x256xf32> to vector<8x256xf32>
    %53 = vector.broadcast %13 : vector<8x1xf32> to vector<8x256xf32>
    %54 = arith.mulf %52, %53 : vector<8x256xf32>
    %55 = vector.broadcast %15 : vector<8x1xf32> to vector<8x256xf32>
    %56 = arith.addf %54, %55 : vector<8x256xf32>
    %cst_33 = arith.constant 0.000000e+00 : f32
    %57 = vector.broadcast %cst_33 : f32 to vector<8x256xf32>
    %58 = arith.maximumf %56, %57 : vector<8x256xf32>
    %c3_34 = arith.constant 3 : index
    %c0_35 = arith.constant 0 : index
    %c0_36 = arith.constant 0 : index
    %59 = vector.load %arg7[%c3_34, %c0_35, %c0_36] : memref<9x8x8xf32, #tpu.memory_space<vmem>>, vector<1x8x8xf32>
    %60 = vector.shape_cast %59 : vector<1x8x8xf32> to vector<8x8xf32>
    %cst_37 = arith.constant dense<0.000000e+00> : vector<8x256xf32>
    %61 = tpu.matmul %60, %58, %cst_37 {dimension_numbers = #tpu.dot_dimension_numbers<[1], [0], [0], [1], [0, 0, 1, 1], [], []>} : vector<8x8xf32>, vector<8x256xf32>, vector<8x256xf32> -> vector<8x256xf32>
    %62 = arith.addf %50, %61 : vector<8x256xf32>
    %c4 = arith.constant 4 : index
    %c0_38 = arith.constant 0 : index
    %c0_39 = arith.constant 0 : index
    %63 = vector.load %arg2[%c4, %c0_38, %c0_39] : memref<9x8x256xf32, #tpu.memory_space<vmem>>, vector<1x8x256xf32>
    %64 = vector.shape_cast %63 : vector<1x8x256xf32> to vector<8x256xf32>
    %65 = vector.broadcast %13 : vector<8x1xf32> to vector<8x256xf32>
    %66 = arith.mulf %64, %65 : vector<8x256xf32>
    %67 = vector.broadcast %15 : vector<8x1xf32> to vector<8x256xf32>
    %68 = arith.addf %66, %67 : vector<8x256xf32>
    %cst_40 = arith.constant 0.000000e+00 : f32
    %69 = vector.broadcast %cst_40 : f32 to vector<8x256xf32>
    %70 = arith.maximumf %68, %69 : vector<8x256xf32>
    %c4_41 = arith.constant 4 : index
    %c0_42 = arith.constant 0 : index
    %c0_43 = arith.constant 0 : index
    %71 = vector.load %arg7[%c4_41, %c0_42, %c0_43] : memref<9x8x8xf32, #tpu.memory_space<vmem>>, vector<1x8x8xf32>
    %72 = vector.shape_cast %71 : vector<1x8x8xf32> to vector<8x8xf32>
    %cst_44 = arith.constant dense<0.000000e+00> : vector<8x256xf32>
    %73 = tpu.matmul %72, %70, %cst_44 {dimension_numbers = #tpu.dot_dimension_numbers<[1], [0], [0], [1], [0, 0, 1, 1], [], []>} : vector<8x8xf32>, vector<8x256xf32>, vector<8x256xf32> -> vector<8x256xf32>
    %74 = arith.addf %62, %73 : vector<8x256xf32>
    %c5 = arith.constant 5 : index
    %c0_45 = arith.constant 0 : index
    %c0_46 = arith.constant 0 : index
    %75 = vector.load %arg2[%c5, %c0_45, %c0_46] : memref<9x8x256xf32, #tpu.memory_space<vmem>>, vector<1x8x256xf32>
    %76 = vector.shape_cast %75 : vector<1x8x256xf32> to vector<8x256xf32>
    %77 = vector.broadcast %13 : vector<8x1xf32> to vector<8x256xf32>
    %78 = arith.mulf %76, %77 : vector<8x256xf32>
    %79 = vector.broadcast %15 : vector<8x1xf32> to vector<8x256xf32>
    %80 = arith.addf %78, %79 : vector<8x256xf32>
    %cst_47 = arith.constant 0.000000e+00 : f32
    %81 = vector.broadcast %cst_47 : f32 to vector<8x256xf32>
    %82 = arith.maximumf %80, %81 : vector<8x256xf32>
    %c5_48 = arith.constant 5 : index
    %c0_49 = arith.constant 0 : index
    %c0_50 = arith.constant 0 : index
    %83 = vector.load %arg7[%c5_48, %c0_49, %c0_50] : memref<9x8x8xf32, #tpu.memory_space<vmem>>, vector<1x8x8xf32>
    %84 = vector.shape_cast %83 : vector<1x8x8xf32> to vector<8x8xf32>
    %cst_51 = arith.constant dense<0.000000e+00> : vector<8x256xf32>
    %85 = tpu.matmul %84, %82, %cst_51 {dimension_numbers = #tpu.dot_dimension_numbers<[1], [0], [0], [1], [0, 0, 1, 1], [], []>} : vector<8x8xf32>, vector<8x256xf32>, vector<8x256xf32> -> vector<8x256xf32>
    %86 = arith.addf %74, %85 : vector<8x256xf32>
    %c6 = arith.constant 6 : index
    %c0_52 = arith.constant 0 : index
    %c0_53 = arith.constant 0 : index
    %87 = vector.load %arg2[%c6, %c0_52, %c0_53] : memref<9x8x256xf32, #tpu.memory_space<vmem>>, vector<1x8x256xf32>
    %88 = vector.shape_cast %87 : vector<1x8x256xf32> to vector<8x256xf32>
    %89 = vector.broadcast %13 : vector<8x1xf32> to vector<8x256xf32>
    %90 = arith.mulf %88, %89 : vector<8x256xf32>
    %91 = vector.broadcast %15 : vector<8x1xf32> to vector<8x256xf32>
    %92 = arith.addf %90, %91 : vector<8x256xf32>
    %cst_54 = arith.constant 0.000000e+00 : f32
    %93 = vector.broadcast %cst_54 : f32 to vector<8x256xf32>
    %94 = arith.maximumf %92, %93 : vector<8x256xf32>
    %c6_55 = arith.constant 6 : index
    %c0_56 = arith.constant 0 : index
    %c0_57 = arith.constant 0 : index
    %95 = vector.load %arg7[%c6_55, %c0_56, %c0_57] : memref<9x8x8xf32, #tpu.memory_space<vmem>>, vector<1x8x8xf32>
    %96 = vector.shape_cast %95 : vector<1x8x8xf32> to vector<8x8xf32>
    %cst_58 = arith.constant dense<0.000000e+00> : vector<8x256xf32>
    %97 = tpu.matmul %96, %94, %cst_58 {dimension_numbers = #tpu.dot_dimension_numbers<[1], [0], [0], [1], [0, 0, 1, 1], [], []>} : vector<8x8xf32>, vector<8x256xf32>, vector<8x256xf32> -> vector<8x256xf32>
    %98 = arith.addf %86, %97 : vector<8x256xf32>
    %c7 = arith.constant 7 : index
    %c0_59 = arith.constant 0 : index
    %c0_60 = arith.constant 0 : index
    %99 = vector.load %arg2[%c7, %c0_59, %c0_60] : memref<9x8x256xf32, #tpu.memory_space<vmem>>, vector<1x8x256xf32>
    %100 = vector.shape_cast %99 : vector<1x8x256xf32> to vector<8x256xf32>
    %101 = vector.broadcast %13 : vector<8x1xf32> to vector<8x256xf32>
    %102 = arith.mulf %100, %101 : vector<8x256xf32>
    %103 = vector.broadcast %15 : vector<8x1xf32> to vector<8x256xf32>
    %104 = arith.addf %102, %103 : vector<8x256xf32>
    %cst_61 = arith.constant 0.000000e+00 : f32
    %105 = vector.broadcast %cst_61 : f32 to vector<8x256xf32>
    %106 = arith.maximumf %104, %105 : vector<8x256xf32>
    %c7_62 = arith.constant 7 : index
    %c0_63 = arith.constant 0 : index
    %c0_64 = arith.constant 0 : index
    %107 = vector.load %arg7[%c7_62, %c0_63, %c0_64] : memref<9x8x8xf32, #tpu.memory_space<vmem>>, vector<1x8x8xf32>
    %108 = vector.shape_cast %107 : vector<1x8x8xf32> to vector<8x8xf32>
    %cst_65 = arith.constant dense<0.000000e+00> : vector<8x256xf32>
    %109 = tpu.matmul %108, %106, %cst_65 {dimension_numbers = #tpu.dot_dimension_numbers<[1], [0], [0], [1], [0, 0, 1, 1], [], []>} : vector<8x8xf32>, vector<8x256xf32>, vector<8x256xf32> -> vector<8x256xf32>
    %110 = arith.addf %98, %109 : vector<8x256xf32>
    %c8 = arith.constant 8 : index
    %c0_66 = arith.constant 0 : index
    %c0_67 = arith.constant 0 : index
    %111 = vector.load %arg2[%c8, %c0_66, %c0_67] : memref<9x8x256xf32, #tpu.memory_space<vmem>>, vector<1x8x256xf32>
    %112 = vector.shape_cast %111 : vector<1x8x256xf32> to vector<8x256xf32>
    %113 = vector.broadcast %13 : vector<8x1xf32> to vector<8x256xf32>
    %114 = arith.mulf %112, %113 : vector<8x256xf32>
    %115 = vector.broadcast %15 : vector<8x1xf32> to vector<8x256xf32>
    %116 = arith.addf %114, %115 : vector<8x256xf32>
    %cst_68 = arith.constant 0.000000e+00 : f32
    %117 = vector.broadcast %cst_68 : f32 to vector<8x256xf32>
    %118 = arith.maximumf %116, %117 : vector<8x256xf32>
    %c8_69 = arith.constant 8 : index
    %c0_70 = arith.constant 0 : index
    %c0_71 = arith.constant 0 : index
    %119 = vector.load %arg7[%c8_69, %c0_70, %c0_71] : memref<9x8x8xf32, #tpu.memory_space<vmem>>, vector<1x8x8xf32>
    %120 = vector.shape_cast %119 : vector<1x8x8xf32> to vector<8x8xf32>
    %cst_72 = arith.constant dense<0.000000e+00> : vector<8x256xf32>
    %121 = tpu.matmul %120, %118, %cst_72 {dimension_numbers = #tpu.dot_dimension_numbers<[1], [0], [0], [1], [0, 0, 1, 1], [], []>} : vector<8x8xf32>, vector<8x256xf32>, vector<8x256xf32> -> vector<8x256xf32>
    %122 = arith.addf %110, %121 : vector<8x256xf32>
    %c0_73 = arith.constant 0 : index
    %c0_74 = arith.constant 0 : index
    %123 = vector.load %arg8[%c0_73, %c0_74] : memref<8x1xf32, #tpu.memory_space<vmem>>, vector<8x1xf32>
    %124 = vector.broadcast %123 : vector<8x1xf32> to vector<8x256xf32>
    %125 = arith.addf %122, %124 : vector<8x256xf32>
    %c0_75 = arith.constant 0 : index
    %c0_76 = arith.constant 0 : index
    %126 = vector.load %arg9[%c0_75, %c0_76] : memref<8x256xf32, #tpu.memory_space<vmem>>, vector<8x256xf32>
    tpu.vector_store %arg9[%c0_75, %c0_76], %125 {strides = array<i32>} : memref<8x256xf32, #tpu.memory_space<vmem>>, vector<8x256xf32>,
    %c0_i32 = arith.constant 0 : i32
    %127 = arith.cmpi eq, %arg0, %c0_i32 : i32
    %c0_i32_77 = arith.constant 0 : i32
    %128 = arith.cmpi eq, %arg1, %c0_i32_77 : i32
    %129 = arith.andi %127, %128 : i1
    %130 = arith.extui %129 : i1 to i32
    %c0_i32_78 = arith.constant 0 : i32
    %131 = arith.cmpi ne, %130, %c0_i32_78 : i32
    scf.if %131 {
      %cst_89 = arith.constant 0.000000e+00 : f32
      %143 = vector.broadcast %cst_89 : f32 to vector<8x1xf32>
      %c0_90 = arith.constant 0 : index
      %c0_91 = arith.constant 0 : index
      %144 = vector.load %arg10[%c0_90, %c0_91] : memref<8x1xf32, #tpu.memory_space<vmem>>, vector<8x1xf32>
      tpu.vector_store %arg10[%c0_90, %c0_91], %143 {strides = array<i32>} : memref<8x1xf32, #tpu.memory_space<vmem>>, vector<8x1xf32>,
      %cst_92 = arith.constant 0.000000e+00 : f32
      %145 = vector.broadcast %cst_92 : f32 to vector<8x1xf32>
      %c0_93 = arith.constant 0 : index
      %c0_94 = arith.constant 0 : index
      %146 = vector.load %arg11[%c0_93, %c0_94] : memref<8x1xf32, #tpu.memory_space<vmem>>, vector<8x1xf32>
      tpu.vector_store %arg11[%c0_93, %c0_94], %145 {strides = array<i32>} : memref<8x1xf32, #tpu.memory_space<vmem>>, vector<8x1xf32>,
    } else {
    }
    %c0_79 = arith.constant 0 : index
    %c0_80 = arith.constant 0 : index
    %132 = vector.load %arg10[%c0_79, %c0_80] : memref<8x1xf32, #tpu.memory_space<vmem>>, vector<8x1xf32>
    %cst_81 = arith.constant dense<0.000000e+00> : vector<8xf32>
    %133 = vector.multi_reduction <add>, %125, %cst_81 [1] : vector<8x256xf32> to vector<8xf32>
    %134 = vector.shape_cast %133 : vector<8xf32> to vector<8x1xf32>
    %135 = arith.addf %132, %134 : vector<8x1xf32>
    %c0_82 = arith.constant 0 : index
    %c0_83 = arith.constant 0 : index
    %136 = vector.load %arg10[%c0_82, %c0_83] : memref<8x1xf32, #tpu.memory_space<vmem>>, vector<8x1xf32>
    tpu.vector_store %arg10[%c0_82, %c0_83], %135 {strides = array<i32>} : memref<8x1xf32, #tpu.memory_space<vmem>>, vector<8x1xf32>,
    %c0_84 = arith.constant 0 : index
    %c0_85 = arith.constant 0 : index
    %137 = vector.load %arg11[%c0_84, %c0_85] : memref<8x1xf32, #tpu.memory_space<vmem>>, vector<8x1xf32>
    %138 = arith.mulf %125, %125 : vector<8x256xf32>
    %cst_86 = arith.constant dense<0.000000e+00> : vector<8xf32>
    %139 = vector.multi_reduction <add>, %138, %cst_86 [1] : vector<8x256xf32> to vector<8xf32>
    %140 = vector.shape_cast %139 : vector<8xf32> to vector<8x1xf32>
    %141 = arith.addf %137, %140 : vector<8x1xf32>
    %c0_87 = arith.constant 0 : index
    %c0_88 = arith.constant 0 : index
    %142 = vector.load %arg11[%c0_87, %c0_88] : memref<8x1xf32, #tpu.memory_space<vmem>>, vector<8x1xf32>
    tpu.vector_store %arg11[%c0_87, %c0_88], %141 {strides = array<i32>} : memref<8x1xf32, #tpu.memory_space<vmem>>, vector<8x1xf32>,
    return
  }
  func.func @transform_0(%arg0: i32, %arg1: i32) -> (i32, i32, i32) {
    %c1_i32 = arith.constant 1 : i32
    %0 = arith.muli %arg0, %c1_i32 : i32
    %1 = arith.addi %0, %arg1 : i32
    %c0_i32 = arith.constant 0 : i32
    %c0_i32_0 = arith.constant 0 : i32
    %c0_i32_1 = arith.constant 0 : i32
    return %c0_i32, %c0_i32_0, %1 : i32, i32, i32
  }
  func.func @transform_1(%arg0: i32, %arg1: i32) -> (i32, i32) {
    %c0_i32 = arith.constant 0 : i32
    %c0_i32_0 = arith.constant 0 : i32
    %c0_i32_1 = arith.constant 0 : i32
    return %c0_i32, %c0_i32_0 : i32, i32
  }
  func.func @transform_2(%arg0: i32, %arg1: i32) -> (i32, i32) {
    %c0_i32 = arith.constant 0 : i32
    %c0_i32_0 = arith.constant 0 : i32
    %c0_i32_1 = arith.constant 0 : i32
    return %c0_i32, %c0_i32_0 : i32, i32
  }
  func.func @transform_3(%arg0: i32, %arg1: i32) -> (i32, i32) {
    %c0_i32 = arith.constant 0 : i32
    %c0_i32_0 = arith.constant 0 : i32
    %c0_i32_1 = arith.constant 0 : i32
    return %c0_i32, %c0_i32_0 : i32, i32
  }
  func.func @transform_4(%arg0: i32, %arg1: i32) -> (i32, i32) {
    %c0_i32 = arith.constant 0 : i32
    %c0_i32_0 = arith.constant 0 : i32
    %c0_i32_1 = arith.constant 0 : i32
    return %c0_i32, %c0_i32_0 : i32, i32
  }
  func.func @transform_5(%arg0: i32, %arg1: i32) -> (i32, i32, i32) {
    %c0_i32 = arith.constant 0 : i32
    %c0_i32_0 = arith.constant 0 : i32
    %c0_i32_1 = arith.constant 0 : i32
    %c0_i32_2 = arith.constant 0 : i32
    return %c0_i32, %c0_i32_0, %c0_i32_1 : i32, i32, i32
  }
  func.func @transform_6(%arg0: i32, %arg1: i32) -> (i32, i32) {
    %c0_i32 = arith.constant 0 : i32
    %c0_i32_0 = arith.constant 0 : i32
    %c0_i32_1 = arith.constant 0 : i32
    return %c0_i32, %c0_i32_0 : i32, i32
  }
  func.func @transform_7(%arg0: i32, %arg1: i32) -> (i32, i32) {
    %c1_i32 = arith.constant 1 : i32
    %0 = arith.muli %arg0, %c1_i32 : i32
    %1 = arith.addi %0, %arg1 : i32
    %c0_i32 = arith.constant 0 : i32
    %c0_i32_0 = arith.constant 0 : i32
    return %c0_i32, %1 : i32, i32
  }
  func.func @transform_8(%arg0: i32, %arg1: i32) -> (i32, i32) {
    %c0_i32 = arith.constant 0 : i32
    %c0_i32_0 = arith.constant 0 : i32
    %c0_i32_1 = arith.constant 0 : i32
    return %c0_i32, %c0_i32_0 : i32, i32
  }
  func.func @transform_9(%arg0: i32, %arg1: i32) -> (i32, i32) {
    %c0_i32 = arith.constant 0 : i32
    %c0_i32_0 = arith.constant 0 : i32
    %c0_i32_1 = arith.constant 0 : i32
    return %c0_i32, %c0_i32_0 : i32, i32
  }
}

module attributes {stable_mosaic.version = 11 : i64} {
  func.func @_conv_block_kernel(%arg0: i32, %arg1: i32, %arg2: memref<1x8x256xf32, #tpu.memory_space<vmem>>, %arg3: memref<8x1xf32, #tpu.memory_space<vmem>>, %arg4: memref<8x1xf32, #tpu.memory_space<vmem>>, %arg5: memref<8x1xf32, #tpu.memory_space<vmem>>, %arg6: memref<8x1xf32, #tpu.memory_space<vmem>>, %arg7: memref<1x8x1xf32, #tpu.memory_space<vmem>>, %arg8: memref<1x8x8xf32, #tpu.memory_space<vmem>>, %arg9: memref<8x1xf32, #tpu.memory_space<vmem>>, %arg10: memref<8x256xf32, #tpu.memory_space<vmem>>, %arg11: memref<8x1xf32, #tpu.memory_space<vmem>>, %arg12: memref<8x1xf32, #tpu.memory_space<vmem>>) attributes {dimension_semantics = [#tpu.dimension_semantics<arbitrary>, #tpu.dimension_semantics<arbitrary>], iteration_bounds = array<i64: 2, 1>, scalar_prefetch = 0 : i64, scratch_operands = 0 : i64, tpu.core_type = #tpu.core_type<tc>, window_params = [{transform_indices = @transform_0, window_bounds = array<i64: 1, 8, 256>}, {pipeline_mode = #tpu.pipeline_mode<synchronous>, transform_indices = @transform_1, window_bounds = array<i64: 8, 1>}, {pipeline_mode = #tpu.pipeline_mode<synchronous>, transform_indices = @transform_2, window_bounds = array<i64: 8, 1>}, {pipeline_mode = #tpu.pipeline_mode<synchronous>, transform_indices = @transform_3, window_bounds = array<i64: 8, 1>}, {pipeline_mode = #tpu.pipeline_mode<synchronous>, transform_indices = @transform_4, window_bounds = array<i64: 8, 1>}, {transform_indices = @transform_5, window_bounds = array<i64: 1, 8, 1>}, {pipeline_mode = #tpu.pipeline_mode<synchronous>, transform_indices = @transform_6, window_bounds = array<i64: 1, 8, 8>}, {pipeline_mode = #tpu.pipeline_mode<synchronous>, transform_indices = @transform_7, window_bounds = array<i64: 8, 1>}, {transform_indices = @transform_8, window_bounds = array<i64: 8, 256>}, {pipeline_mode = #tpu.pipeline_mode<synchronous>, transform_indices = @transform_9, window_bounds = array<i64: 8, 1>}, {pipeline_mode = #tpu.pipeline_mode<synchronous>, transform_indices = @transform_10, window_bounds = array<i64: 8, 1>}]} {
    %c0 = arith.constant 0 : index
    %c0_0 = arith.constant 0 : index
    %0 = vector.load %arg3[%c0, %c0_0] : memref<8x1xf32, #tpu.memory_space<vmem>>, vector<8x1xf32>
    %c0_1 = arith.constant 0 : index
    %c0_2 = arith.constant 0 : index
    %1 = vector.load %arg4[%c0_1, %c0_2] : memref<8x1xf32, #tpu.memory_space<vmem>>, vector<8x1xf32>
    %c0_3 = arith.constant 0 : index
    %c0_4 = arith.constant 0 : index
    %2 = vector.load %arg5[%c0_3, %c0_4] : memref<8x1xf32, #tpu.memory_space<vmem>>, vector<8x1xf32>
    %c0_5 = arith.constant 0 : index
    %c0_6 = arith.constant 0 : index
    %3 = vector.load %arg6[%c0_5, %c0_6] : memref<8x1xf32, #tpu.memory_space<vmem>>, vector<8x1xf32>
    %cst = arith.constant 0.001953125 : f32
    %4 = vector.broadcast %cst : f32 to vector<8x1xf32>
    %5 = arith.mulf %0, %4 : vector<8x1xf32>
    %cst_7 = arith.constant 0.001953125 : f32
    %6 = vector.broadcast %cst_7 : f32 to vector<8x1xf32>
    %7 = arith.mulf %1, %6 : vector<8x1xf32>
    %8 = arith.mulf %5, %5 : vector<8x1xf32>
    %9 = arith.subf %7, %8 : vector<8x1xf32>
    %cst_8 = arith.constant 9.99999974E-6 : f32
    %10 = vector.broadcast %cst_8 : f32 to vector<8x1xf32>
    %11 = arith.addf %9, %10 : vector<8x1xf32>
    %12 = math.rsqrt %11 : vector<8x1xf32>
    %13 = arith.mulf %12, %2 : vector<8x1xf32>
    %14 = arith.mulf %5, %13 : vector<8x1xf32>
    %15 = arith.subf %3, %14 : vector<8x1xf32>
    %c0_9 = arith.constant 0 : index
    %c0_10 = arith.constant 0 : index
    %c0_11 = arith.constant 0 : index
    %16 = vector.load %arg2[%c0_9, %c0_10, %c0_11] : memref<1x8x256xf32, #tpu.memory_space<vmem>>, vector<1x8x256xf32>
    %17 = vector.shape_cast %16 : vector<1x8x256xf32> to vector<8x256xf32>
    %18 = vector.broadcast %13 : vector<8x1xf32> to vector<8x256xf32>
    %19 = arith.mulf %17, %18 : vector<8x256xf32>
    %20 = vector.broadcast %15 : vector<8x1xf32> to vector<8x256xf32>
    %21 = arith.addf %19, %20 : vector<8x256xf32>
    %cst_12 = arith.constant 0.000000e+00 : f32
    %22 = vector.broadcast %cst_12 : f32 to vector<8x256xf32>
    %23 = arith.maximumf %21, %22 : vector<8x256xf32>
    %c0_13 = arith.constant 0 : index
    %c0_14 = arith.constant 0 : index
    %c0_15 = arith.constant 0 : index
    %24 = vector.load %arg7[%c0_13, %c0_14, %c0_15] : memref<1x8x1xf32, #tpu.memory_space<vmem>>, vector<1x8x1xf32>
    %25 = vector.shape_cast %24 : vector<1x8x1xf32> to vector<8x1xf32>
    %26 = vector.broadcast %25 : vector<8x1xf32> to vector<8x256xf32>
    %27 = arith.mulf %23, %26 : vector<8x256xf32>
    %c0_16 = arith.constant 0 : index
    %c0_17 = arith.constant 0 : index
    %c0_18 = arith.constant 0 : index
    %28 = vector.load %arg8[%c0_16, %c0_17, %c0_18] : memref<1x8x8xf32, #tpu.memory_space<vmem>>, vector<1x8x8xf32>
    %29 = vector.shape_cast %28 : vector<1x8x8xf32> to vector<8x8xf32>
    %cst_19 = arith.constant dense<0.000000e+00> : vector<8x256xf32>
    %30 = tpu.matmul %29, %27, %cst_19 {dimension_numbers = #tpu.dot_dimension_numbers<[1], [0], [0], [1], [0, 0, 1, 1], [], []>} : vector<8x8xf32>, vector<8x256xf32>, vector<8x256xf32> -> vector<8x256xf32>
    %c0_20 = arith.constant 0 : index
    %c0_21 = arith.constant 0 : index
    %31 = vector.load %arg9[%c0_20, %c0_21] : memref<8x1xf32, #tpu.memory_space<vmem>>, vector<8x1xf32>
    %32 = vector.broadcast %31 : vector<8x1xf32> to vector<8x256xf32>
    %33 = arith.addf %30, %32 : vector<8x256xf32>
    %c0_22 = arith.constant 0 : index
    %c0_23 = arith.constant 0 : index
    %34 = vector.load %arg10[%c0_22, %c0_23] : memref<8x256xf32, #tpu.memory_space<vmem>>, vector<8x256xf32>
    tpu.vector_store %arg10[%c0_22, %c0_23], %33 {strides = array<i32>} : memref<8x256xf32, #tpu.memory_space<vmem>>, vector<8x256xf32>,
    %c0_i32 = arith.constant 0 : i32
    %35 = arith.cmpi eq, %arg0, %c0_i32 : i32
    %c0_i32_24 = arith.constant 0 : i32
    %36 = arith.cmpi eq, %arg1, %c0_i32_24 : i32
    %37 = arith.andi %35, %36 : i1
    %38 = arith.extui %37 : i1 to i32
    %c0_i32_25 = arith.constant 0 : i32
    %39 = arith.cmpi ne, %38, %c0_i32_25 : i32
    scf.if %39 {
      %cst_36 = arith.constant 0.000000e+00 : f32
      %51 = vector.broadcast %cst_36 : f32 to vector<8x1xf32>
      %c0_37 = arith.constant 0 : index
      %c0_38 = arith.constant 0 : index
      %52 = vector.load %arg11[%c0_37, %c0_38] : memref<8x1xf32, #tpu.memory_space<vmem>>, vector<8x1xf32>
      tpu.vector_store %arg11[%c0_37, %c0_38], %51 {strides = array<i32>} : memref<8x1xf32, #tpu.memory_space<vmem>>, vector<8x1xf32>,
      %cst_39 = arith.constant 0.000000e+00 : f32
      %53 = vector.broadcast %cst_39 : f32 to vector<8x1xf32>
      %c0_40 = arith.constant 0 : index
      %c0_41 = arith.constant 0 : index
      %54 = vector.load %arg12[%c0_40, %c0_41] : memref<8x1xf32, #tpu.memory_space<vmem>>, vector<8x1xf32>
      tpu.vector_store %arg12[%c0_40, %c0_41], %53 {strides = array<i32>} : memref<8x1xf32, #tpu.memory_space<vmem>>, vector<8x1xf32>,
    } else {
    }
    %c0_26 = arith.constant 0 : index
    %c0_27 = arith.constant 0 : index
    %40 = vector.load %arg11[%c0_26, %c0_27] : memref<8x1xf32, #tpu.memory_space<vmem>>, vector<8x1xf32>
    %cst_28 = arith.constant dense<0.000000e+00> : vector<8xf32>
    %41 = vector.multi_reduction <add>, %33, %cst_28 [1] : vector<8x256xf32> to vector<8xf32>
    %42 = vector.shape_cast %41 : vector<8xf32> to vector<8x1xf32>
    %43 = arith.addf %40, %42 : vector<8x1xf32>
    %c0_29 = arith.constant 0 : index
    %c0_30 = arith.constant 0 : index
    %44 = vector.load %arg11[%c0_29, %c0_30] : memref<8x1xf32, #tpu.memory_space<vmem>>, vector<8x1xf32>
    tpu.vector_store %arg11[%c0_29, %c0_30], %43 {strides = array<i32>} : memref<8x1xf32, #tpu.memory_space<vmem>>, vector<8x1xf32>,
    %c0_31 = arith.constant 0 : index
    %c0_32 = arith.constant 0 : index
    %45 = vector.load %arg12[%c0_31, %c0_32] : memref<8x1xf32, #tpu.memory_space<vmem>>, vector<8x1xf32>
    %46 = arith.mulf %33, %33 : vector<8x256xf32>
    %cst_33 = arith.constant dense<0.000000e+00> : vector<8xf32>
    %47 = vector.multi_reduction <add>, %46, %cst_33 [1] : vector<8x256xf32> to vector<8xf32>
    %48 = vector.shape_cast %47 : vector<8xf32> to vector<8x1xf32>
    %49 = arith.addf %45, %48 : vector<8x1xf32>
    %c0_34 = arith.constant 0 : index
    %c0_35 = arith.constant 0 : index
    %50 = vector.load %arg12[%c0_34, %c0_35] : memref<8x1xf32, #tpu.memory_space<vmem>>, vector<8x1xf32>
    tpu.vector_store %arg12[%c0_34, %c0_35], %49 {strides = array<i32>} : memref<8x1xf32, #tpu.memory_space<vmem>>, vector<8x1xf32>,
    return
  }
  func.func @transform_0(%arg0: i32, %arg1: i32) -> (i32, i32, i32) {
    %c1_i32 = arith.constant 1 : i32
    %0 = arith.muli %arg0, %c1_i32 : i32
    %1 = arith.addi %0, %arg1 : i32
    %c0_i32 = arith.constant 0 : i32
    %c0_i32_0 = arith.constant 0 : i32
    %c0_i32_1 = arith.constant 0 : i32
    return %c0_i32, %c0_i32_0, %1 : i32, i32, i32
  }
  func.func @transform_1(%arg0: i32, %arg1: i32) -> (i32, i32) {
    %c0_i32 = arith.constant 0 : i32
    %c0_i32_0 = arith.constant 0 : i32
    %c0_i32_1 = arith.constant 0 : i32
    return %c0_i32, %c0_i32_0 : i32, i32
  }
  func.func @transform_2(%arg0: i32, %arg1: i32) -> (i32, i32) {
    %c0_i32 = arith.constant 0 : i32
    %c0_i32_0 = arith.constant 0 : i32
    %c0_i32_1 = arith.constant 0 : i32
    return %c0_i32, %c0_i32_0 : i32, i32
  }
  func.func @transform_3(%arg0: i32, %arg1: i32) -> (i32, i32) {
    %c0_i32 = arith.constant 0 : i32
    %c0_i32_0 = arith.constant 0 : i32
    %c0_i32_1 = arith.constant 0 : i32
    return %c0_i32, %c0_i32_0 : i32, i32
  }
  func.func @transform_4(%arg0: i32, %arg1: i32) -> (i32, i32) {
    %c0_i32 = arith.constant 0 : i32
    %c0_i32_0 = arith.constant 0 : i32
    %c0_i32_1 = arith.constant 0 : i32
    return %c0_i32, %c0_i32_0 : i32, i32
  }
  func.func @transform_5(%arg0: i32, %arg1: i32) -> (i32, i32, i32) {
    %c0_i32 = arith.constant 0 : i32
    %c0_i32_0 = arith.constant 0 : i32
    %c0_i32_1 = arith.constant 0 : i32
    return %arg0, %c0_i32, %c0_i32_0 : i32, i32, i32
  }
  func.func @transform_6(%arg0: i32, %arg1: i32) -> (i32, i32, i32) {
    %c0_i32 = arith.constant 0 : i32
    %c0_i32_0 = arith.constant 0 : i32
    %c0_i32_1 = arith.constant 0 : i32
    %c0_i32_2 = arith.constant 0 : i32
    return %c0_i32, %c0_i32_0, %c0_i32_1 : i32, i32, i32
  }
  func.func @transform_7(%arg0: i32, %arg1: i32) -> (i32, i32) {
    %c0_i32 = arith.constant 0 : i32
    %c0_i32_0 = arith.constant 0 : i32
    %c0_i32_1 = arith.constant 0 : i32
    return %c0_i32, %c0_i32_0 : i32, i32
  }
  func.func @transform_8(%arg0: i32, %arg1: i32) -> (i32, i32) {
    %c1_i32 = arith.constant 1 : i32
    %0 = arith.muli %arg0, %c1_i32 : i32
    %1 = arith.addi %0, %arg1 : i32
    %c0_i32 = arith.constant 0 : i32
    %c0_i32_0 = arith.constant 0 : i32
    return %c0_i32, %1 : i32, i32
  }
  func.func @transform_9(%arg0: i32, %arg1: i32) -> (i32, i32) {
    %c0_i32 = arith.constant 0 : i32
    %c0_i32_0 = arith.constant 0 : i32
    %c0_i32_1 = arith.constant 0 : i32
    return %c0_i32, %c0_i32_0 : i32, i32
  }
  func.func @transform_10(%arg0: i32, %arg1: i32) -> (i32, i32) {
    %c0_i32 = arith.constant 0 : i32
    %c0_i32_0 = arith.constant 0 : i32
    %c0_i32_1 = arith.constant 0 : i32
    return %c0_i32, %c0_i32_0 : i32, i32
  }
}

module attributes {stable_mosaic.version = 11 : i64} {
  func.func @_residual_kernel(%arg0: i32, %arg1: memref<8x256xf32, #tpu.memory_space<vmem>>, %arg2: memref<8x1xf32, #tpu.memory_space<vmem>>, %arg3: memref<8x1xf32, #tpu.memory_space<vmem>>, %arg4: memref<8x1xf32, #tpu.memory_space<vmem>>, %arg5: memref<8x1xf32, #tpu.memory_space<vmem>>, %arg6: memref<8x256xf32, #tpu.memory_space<vmem>>, %arg7: memref<8x256xf32, #tpu.memory_space<vmem>>, %arg8: memref<8x1xf32, #tpu.memory_space<vmem>>, %arg9: memref<8x1xf32, #tpu.memory_space<vmem>>, %arg10: memref<8x1xf32, #tpu.memory_space<vmem>>, %arg11: memref<8x1xf32, #tpu.memory_space<vmem>>, %arg12: memref<8x256xf32, #tpu.memory_space<vmem>>, %arg13: memref<8x1xf32, #tpu.memory_space<vmem>>, %arg14: memref<8x1xf32, #tpu.memory_space<vmem>>, %arg15: memref<8x1xf32, #tpu.memory_space<vmem>>, %arg16: memref<8x1xf32, #tpu.memory_space<vmem>>, %arg17: memref<8x256xf32, #tpu.memory_space<vmem>>) attributes {dimension_semantics = [#tpu.dimension_semantics<parallel>], iteration_bounds = array<i64: 2>, scalar_prefetch = 0 : i64, scratch_operands = 0 : i64, tpu.core_type = #tpu.core_type<tc>, window_params = [{transform_indices = @transform_0, window_bounds = array<i64: 8, 256>}, {pipeline_mode = #tpu.pipeline_mode<synchronous>, transform_indices = @transform_1, window_bounds = array<i64: 8, 1>}, {pipeline_mode = #tpu.pipeline_mode<synchronous>, transform_indices = @transform_2, window_bounds = array<i64: 8, 1>}, {pipeline_mode = #tpu.pipeline_mode<synchronous>, transform_indices = @transform_3, window_bounds = array<i64: 8, 1>}, {pipeline_mode = #tpu.pipeline_mode<synchronous>, transform_indices = @transform_4, window_bounds = array<i64: 8, 1>}, {transform_indices = @transform_5, window_bounds = array<i64: 8, 256>}, {transform_indices = @transform_6, window_bounds = array<i64: 8, 256>}, {pipeline_mode = #tpu.pipeline_mode<synchronous>, transform_indices = @transform_7, window_bounds = array<i64: 8, 1>}, {pipeline_mode = #tpu.pipeline_mode<synchronous>, transform_indices = @transform_8, window_bounds = array<i64: 8, 1>}, {pipeline_mode = #tpu.pipeline_mode<synchronous>, transform_indices = @transform_9, window_bounds = array<i64: 8, 1>}, {pipeline_mode = #tpu.pipeline_mode<synchronous>, transform_indices = @transform_10, window_bounds = array<i64: 8, 1>}, {transform_indices = @transform_11, window_bounds = array<i64: 8, 256>}, {pipeline_mode = #tpu.pipeline_mode<synchronous>, transform_indices = @transform_12, window_bounds = array<i64: 8, 1>}, {pipeline_mode = #tpu.pipeline_mode<synchronous>, transform_indices = @transform_13, window_bounds = array<i64: 8, 1>}, {pipeline_mode = #tpu.pipeline_mode<synchronous>, transform_indices = @transform_14, window_bounds = array<i64: 8, 1>}, {pipeline_mode = #tpu.pipeline_mode<synchronous>, transform_indices = @transform_15, window_bounds = array<i64: 8, 1>}, {transform_indices = @transform_16, window_bounds = array<i64: 8, 256>}]} {
    %c0 = arith.constant 0 : index
    %c0_0 = arith.constant 0 : index
    %0 = vector.load %arg1[%c0, %c0_0] : memref<8x256xf32, #tpu.memory_space<vmem>>, vector<8x256xf32>
    %c0_1 = arith.constant 0 : index
    %c0_2 = arith.constant 0 : index
    %1 = vector.load %arg2[%c0_1, %c0_2] : memref<8x1xf32, #tpu.memory_space<vmem>>, vector<8x1xf32>
    %c0_3 = arith.constant 0 : index
    %c0_4 = arith.constant 0 : index
    %2 = vector.load %arg3[%c0_3, %c0_4] : memref<8x1xf32, #tpu.memory_space<vmem>>, vector<8x1xf32>
    %c0_5 = arith.constant 0 : index
    %c0_6 = arith.constant 0 : index
    %3 = vector.load %arg4[%c0_5, %c0_6] : memref<8x1xf32, #tpu.memory_space<vmem>>, vector<8x1xf32>
    %c0_7 = arith.constant 0 : index
    %c0_8 = arith.constant 0 : index
    %4 = vector.load %arg5[%c0_7, %c0_8] : memref<8x1xf32, #tpu.memory_space<vmem>>, vector<8x1xf32>
    %cst = arith.constant 0.001953125 : f32
    %5 = vector.broadcast %cst : f32 to vector<8x1xf32>
    %6 = arith.mulf %1, %5 : vector<8x1xf32>
    %cst_9 = arith.constant 0.001953125 : f32
    %7 = vector.broadcast %cst_9 : f32 to vector<8x1xf32>
    %8 = arith.mulf %2, %7 : vector<8x1xf32>
    %9 = arith.mulf %6, %6 : vector<8x1xf32>
    %10 = arith.subf %8, %9 : vector<8x1xf32>
    %cst_10 = arith.constant 9.99999974E-6 : f32
    %11 = vector.broadcast %cst_10 : f32 to vector<8x1xf32>
    %12 = arith.addf %10, %11 : vector<8x1xf32>
    %13 = math.rsqrt %12 : vector<8x1xf32>
    %14 = arith.mulf %13, %3 : vector<8x1xf32>
    %15 = arith.mulf %6, %14 : vector<8x1xf32>
    %16 = arith.subf %4, %15 : vector<8x1xf32>
    %17 = vector.broadcast %14 : vector<8x1xf32> to vector<8x256xf32>
    %18 = arith.mulf %0, %17 : vector<8x256xf32>
    %19 = vector.broadcast %16 : vector<8x1xf32> to vector<8x256xf32>
    %20 = arith.addf %18, %19 : vector<8x256xf32>
    %c0_11 = arith.constant 0 : index
    %c0_12 = arith.constant 0 : index
    %21 = vector.load %arg7[%c0_11, %c0_12] : memref<8x256xf32, #tpu.memory_space<vmem>>, vector<8x256xf32>
    %c0_13 = arith.constant 0 : index
    %c0_14 = arith.constant 0 : index
    %22 = vector.load %arg8[%c0_13, %c0_14] : memref<8x1xf32, #tpu.memory_space<vmem>>, vector<8x1xf32>
    %c0_15 = arith.constant 0 : index
    %c0_16 = arith.constant 0 : index
    %23 = vector.load %arg9[%c0_15, %c0_16] : memref<8x1xf32, #tpu.memory_space<vmem>>, vector<8x1xf32>
    %c0_17 = arith.constant 0 : index
    %c0_18 = arith.constant 0 : index
    %24 = vector.load %arg10[%c0_17, %c0_18] : memref<8x1xf32, #tpu.memory_space<vmem>>, vector<8x1xf32>
    %c0_19 = arith.constant 0 : index
    %c0_20 = arith.constant 0 : index
    %25 = vector.load %arg11[%c0_19, %c0_20] : memref<8x1xf32, #tpu.memory_space<vmem>>, vector<8x1xf32>
    %cst_21 = arith.constant 0.001953125 : f32
    %26 = vector.broadcast %cst_21 : f32 to vector<8x1xf32>
    %27 = arith.mulf %22, %26 : vector<8x1xf32>
    %cst_22 = arith.constant 0.001953125 : f32
    %28 = vector.broadcast %cst_22 : f32 to vector<8x1xf32>
    %29 = arith.mulf %23, %28 : vector<8x1xf32>
    %30 = arith.mulf %27, %27 : vector<8x1xf32>
    %31 = arith.subf %29, %30 : vector<8x1xf32>
    %cst_23 = arith.constant 9.99999974E-6 : f32
    %32 = vector.broadcast %cst_23 : f32 to vector<8x1xf32>
    %33 = arith.addf %31, %32 : vector<8x1xf32>
    %34 = math.rsqrt %33 : vector<8x1xf32>
    %35 = arith.mulf %34, %24 : vector<8x1xf32>
    %36 = arith.mulf %27, %35 : vector<8x1xf32>
    %37 = arith.subf %25, %36 : vector<8x1xf32>
    %38 = vector.broadcast %35 : vector<8x1xf32> to vector<8x256xf32>
    %39 = arith.mulf %21, %38 : vector<8x256xf32>
    %40 = vector.broadcast %37 : vector<8x1xf32> to vector<8x256xf32>
    %41 = arith.addf %39, %40 : vector<8x256xf32>
    %cst_24 = arith.constant 0.000000e+00 : f32
    %42 = vector.broadcast %cst_24 : f32 to vector<8x256xf32>
    %43 = arith.maximumf %41, %42 : vector<8x256xf32>
    %c0_25 = arith.constant 0 : index
    %c0_26 = arith.constant 0 : index
    %44 = vector.load %arg12[%c0_25, %c0_26] : memref<8x256xf32, #tpu.memory_space<vmem>>, vector<8x256xf32>
    %c0_27 = arith.constant 0 : index
    %c0_28 = arith.constant 0 : index
    %45 = vector.load %arg13[%c0_27, %c0_28] : memref<8x1xf32, #tpu.memory_space<vmem>>, vector<8x1xf32>
    %c0_29 = arith.constant 0 : index
    %c0_30 = arith.constant 0 : index
    %46 = vector.load %arg14[%c0_29, %c0_30] : memref<8x1xf32, #tpu.memory_space<vmem>>, vector<8x1xf32>
    %c0_31 = arith.constant 0 : index
    %c0_32 = arith.constant 0 : index
    %47 = vector.load %arg15[%c0_31, %c0_32] : memref<8x1xf32, #tpu.memory_space<vmem>>, vector<8x1xf32>
    %c0_33 = arith.constant 0 : index
    %c0_34 = arith.constant 0 : index
    %48 = vector.load %arg16[%c0_33, %c0_34] : memref<8x1xf32, #tpu.memory_space<vmem>>, vector<8x1xf32>
    %cst_35 = arith.constant 0.001953125 : f32
    %49 = vector.broadcast %cst_35 : f32 to vector<8x1xf32>
    %50 = arith.mulf %45, %49 : vector<8x1xf32>
    %cst_36 = arith.constant 0.001953125 : f32
    %51 = vector.broadcast %cst_36 : f32 to vector<8x1xf32>
    %52 = arith.mulf %46, %51 : vector<8x1xf32>
    %53 = arith.mulf %50, %50 : vector<8x1xf32>
    %54 = arith.subf %52, %53 : vector<8x1xf32>
    %cst_37 = arith.constant 9.99999974E-6 : f32
    %55 = vector.broadcast %cst_37 : f32 to vector<8x1xf32>
    %56 = arith.addf %54, %55 : vector<8x1xf32>
    %57 = math.rsqrt %56 : vector<8x1xf32>
    %58 = arith.mulf %57, %47 : vector<8x1xf32>
    %59 = arith.mulf %50, %58 : vector<8x1xf32>
    %60 = arith.subf %48, %59 : vector<8x1xf32>
    %61 = vector.broadcast %58 : vector<8x1xf32> to vector<8x256xf32>
    %62 = arith.mulf %44, %61 : vector<8x256xf32>
    %63 = vector.broadcast %60 : vector<8x1xf32> to vector<8x256xf32>
    %64 = arith.addf %62, %63 : vector<8x256xf32>
    %cst_38 = arith.constant 0.000000e+00 : f32
    %65 = vector.broadcast %cst_38 : f32 to vector<8x256xf32>
    %66 = arith.maximumf %64, %65 : vector<8x256xf32>
    %c0_39 = arith.constant 0 : index
    %c0_40 = arith.constant 0 : index
    %67 = vector.load %arg6[%c0_39, %c0_40] : memref<8x256xf32, #tpu.memory_space<vmem>>, vector<8x256xf32>
    %68 = arith.addf %20, %67 : vector<8x256xf32>
    %69 = arith.addf %68, %43 : vector<8x256xf32>
    %70 = arith.addf %69, %66 : vector<8x256xf32>
    %cst_41 = arith.constant 0.000000e+00 : f32
    %71 = vector.broadcast %cst_41 : f32 to vector<8x256xf32>
    %72 = arith.maximumf %70, %71 : vector<8x256xf32>
    %c0_42 = arith.constant 0 : index
    %c0_43 = arith.constant 0 : index
    %73 = vector.load %arg17[%c0_42, %c0_43] : memref<8x256xf32, #tpu.memory_space<vmem>>, vector<8x256xf32>
    tpu.vector_store %arg17[%c0_42, %c0_43], %72 {strides = array<i32>} : memref<8x256xf32, #tpu.memory_space<vmem>>, vector<8x256xf32>,
    return
  }
  func.func @transform_0(%arg0: i32) -> (i32, i32) {
    %c0_i32 = arith.constant 0 : i32
    %c0_i32_0 = arith.constant 0 : i32
    return %c0_i32, %arg0 : i32, i32
  }
  func.func @transform_1(%arg0: i32) -> (i32, i32) {
    %c0_i32 = arith.constant 0 : i32
    %c0_i32_0 = arith.constant 0 : i32
    %c0_i32_1 = arith.constant 0 : i32
    return %c0_i32, %c0_i32_0 : i32, i32
  }
  func.func @transform_2(%arg0: i32) -> (i32, i32) {
    %c0_i32 = arith.constant 0 : i32
    %c0_i32_0 = arith.constant 0 : i32
    %c0_i32_1 = arith.constant 0 : i32
    return %c0_i32, %c0_i32_0 : i32, i32
  }
  func.func @transform_3(%arg0: i32) -> (i32, i32) {
    %c0_i32 = arith.constant 0 : i32
    %c0_i32_0 = arith.constant 0 : i32
    %c0_i32_1 = arith.constant 0 : i32
    return %c0_i32, %c0_i32_0 : i32, i32
  }
  func.func @transform_4(%arg0: i32) -> (i32, i32) {
    %c0_i32 = arith.constant 0 : i32
    %c0_i32_0 = arith.constant 0 : i32
    %c0_i32_1 = arith.constant 0 : i32
    return %c0_i32, %c0_i32_0 : i32, i32
  }
  func.func @transform_5(%arg0: i32) -> (i32, i32) {
    %c0_i32 = arith.constant 0 : i32
    %c0_i32_0 = arith.constant 0 : i32
    return %c0_i32, %arg0 : i32, i32
  }
  func.func @transform_6(%arg0: i32) -> (i32, i32) {
    %c0_i32 = arith.constant 0 : i32
    %c0_i32_0 = arith.constant 0 : i32
    return %c0_i32, %arg0 : i32, i32
  }
  func.func @transform_7(%arg0: i32) -> (i32, i32) {
    %c0_i32 = arith.constant 0 : i32
    %c0_i32_0 = arith.constant 0 : i32
    %c0_i32_1 = arith.constant 0 : i32
    return %c0_i32, %c0_i32_0 : i32, i32
  }
  func.func @transform_8(%arg0: i32) -> (i32, i32) {
    %c0_i32 = arith.constant 0 : i32
    %c0_i32_0 = arith.constant 0 : i32
    %c0_i32_1 = arith.constant 0 : i32
    return %c0_i32, %c0_i32_0 : i32, i32
  }
  func.func @transform_9(%arg0: i32) -> (i32, i32) {
    %c0_i32 = arith.constant 0 : i32
    %c0_i32_0 = arith.constant 0 : i32
    %c0_i32_1 = arith.constant 0 : i32
    return %c0_i32, %c0_i32_0 : i32, i32
  }
  func.func @transform_10(%arg0: i32) -> (i32, i32) {
    %c0_i32 = arith.constant 0 : i32
    %c0_i32_0 = arith.constant 0 : i32
    %c0_i32_1 = arith.constant 0 : i32
    return %c0_i32, %c0_i32_0 : i32, i32
  }
  func.func @transform_11(%arg0: i32) -> (i32, i32) {
    %c0_i32 = arith.constant 0 : i32
    %c0_i32_0 = arith.constant 0 : i32
    return %c0_i32, %arg0 : i32, i32
  }
  func.func @transform_12(%arg0: i32) -> (i32, i32) {
    %c0_i32 = arith.constant 0 : i32
    %c0_i32_0 = arith.constant 0 : i32
    %c0_i32_1 = arith.constant 0 : i32
    return %c0_i32, %c0_i32_0 : i32, i32
  }
  func.func @transform_13(%arg0: i32) -> (i32, i32) {
    %c0_i32 = arith.constant 0 : i32
    %c0_i32_0 = arith.constant 0 : i32
    %c0_i32_1 = arith.constant 0 : i32
    return %c0_i32, %c0_i32_0 : i32, i32
  }
  func.func @transform_14(%arg0: i32) -> (i32, i32) {
    %c0_i32 = arith.constant 0 : i32
    %c0_i32_0 = arith.constant 0 : i32
    %c0_i32_1 = arith.constant 0 : i32
    return %c0_i32, %c0_i32_0 : i32, i32
  }
  func.func @transform_15(%arg0: i32) -> (i32, i32) {
    %c0_i32 = arith.constant 0 : i32
    %c0_i32_0 = arith.constant 0 : i32
    %c0_i32_1 = arith.constant 0 : i32
    return %c0_i32, %c0_i32_0 : i32, i32
  }
  func.func @transform_16(%arg0: i32) -> (i32, i32) {
    %c0_i32 = arith.constant 0 : i32
    %c0_i32_0 = arith.constant 0 : i32
    return %c0_i32, %arg0 : i32, i32
  }
}

</mosaic_0001>

<bundles_post_ra>
// kernel: up_forward.9
= control target key start
LH: loop header
LB: loop body
LE: loop exit
PB: predicated region body
PF: predicated region fallthrough
CT: control target
= control target key end

     0   :  { %vm19_vm0 = vcmask 1043456   ;;  %vm15_vm1 = vcmask 3072   ;;  %v42_v1 = vmov 0.0   ;;  %s83_s0 = inlined_call_operand.vmem [shape: f32[4,128], index: 0, kind: input, shape index: {}]   ;;  %s84_s1 = inlined_call_operand.vmem [shape: f32[4,1], index: 1, kind: output, shape index: {0}]   ;;  %s85_s2 = inlined_call_operand.vmem [shape: f32[4,1], index: 2, kind: output, shape index: {1}]  }
   0x1   :  { %v10_v0 = vld [vmem:[%s83_s0] sm:$0xf]  ;;  %16 = vst.msk [vmem:[%s84_s1] sm:$0xf] %vm15_vm1, %v42_v1  ;;  %17 = vst.msk [vmem:[%s85_s2] sm:$0xf] %vm15_vm1, %v42_v1 }
   0x2   :  { %v20_v2 = vsel %vm19_vm0, %v10_v0, 0.0  ;;  %v27_v3 = vmul.f32 %v10_v0, %v10_v0 }
   0x3   :  { %21 = vadd.xlane.f32.xlu0 %v20_v2 }
   0x4   :  { %v28_v4 = vsel %vm19_vm0, %v27_v3, 0.0 }
   0x7   :  { %29 = vadd.xlane.f32.xlu0 %v28_v4 }
   0x8   :  { %v18_v5 = vld [vmem:[%s84_s1] sm:$0xf] }
   0x9   :  { %v26_v8 = vld [vmem:[%s85_s2] sm:$0xf] }
  0x90   :  { %v22_v6 = vpop.xlane.xlu0 %21 }
  0x91   :  { %v23_v7 = vadd.f32 %v22_v6, %v18_v5 }
  0x93   :  { %25 = vst.msk [vmem:[%s84_s1] sm:$0xf] %vm15_vm1, %v23_v7 }
  0x94   :  { %v30_v9 = vpop.xlane.xlu0 %29 }
  0x95   :  { %v31_v10 = vadd.f32 %v30_v9, %v26_v8 }
  0x97   :  { %32 = vst.msk [vmem:[%s85_s2] sm:$0xf] %vm15_vm1, %v31_v10 }

// kernel: up_forward.10
= control target key start
LH: loop header
LB: loop body
LE: loop exit
PB: predicated region body
PF: predicated region fallthrough
CT: control target
= control target key end

     0   :  { %s288_s6 = smov 0   ;;  %s290_s7 = smov 0   ;;  %s323_s0 = inlined_call_operand.vmem [shape: f32[4,512], index: 0, kind: input, shape index: {}]   ;;  %s324_s1 = inlined_call_operand.vmem [shape: f32[2,4,1], index: 1, kind: output, shape index: {}]  }
   0x1   :  { %s292_s8 = smov 0  }
   0x2 LB: > { %s23_s9 = sadd.s32 1, %s271_s7  ;;  %p221_p0 = scmp.ge.s32.totalorder %s275_s8, 1  ;;  %s275_s8 = sphi %s292_s8, %s11_s8   ;;  %s271_s7 = sphi %s290_s7, %s326_s7   ;;  %s267_s6 = sphi %s288_s6, %s325_s6  }
   0x3   : > { %p25_p1 = scmp.ge.s32.totalorder %s23_s9, 2  ;;  %p104_p2 = scmp.lt.s32.totalorder %s275_s8, 3 }
   0x5   : > { %s328_s9 = smov (%p25_p1, %s23_s9), 0  ;;  %p105_p3 = pnand %p221_p0, %p104_p2 }
   0x6   : > { %s222_s10 = sshll.u32 (!%p105_p3), %s267_s6, 1  ;;  %p132_p4 = scmp.lt.s32.totalorder (!%p105_p3), %s267_s6, 1  ;;  %vm141_vm0 = vcmask (!%p105_p3), 3072   ;;  %vm147_vm1 = vcmask (!%p105_p3), 1043456   ;;  %v277_v0 = vmov (!%p105_p3), 0.0  }
   0x7   : > { %108 = sbr.rel (%p105_p3) target bundleno = 168 (0xa8), region = 24  ;;  %p126_p5 = scmp.lt.s32.totalorder (!%p105_p3), %s222_s10, 3 }
   0xe   : > { %s330_s6 = smov (!%p132_p4, %s267_s6), 1  ;;  %s332_s10 = smov (!%p126_p5, %s222_s10), 3 }
   0xf   : > { %s224_s11 = sshll.u32 %s330_s6, 2  ;;  %s223_s12 = sshll.u32 %s332_s10, 2 }
  0x10   : > { %s135_s15 = scalar_lea.vmem %s324_s1, %s224_s11  ;;  %s129_s18 = scalar_lea.vmem %s323_s0, %s223_s12 }
  0x11   : > { %142 = vst.msk [vmem:[%s135_s15] sm:$0xf] %vm141_vm0, %v277_v0  ;;  %v136_v1 = vld [vmem:[%s129_s18] sm:$0xff] }
  0x12   : > { %v145_v2 = vcombine.high %v136_v1, %v136_v1  ;;  %v148_v3 = vsel %vm147_vm1, %v136_v1, 0.0 }
  0x14   : > { %v149_v4 = vsel %vm147_vm1, %v145_v2, 0.0 }
  0x15   : > { %v150_v5 = vadd.f32 %v149_v4, %v148_v3 }
  0x17   : > { %151 = vadd.xlane.f32.xlu0 %v150_v5 }
  0x18   : > { %v143_v6 = vld [vmem:[%s135_s15] sm:$0xf] }
  0xa4   : > { %v152_v7 = vpop.xlane.xlu0 %151 }
  0xa5   : > { %v153_v8 = vadd.f32 %v152_v7, %v143_v6 }
  0xa7   : > { %155 = vst.msk [vmem:[%s135_s15] sm:$0xf] %vm141_vm0, %v153_v8 }
  0xa8 PF: > { %s11_s8 = sadd.s32 1, %s275_s8   ;;  %s325_s6 = smov %s271_s7 }
  0xa9   : > { %p8_p6 = scmp.ge.s32.totalorder %s11_s8, 4   ;;  %s326_s7 = smov %s328_s9 }
  0xab   :  { %10 = sbr.rel (!%p8_p6) target bundleno = 2 (0x2), region = 58 }

// kernel: up_forward.11
= control target key start
LH: loop header
LB: loop body
LE: loop exit
PB: predicated region body
PF: predicated region fallthrough
CT: control target
= control target key end

     0   :  { %s1106_s27 = smov 0   ;;  %s1108_s28 = smov 0   ;;  %s1202_s0 = inlined_call_operand.vmem [shape: f32[4,512], index: 0, kind: input, shape index: {}]   ;;  %s1203_s1 = inlined_call_operand.vmem [shape: f32[4,512], index: 1, kind: input, shape index: {}]   ;;  %s1204_s2 = inlined_call_operand.vmem [shape: f32[1,512], index: 2, kind: input, shape index: {}]   ;;  %s1205_s3 = inlined_call_operand.vmem [shape: f32[4,1], index: 3, kind: input, shape index: {}]   ;;  %s1206_s4 = inlined_call_operand.vmem [shape: f32[4,1], index: 4, kind: input, shape index: {}]   ;;  %s1207_s5 = inlined_call_operand.vmem [shape: f32[4,1], index: 5, kind: input, shape index: {}]   ;;  %s1208_s6 = inlined_call_operand.vmem [shape: f32[4,1], index: 6, kind: input, shape index: {}]   ;;  %s1209_s7 = inlined_call_operand.vmem [shape: f32[4,1], index: 7, kind: input, shape index: {}]   ;;  %s1210_s8 = inlined_call_operand.<no memory space> [shape: f32[1,1], index: 8, kind: input, shape index: {}]   ;;  %s1211_s9 = inlined_call_operand.vmem [shape: f32[2,4,1], index: 9, kind: input, shape index: {}]   ;;  %s1212_s10 = inlined_call_operand.vmem [shape: f32[8,4], index: 10, kind: input, shape index: {}]   ;;  %s1213_s11 = inlined_call_operand.vmem [shape: f32[8,4], index: 11, kind: input, shape index: {}]   ;;  %s1214_s12 = inlined_call_operand.vmem [shape: f32[8,1], index: 12, kind: input, shape index: {}]   ;;  %s1215_s13 = inlined_call_operand.vmem [shape: f32[8,512], index: 13, kind: output, shape index: {}]  }
   0x1   :  { %v18_v0 = vstv %s1210_s8  ;;  %s1110_s29 = smov 0  }
   0x2   :  { %19 = vst [vmem:[#allocation2] sm:$0x1] %v18_v0 }
   0x3 LB: > { %s37_s8 = sadd.s32 1, %s1024_s28  ;;  %p945_p0 = scmp.ge.s32.totalorder %s1028_s29, 1  ;;  %s1028_s29 = sphi %s1110_s29, %s25_s29   ;;  %s1024_s28 = sphi %s1108_s28, %s1217_s28   ;;  %s1020_s27 = sphi %s1106_s27, %s1216_s27  }
   0x4   : > { %p39_p1 = scmp.ge.s32.totalorder %s37_s8, 2  ;;  %p446_p2 = scmp.lt.s32.totalorder %s1028_s29, 3 }
   0x6   : > { %s1219_s8 = smov (%p39_p1, %s37_s8), 0  ;;  %p447_p3 = pnand %p945_p0, %p446_p2 }
   0x7   : > { %v543_v1 = vld [vmem:[%s1209_s7] sm:$0xf] (!%p447_p3)  ;;  %p530_p4 = scmp.lt.s32.totalorder (!%p447_p3), %s1020_s27, 1  ;;  %v1030_v2 = vmov (!%p447_p3), 0   ;;  %v1031_v19 = vmov (!%p447_p3), 0.0   ;;  %s946_s16 = sshll.u32 (!%p447_p3), %s1020_s27, 1  ;;  %v575_v25 = vlaneseq (!%p447_p3) }
   0x8   : > { %450 = sbr.rel (%p447_p3) target bundleno = 411 (0x19b), region = 72  ;;  %993 = vset.pattern.permute.xlu0 (!%p447_p3), %v1030_v2  ;;  %994 = vset.pattern.permute.xlu1 (!%p447_p3), %v1030_v2  ;;  %v615_v3 = vld [vmem:[%s1205_s3] sm:$0xf] (!%p447_p3)  ;;  %p509_p5 = scmp.lt.s32.totalorder (!%p447_p3), %s946_s16, 3  ;;  %vm554_vm0 = vcmask (!%p447_p3), 1043456   ;;  %vm671_vm1 = vcmask (!%p447_p3), 31744  }
   0x9   : > { %v616_v4 = vld [vmem:[%s1206_s4] sm:$0xf] (!%p447_p3)  ;;  %546 = vperm.xlu0 (!%p447_p3), %993, %v543_v1   ;;  %v619_v5 = vmul.f32 (!%p447_p3), 0.0078125, %v615_v3  ;;  %743 = vmatprep.mubr.f32.mxu1 (!%p447_p3), %v1031_v19  ;;  %v576_v32 = vshrl.u32 (!%p447_p3), %v575_v25, 7  ;;  %v1032_v38 = vmov (!%p447_p3), 839922192  }
   0xa   : > { %v620_v6 = vmul.f32 (!%p447_p3), 0.0078125, %v616_v4  ;;  %v569_v7 = vld [vmem:[#allocation2] sm:$0x1] (!%p447_p3)  ;;  %823 = vmatprep.mubr.f32.mxu0 (!%p447_p3), %v1031_v19  ;;  %v604_v39 = vunpack.c.l.s4 (!%p447_p3), %v1032_v38 }
   0xb   : > { %v621_v8 = vmul.f32 (!%p447_p3), %v619_v5, %v619_v5  ;;  %v617_v12 = vld [vmem:[%s1207_s5] sm:$0xf] (!%p447_p3)  ;;  %v577_v35 = vsub.s32 (!%p447_p3), 0, %v576_v32  ;;  %v662_v50 = vsub.s32 (!%p447_p3), 1, %v576_v32 }
   0xc   : > { %v618_v15 = vld [vmem:[%s1208_s6] sm:$0xf] (!%p447_p3)  ;;  %v605_v46 = vunpack.c.0.s8 (!%p447_p3), %v604_v39 }
   0xd   : > { %572 = vperm.xlu0 (!%p447_p3), %993, %v569_v7   ;;  %v622_v10 = vsub.f32 (!%p447_p3), %v620_v6, %v621_v8  ;;  %v830_v17 = vld [vmem:[%s1214_s12] sm:$0xff] (!%p447_p3) }
   0xe   : > { %v608_v53 = vsub.s32 (!%p447_p3), %v605_v46, %v576_v32  ;;  %v668_v7 = vld [vmem:[%s1213_s11] sm:$0xff] (!%p447_p3) }
   0xf   : > { %s531_s19 = scalar_select %p530_p4, %s1020_s27, 1  ;;  %v623_v11 = vadd.f32 1e-05, %v622_v10 }
  0x10   : > { %s1221_s16 = smov (!%p509_p5, %s946_s16), 3 }
  0x11   : > { %s951_s20 = sshll.u32 %s531_s19, 2  ;;  %996 = vrsqrt.f32 %v623_v11  ;;  %s947_s17 = sshll.u32 %s1221_s16, 2 }
  0x12   : > { %s533_s23 = scalar_lea.vmem %s1211_s9, %s951_s20  ;;  %s512_s20 = scalar_lea.vmem %s1202_s0, %s947_s17 }
  0x13   : > { %v593_v9 = vld [vmem:[%s533_s23] sm:$0xf]  ;;  %s527_s22 = scalar_lea.vmem %s1204_s2, %s1221_s16  ;;  %s520_s25 = scalar_lea.vmem %s1203_s1, %s947_s17 }
  0x14   : > { %601 = vperm.xlu1 %994, %v593_v9   ;;  %v1158_v20 = vld [vmem:[%s512_s20] sm:$0xff]  ;;  %s953_s17 = sshll.u32 %s1221_s16, 3 }
  0x15   : > { %v550_v21 = vcombine.high %v1158_v20, %v1158_v20  ;;  %v654_v54 = vld [vmem:[%s527_s22] sm:$0x3]  ;;  %s539_s20 = scalar_lea.vmem %s1215_s13, %s953_s17 }
  0x16   : > { %v614_v56 = vld [vmem:[%s520_s25] sm:$0xff]  ;;  %v659_v57 = vrot.slane %v654_v54, %v577_v35  ;;  %v663_v58 = vrot.slane %v654_v54, %v662_v50 }
  0x18   : > { %v664_v63 = vcombine.low %v659_v57, %v663_v58 }
  0x1b   : > { %v997_v13 = vpop.eup %996 }
  0x1c   : > { %v625_v14 = vmul.f32 %v997_v13, %v617_v12 }
  0x1e   : > { %630 = vperm.xlu1 %994, %v625_v14   ;;  %v626_v16 = vmul.f32 %v625_v14, %v619_v5 }
  0x20   : > { %v627_v18 = vsub.f32 %v618_v15, %v626_v16 }
  0x22   : > { %643 = vperm.xlu0 %993, %v627_v18   ;;  %833 = vperm.xlu1 %994, %v830_v17   ;;  %v667_v17 = vld [vmem:[%s1212_s10] sm:$0xff] }
  0x88   : > { %v547_v22 = vpop.permute.xlu0 %546 }
  0x89   : > { %v552_v23 = vmul.f32 %v547_v22, %v1158_v20  ;;  %v553_v24 = vmul.f32 %v550_v21, %v547_v22 }
  0x8b   : > { %v555_v26 = vsel %vm554_vm0, %v552_v23, 0.0  ;;  %v562_v27 = vsel %vm554_vm0, %v553_v24, 0.0 }
  0x8c   : > { %v556_v28 = vrot.slane %v555_v26, 4  ;;  %v563_v29 = vrot.slane %v562_v27, 4  ;;  %v573_v40 = vpop.permute.xlu0 %572 }
  0x8d   : > { %v578_v45 = vrot.slane %v573_v40, %v577_v35 }
  0x8e   : > { %v557_v30 = vadd.f32 %v556_v28, %v555_v26  ;;  %v564_v31 = vadd.f32 %v563_v29, %v562_v27 }
  0x90   : > { %v558_v33 = vrot.slane %v557_v30, 2  ;;  %v565_v34 = vrot.slane %v564_v31, 2 }
  0x92   : > { %v559_v36 = vadd.f32 %v558_v33, %v557_v30  ;;  %v566_v37 = vadd.f32 %v565_v34, %v564_v31 }
  0x93   : > { %v602_v47 = vpop.permute.xlu1 %601 }
  0x94   : > { %v560_v41 = vrot.slane %v559_v36, 1  ;;  %v567_v42 = vrot.slane %v566_v37, 1  ;;  %v609_v9 = vrot.slane %v602_v47, %v608_v53 }
  0x96   : > { %v561_v43 = vadd.f32 %v560_v41, %v559_v36  ;;  %v568_v44 = vadd.f32 %v567_v42, %v566_v37  ;;  %v611_v13 = vmul.f32 %v609_v9, %v1158_v20 }
  0x98   : > { %v579_v48 = vadd.f32 %v578_v45, %v561_v43  ;;  %v580_v49 = vadd.f32 %v578_v45, %v568_v44 }
  0x9a   : > { %v954_v51 = vmul.f32 -1.442695, %v579_v48  ;;  %v955_v52 = vmul.f32 -1.442695, %v580_v49 }
  0x9c   : > { %998 = vpow2.f32 %v954_v51 }
  0x9d   : > { %1000 = vpow2.f32 %v955_v52  ;;  %v631_v55 = vpop.permute.xlu1 %630 }
  0x9e   : > { %v638_v59 = vrot.slane %v631_v55, %v608_v53 }
  0xa0   : > { %v640_v60 = vmul.f32 %v638_v59, %v614_v56 }
  0xa1   : > { %v644_v61 = vpop.permute.xlu0 %643  ;;  %v834_v24 = vpop.permute.xlu1 %833 }
  0xa2   : > { %v651_v62 = vrot.slane %v644_v61, %v608_v53 }
  0xa4   : > { %v653_v0 = vadd.f32 %v651_v62, %v640_v60 }
  0xa6   : > { %v999_v1 = vpop.eup %998  ;;  %v666_v2 = vmul.f32 %v664_v63, %v653_v0 }
  0xa7   : > { %v1001_v3 = vpop.eup %1000  ;;  %v587_v4 = vadd.f32 1.0, %v999_v1 }
  0xa8   : > { %v588_v5 = vadd.f32 1.0, %v1001_v3  ;;  %v670_v6 = vcombine.high %v666_v2, %v666_v2 }
  0xa9   : > { %1002 = vrcp.f32 %v587_v4 }
  0xaa   : > { %1004 = vrcp.f32 %v588_v5  ;;  %956 = vmatprep.subr.msk.mxu1 %vm554_vm0, %v670_v6 }
  0xab   : > { %957 = vmatpush1.msk.msra.mxu1 %vm554_vm0, %v666_v2 }
  0xac   : > { %958 = vmatmul.mubr.msk.f32.vlgmr.msra.gmra.mrb[0].mxu1 %vm671_vm1, %v668_v7 }
  0xb3   : > { %v1003_v8 = vpop.eup %1002 }
  0xb4   : > { %v1005_v10 = vpop.eup %1004 }
  0xb5   : > { %v596_v11 = vcombine.low %v1003_v8, %v1005_v10 }
  0xb7   : > { %v598_v12 = vmul.f32 %v596_v11, %v1158_v20 }
  0xb9   : > { %v612_v14 = vmul.f32 %v611_v13, %v598_v12 }
  0xbb   : > { %v613_v15 = vadd.f32 %v612_v14, %v1158_v20 }
  0xbd   : > { %v751_v16 = vcombine.high %v613_v15, %v613_v15 }
  0xbf   : > { %959 = vmatprep.subr.msk.mxu0 %vm554_vm0, %v751_v16 }
  0xc0   : > { %960 = vmatpush1.msk.msra.mxu0 %vm554_vm0, %v613_v15 }
  0xc1   : > { %961 = vmatmul.mubr.msk.f32.vlgmr.msra.gmra.mrb[0].mxu0 %vm671_vm1, %v667_v17 }
 0x17f   : > { %v745_v18 = vpop.f32.mrb[0].mxu1 }
 0x180   : > { %v747_v19 = vpop.f32.mrb[1].mxu1 }
 0x194   : > { %v825_v21 = vpop.f32.mrb[0].mxu0 }
 0x195   : > { %v826_v22 = vadd.f32 %v825_v21, %v745_v18  ;;  %v827_v23 = vpop.f32.mrb[1].mxu0 }
 0x196   : > { %v828_v20 = vadd.f32 %v827_v23, %v747_v19 }
 0x197   : > { %v836_v25 = vadd.f32 %v834_v24, %v826_v22 }
 0x198   : > { %v837_v26 = vadd.f32 %v834_v24, %v828_v20 }
 0x199   : > { %838 = vst [vmem:[%s539_s20] sm:$0xff] %v836_v25 }
 0x19a   : > { %839 = vst [vmem:[%s539_s20 + $0x8] sm:$0xff] %v837_v26 }
 0x19b PF: > { %s25_s29 = sadd.s32 1, %s1028_s29   ;;  %s1216_s27 = smov %s1024_s28 }
 0x19c   : > { %p22_p6 = scmp.ge.s32.totalorder %s25_s29, 4   ;;  %s1217_s28 = smov %s1219_s8 }
 0x19e   :  { %24 = sbr.rel (!%p22_p6) target bundleno = 3 (0x3), region = 111 }

// kernel: up_forward.12
= control target key start
LH: loop header
LB: loop body
LE: loop exit
PB: predicated region body
PF: predicated region fallthrough
CT: control target
= control target key end

     0   :  { %s536_s18 = smov 0   ;;  %s538_s19 = smov 0   ;;  %s597_s0 = inlined_call_operand.vmem [shape: f32[1,8,512], index: 0, kind: input, shape index: {}]   ;;  %s598_s1 = inlined_call_operand.vmem [shape: f32[1,8,8], index: 1, kind: input, shape index: {}]   ;;  %s599_s2 = inlined_call_operand.vmem [shape: f32[8,1], index: 2, kind: input, shape index: {}]   ;;  %s600_s3 = inlined_call_operand.vmem [shape: f32[8,512], index: 3, kind: output, shape index: {0}]   ;;  %s601_s4 = inlined_call_operand.vmem [shape: f32[8,1], index: 4, kind: output, shape index: {1}]   ;;  %s602_s5 = inlined_call_operand.vmem [shape: f32[8,1], index: 5, kind: output, shape index: {2}]  }
   0x1   :  { %s540_s20 = smov 0  }
   0x2 LB: > { %s28_s21 = sadd.s32 1, %s497_s19  ;;  %p441_p0 = scmp.ge.s32.totalorder %s501_s20, 1  ;;  %s501_s20 = sphi %s540_s20, %s16_s20   ;;  %s497_s19 = sphi %s538_s19, %s604_s19   ;;  %s493_s18 = sphi %s536_s18, %s603_s18  }
   0x3   : > { %p30_p1 = scmp.ge.s32.totalorder %s28_s21, 2  ;;  %p201_p2 = scmp.lt.s32.totalorder %s501_s20, 3 }
   0x5   : > { %s606_s21 = smov (%p30_p1, %s28_s21), 0  ;;  %p202_p3 = pnand %p441_p0, %p201_p2 }
   0x6   : > { %s442_s22 = sshll.u32 (!%p202_p3), %s493_s18, 1  ;;  %v250_v0 = vld [vmem:[%s599_s2] sm:$0xff] (!%p202_p3)  ;;  %v503_v1 = vmov (!%p202_p3), 0.0   ;;  %v504_v2 = vmov (!%p202_p3), 0   ;;  %vm256_vm0 = vcmask (!%p202_p3), 64512   ;;  %p333_p5 = scmp.eq.s32.totalorder (!%p202_p3), %s493_s18, 0 }
   0x7   : > { %205 = sbr.rel (%p202_p3) target bundleno = 387 (0x183), region = 32  ;;  %p233_p4 = scmp.lt.s32.totalorder (!%p202_p3), %s442_s22, 3  ;;  %324 = vmatprep.mubr.f32.mxu0 (!%p202_p3), %v503_v1  ;;  %478 = vset.pattern.permute.xlu0 (!%p202_p3), %v504_v2  ;;  %v249_v5 = vld [vmem:[%s598_s1] sm:$0xff] (!%p202_p3) }
   0x8   : > { %253 = vperm.xlu0 (!%p202_p3), %478, %v250_v0  }
   0xe   : > { %s608_s22 = smov (!%p233_p4, %s442_s22), 3  ;;  %vm339_vm1 = vcmask (%p333_p5), 7168   ;;  %v505_v11 = vmov (%p333_p5), 0.0  }
   0xf   : > { %s443_s25 = sshll.u32 %s608_s22, 3  ;;  %340 = vst.msk [vmem:[%s601_s4] sm:$0xff] (%p333_p5), %vm339_vm1, %v505_v11  ;;  %341 = vst.msk [vmem:[%s602_s5] sm:$0xff] (%p333_p5), %vm339_vm1, %v505_v11 }
  0x10   : > { %s236_s28 = scalar_lea.vmem %s597_s0, %s443_s25  ;;  %s244_s8 = scalar_lea.vmem %s600_s3, %s443_s25 }
  0x11   : > { %v248_v3 = vld [vmem:[%s236_s28 + $0x8] sm:$0xff]  ;;  %v247_v4 = vld [vmem:[%s236_s28] sm:$0xff] }
  0x12   : > { %260 = vmatprep.subr.mxu0 %v248_v3 }
  0x13   : > { %261 = vmatpush1.msra.mxu0 %v247_v4 }
  0x14   : > { %446 = vmatmul.mubr.msk.f32.vlgmr.msra.gmra.mrb[0].mxu0 %vm256_vm0, %v249_v5 }
  0x87   : > { %v254_v6 = vpop.permute.xlu0 %253 }
  0xe5   : > { %338 = sbr.rel (!%p333_p5) target bundleno = 236 (0xec), region = 36 }
  0xe7   : > { %v326_v7 = vpop.f32.mrb[0].mxu0 }
  0xe8   : > { %v327_v8 = vadd.f32 %v326_v7, %v254_v6  ;;  %v328_v9 = vpop.f32.mrb[1].mxu0 }
  0xe9   : > { %v329_v10 = vadd.f32 %v328_v9, %v254_v6 }
  0xea   : > { %331 = vst [vmem:[%s244_s8] sm:$0xff] %v327_v8 }
  0xeb   : > { %332 = vst [vmem:[%s244_s8 + $0x8] sm:$0xff] %v329_v10 }
  0xec PF: > { %v343_v12 = vadd.f32 %v329_v10, %v327_v8  ;;  %v350_v13 = vmul.f32 %v327_v8, %v327_v8  ;;  %v351_v14 = vmul.f32 %v329_v10, %v329_v10  ;;  %v342_v16 = vld [vmem:[%s601_s4] sm:$0xff]  ;;  %vm347_vm2 = vcmask 7168  }
  0xed   : > { %v349_v19 = vld [vmem:[%s602_s5] sm:$0xff] }
  0xee   : > { %344 = vadd.xlane.f32.xlu0 %v343_v12  ;;  %v352_v15 = vadd.f32 %v351_v14, %v350_v13 }
  0xf2   : > { %353 = vadd.xlane.f32.xlu0 %v352_v15 }
 0x17b   : > { %v345_v17 = vpop.xlane.xlu0 %344 }
 0x17c   : > { %v346_v18 = vadd.f32 %v345_v17, %v342_v16 }
 0x17e   : > { %348 = vst.msk [vmem:[%s601_s4] sm:$0xff] %vm347_vm2, %v346_v18 }
 0x17f   : > { %v354_v20 = vpop.xlane.xlu0 %353 }
 0x180   : > { %v355_v21 = vadd.f32 %v354_v20, %v349_v19 }
 0x182   : > { %356 = vst.msk [vmem:[%s602_s5] sm:$0xff] %vm347_vm2, %v355_v21 }
 0x183 PF: > { %s16_s20 = sadd.s32 1, %s501_s20   ;;  %s603_s18 = smov %s497_s19 }
 0x184   : > { %p13_p6 = scmp.ge.s32.totalorder %s16_s20, 4   ;;  %s604_s19 = smov %s606_s21 }
 0x186   :  { %15 = sbr.rel (!%p13_p6) target bundleno = 2 (0x2), region = 82 }

// kernel: up_forward.15
= control target key start
LH: loop header
LB: loop body
LE: loop exit
PB: predicated region body
PF: predicated region fallthrough
CT: control target
= control target key end

     0   :  { %s444_s18 = smov 0   ;;  %s446_s19 = smov 0   ;;  %s496_s0 = inlined_call_operand.vmem [shape: f32[8,512], index: 0, kind: input, shape index: {}]   ;;  %s497_s1 = inlined_call_operand.vmem [shape: f32[8,1], index: 1, kind: input, shape index: {}]   ;;  %s498_s2 = inlined_call_operand.vmem [shape: f32[8,1], index: 2, kind: input, shape index: {}]   ;;  %s499_s3 = inlined_call_operand.vmem [shape: f32[8,1], index: 3, kind: input, shape index: {}]   ;;  %s500_s4 = inlined_call_operand.vmem [shape: f32[8,1], index: 4, kind: input, shape index: {}]   ;;  %s501_s5 = inlined_call_operand.vmem [shape: f32[2,8,1], index: 5, kind: output, shape index: {}]  }
   0x1   :  { %s448_s20 = smov 0  }
   0x2 LB: > { %s27_s21 = sadd.s32 1, %s406_s19  ;;  %p353_p0 = scmp.ge.s32.totalorder %s410_s20, 1  ;;  %s410_s20 = sphi %s448_s20, %s15_s20   ;;  %s406_s19 = sphi %s446_s19, %s503_s19   ;;  %s402_s18 = sphi %s444_s18, %s502_s18  }
   0x3   : > { %p29_p1 = scmp.ge.s32.totalorder %s27_s21, 2  ;;  %p204_p2 = scmp.lt.s32.totalorder %s410_s20, 3 }
   0x5   : > { %s505_s21 = smov (%p29_p1, %s27_s21), 0  ;;  %p205_p3 = pnand %p353_p0, %p204_p2 }
   0x6   : > { %v246_v0 = vld [vmem:[%s497_s1] sm:$0xff] (!%p205_p3)  ;;  %v412_v2 = vmov (!%p205_p3), 0   ;;  %p240_p4 = scmp.lt.s32.totalorder (!%p205_p3), %s402_s18, 1  ;;  %vm279_vm0 = vcmask (!%p205_p3), 7168   ;;  %v413_v14 = vmov (!%p205_p3), 0.0   ;;  %s354_s10 = sshll.u32 (!%p205_p3), %s402_s18, 1 }
   0x7   : > { %208 = sbr.rel (%p205_p3) target bundleno = 311 (0x137), region = 40  ;;  %v247_v1 = vld [vmem:[%s498_s2] sm:$0xff] (!%p205_p3)  ;;  %385 = vset.pattern.permute.xlu0 (!%p205_p3), %v412_v2  ;;  %v250_v3 = vmul.f32 (!%p205_p3), 0.001953125, %v246_v0  ;;  %p234_p5 = scmp.lt.s32.totalorder (!%p205_p3), %s354_s10, 3 }
   0x8   : > { %v251_v4 = vmul.f32 (!%p205_p3), 0.001953125, %v247_v1  ;;  %v248_v8 = vld [vmem:[%s499_s3] sm:$0xff] (!%p205_p3) }
   0x9   : > { %v252_v5 = vmul.f32 (!%p205_p3), %v250_v3, %v250_v3  ;;  %v249_v11 = vld [vmem:[%s500_s4] sm:$0xff] (!%p205_p3) }
   0xb   : > { %v253_v6 = vsub.f32 (!%p205_p3), %v251_v4, %v252_v5 }
   0xd   : > { %v254_v7 = vadd.f32 (!%p205_p3), 1e-05, %v253_v6 }
   0xe   : > { %s241_s30 = scalar_select %p240_p4, %s402_s18, 1 }
   0xf   : > { %386 = vrsqrt.f32 %v254_v7  ;;  %s507_s10 = smov (!%p234_p5, %s354_s10), 3 }
  0x10   : > { %s356_s6 = sshll.u32 %s241_s30, 3  ;;  %s355_s11 = sshll.u32 %s507_s10, 3 }
  0x11   : > { %s243_s9 = scalar_lea.vmem %s501_s5, %s356_s6  ;;  %s237_s14 = scalar_lea.vmem %s496_s0, %s355_s11 }
  0x12   : > { %280 = vst.msk [vmem:[%s243_s9] sm:$0xff] %vm279_vm0, %v413_v14  ;;  %v244_v16 = vld [vmem:[%s237_s14] sm:$0xff]  ;;  %v245_v17 = vld [vmem:[%s237_s14 + $0x8] sm:$0xff] }
  0x19   : > { %v387_v9 = vpop.eup %386  ;;  %v281_v26 = vld [vmem:[%s243_s9] sm:$0xff] }
  0x1a   : > { %v256_v10 = vmul.f32 %v387_v9, %v248_v8 }
  0x1c   : > { %261 = vperm.xlu0 %385, %v256_v10   ;;  %v257_v12 = vmul.f32 %v256_v10, %v250_v3 }
  0x1e   : > { %v258_v13 = vsub.f32 %v249_v11, %v257_v12 }
  0x20   : > { %268 = vperm.xlu0 %385, %v258_v13  }
  0x9b   : > { %v262_v15 = vpop.permute.xlu0 %261 }
  0x9c   : > { %v264_v18 = vmul.f32 %v262_v15, %v244_v16  ;;  %v265_v19 = vmul.f32 %v262_v15, %v245_v17 }
  0x9f   : > { %v269_v20 = vpop.permute.xlu0 %268 }
  0xa0   : > { %v271_v21 = vadd.f32 %v269_v20, %v264_v18  ;;  %v272_v22 = vadd.f32 %v269_v20, %v265_v19 }
  0xa2   : > { %v273_v23 = vmax.f32 %v271_v21, 0.0  ;;  %v274_v24 = vmax.f32 %v272_v22, 0.0 }
  0xa4   : > { %v282_v25 = vadd.f32 %v274_v24, %v273_v23 }
  0xa6   : > { %283 = vadd.xlane.f32.xlu1 %v282_v25 }
 0x133   : > { %v284_v27 = vpop.xlane.xlu1 %283 }
 0x134   : > { %v285_v28 = vadd.f32 %v284_v27, %v281_v26 }
 0x136   : > { %287 = vst.msk [vmem:[%s243_s9] sm:$0xff] %vm279_vm0, %v285_v28 }
 0x137 PF: > { %s15_s20 = sadd.s32 1, %s410_s20   ;;  %s502_s18 = smov %s406_s19 }
 0x138   : > { %p12_p6 = scmp.ge.s32.totalorder %s15_s20, 4   ;;  %s503_s19 = smov %s505_s21 }
 0x13a   :  { %14 = sbr.rel (!%p12_p6) target bundleno = 2 (0x2), region = 74 }

// kernel: up_forward.13
= control target key start
LH: loop header
LB: loop body
LE: loop exit
PB: predicated region body
PF: predicated region fallthrough
CT: control target
= control target key end

     0   :  { %s903_s30 = smov 0   ;;  %s905_s10 = smov 0   ;;  %s1121_s0 = inlined_call_operand.vmem [shape: f32[9,8,512], index: 0, kind: input, shape index: {}]   ;;  %s1122_s1 = inlined_call_operand.vmem [shape: f32[8,1], index: 1, kind: input, shape index: {}]   ;;  %s1123_s2 = inlined_call_operand.vmem [shape: f32[8,1], index: 2, kind: input, shape index: {}]   ;;  %s1124_s3 = inlined_call_operand.vmem [shape: f32[8,1], index: 3, kind: input, shape index: {}]   ;;  %s1125_s4 = inlined_call_operand.vmem [shape: f32[8,1], index: 4, kind: input, shape index: {}]   ;;  %s1126_s5 = inlined_call_operand.vmem [shape: f32[9,8,1], index: 5, kind: input, shape index: {}]   ;;  %s1127_s6 = inlined_call_operand.vmem [shape: f32[8,1], index: 6, kind: input, shape index: {}]   ;;  %s1128_s7 = inlined_call_operand.vmem [shape: f32[8,512], index: 7, kind: output, shape index: {0}]   ;;  %s1129_s8 = inlined_call_operand.vmem [shape: f32[8,1], index: 8, kind: output, shape index: {1}]   ;;  %s1130_s9 = inlined_call_operand.vmem [shape: f32[8,1], index: 9, kind: output, shape index: {2}]  }
   0x1   :  { %s907_s11 = smov 0   ;;  %s909_s12 = smov 0  }
   0x2   :  { %s911_s13 = smov 0  }
   0x3 LB: > { %s32_s14 = sadd.s32 1, %s845_s12  ;;  %p48_p1 = scmp.ne.s32.totalorder %s837_s10, %s833_s30  ;;  %s849_s13 = sphi %s911_s13, %s20_s13   ;;  %s845_s12 = sphi %s909_s12, %s1135_s12   ;;  %s841_s11 = sphi %s907_s11, %s1134_s11   ;;  %s837_s10 = sphi %s905_s10, %s1133_s10   ;;  %s833_s30 = sphi %s903_s30, %s1132_s30  }
   0x4   : > { %p34_p0 = scmp.ge.s32.totalorder %s32_s14, 2  ;;  %p49_p2 = scmp.eq.s32.totalorder %s849_s13, 0 }
   0x5   : > { %s41_s16 = sadd.s32 1, %s837_s10  ;;  %p728_p5 = scmp.ge.s32.totalorder %s849_s13, 2 }
   0x6   : > { %s1137_s14 = smov (%p34_p0, %s32_s14), 0  ;;  %p50_p3 = por %p49_p2, %p48_p1 }
   0x7   : > { %s38_s15 = ssub.s32 %s845_s12, %s1137_s14  ;;  %288 = sbr.rel (%p728_p5) target bundleno = 27 (0x1b), region = 40 }
   0x8   : > { %p39_p4 = scmp.eq.s32.totalorder %s38_s15, 0 }
   0xa   : > { %s938_s17 = scalar_select %p39_p4, %s837_s10, %s41_s16  }
   0xe   : > { %291 = sbr.rel (!%p50_p3) target bundleno = 27 (0x1b), region = 44  ;;  %s293_s18 = sand.u32 (%p50_p3), 1, %s837_s10  }
   0xf   : > { %s761_s19 = sshll.u32 (%p50_p3), %s845_s12, 4  ;;  %s763_s20 = smul.u32 (%p50_p3), 144, %s293_s18 }
  0x10   : > { %s946_s23 = scalar_lea.vmem (%p50_p3), %s1121_s0, %s761_s19 }
  0x11   : > { %v312_v0 = vld [vmem:[%s946_s23] sm:$0xff] (%p50_p3)  ;;  %v314_v1 = vld [vmem:[%s946_s23 + $0x8] sm:$0xff] (%p50_p3)  ;;  %s295_s24 = scalar_lea.vmem (%p50_p3), [#allocation2], %s763_s20 }
  0x12   : > { %v316_v2 = vld [vmem:[%s946_s23 + $0x20] sm:$0xff] (%p50_p3)  ;;  %v318_v3 = vld [vmem:[%s946_s23 + $0x28] sm:$0xff] (%p50_p3)  ;;  %313 = vst [vmem:[%s295_s24] sm:$0xff] (%p50_p3), %v312_v0  ;;  %315 = vst [vmem:[%s295_s24 + $0x8] sm:$0xff] (%p50_p3), %v314_v1 }
  0x13   : > { %v320_v4 = vld [vmem:[%s946_s23 + $0x40] sm:$0xff] (%p50_p3)  ;;  %v322_v5 = vld [vmem:[%s946_s23 + $0x48] sm:$0xff] (%p50_p3)  ;;  %317 = vst [vmem:[%s295_s24 + $0x10] sm:$0xff] (%p50_p3), %v316_v2  ;;  %319 = vst [vmem:[%s295_s24 + $0x18] sm:$0xff] (%p50_p3), %v318_v3 }
  0x14   : > { %321 = vst [vmem:[%s295_s24 + $0x20] sm:$0xff] (%p50_p3), %v320_v4  ;;  %323 = vst [vmem:[%s295_s24 + $0x28] sm:$0xff] (%p50_p3), %v322_v5  ;;  %v324_v6 = vld [vmem:[%s946_s23 + $0x60] sm:$0xff] (%p50_p3)  ;;  %v326_v7 = vld [vmem:[%s946_s23 + $0x68] sm:$0xff] (%p50_p3) }
  0x15   : > { %v328_v8 = vld [vmem:[%s946_s23 + $0x80] sm:$0xff]  ;;  %325 = vst [vmem:[%s295_s24 + $0x30] sm:$0xff] %v324_v6  ;;  %327 = vst [vmem:[%s295_s24 + $0x38] sm:$0xff] %v326_v7  ;;  %v330_v9 = vld [vmem:[%s946_s23 + $0x88] sm:$0xff] }
  0x16   : > { %329 = vst [vmem:[%s295_s24 + $0x40] sm:$0xff] %v328_v8  ;;  %v332_v10 = vld [vmem:[%s946_s23 + $0xa0] sm:$0xff]  ;;  %v334_v11 = vld [vmem:[%s946_s23 + $0xa8] sm:$0xff]  ;;  %331 = vst [vmem:[%s295_s24 + $0x48] sm:$0xff] %v330_v9 }
  0x17   : > { %333 = vst [vmem:[%s295_s24 + $0x50] sm:$0xff] %v332_v10  ;;  %335 = vst [vmem:[%s295_s24 + $0x58] sm:$0xff] %v334_v11  ;;  %v336_v12 = vld [vmem:[%s946_s23 + $0xc0] sm:$0xff]  ;;  %v338_v13 = vld [vmem:[%s946_s23 + $0xc8] sm:$0xff] }
  0x18   : > { %v340_v14 = vld [vmem:[%s946_s23 + $0xe0] sm:$0xff]  ;;  %337 = vst [vmem:[%s295_s24 + $0x60] sm:$0xff] %v336_v12  ;;  %339 = vst [vmem:[%s295_s24 + $0x68] sm:$0xff] %v338_v13  ;;  %v342_v15 = vld [vmem:[%s946_s23 + $0xe8] sm:$0xff] }
  0x19   : > { %341 = vst [vmem:[%s295_s24 + $0x70] sm:$0xff] %v340_v14  ;;  %v344_v16 = vld [vmem:[%s946_s23 + $0x100] sm:$0xff]  ;;  %v346_v17 = vld [vmem:[%s946_s23 + $0x108] sm:$0xff]  ;;  %343 = vst [vmem:[%s295_s24 + $0x78] sm:$0xff] %v342_v15 }
  0x1a   : > { %345 = vst [vmem:[%s295_s24 + $0x80] sm:$0xff] %v344_v16  ;;  %347 = vst [vmem:[%s295_s24 + $0x88] sm:$0xff] %v346_v17 }
  0x1b PF: > { %p731_p6 = scmp.ge.s32.totalorder %s849_s13, 1  ;;  %p352_p7 = scmp.lt.s32.totalorder %s849_s13, 3 }
  0x1d   : > { %p353_p8 = pnand %p731_p6, %p352_p7 }
  0x1e   : > { %v436_v18 = vld [vmem:[%s1126_s5] sm:$0xff] (!%p353_p8)  ;;  %v851_v19 = vmov (!%p353_p8), 0   ;;  %v736_v23 = vld [vmem:[%s1126_s5 + $0x8] sm:$0xff] (!%p353_p8)  ;;  %v742_v27 = vld [vmem:[%s1126_s5 + $0x18] sm:$0xff] (!%p353_p8)  ;;  %p614_p9 = scmp.eq.s32.totalorder (!%p353_p8), %s841_s11, 0  ;;  %s359_s25 = sand.u32 (!%p353_p8), 1, %s833_s30  }
  0x1f   : > { %356 = sbr.rel (%p353_p8) target bundleno = 362 (0x16a), region = 67  ;;  %808 = vset.pattern.permute.xlu1 (!%p353_p8), %v851_v19  ;;  %807 = vset.pattern.permute.xlu0 (!%p353_p8), %v851_v19  ;;  %v405_v20 = vld [vmem:[%s1122_s1] sm:$0xff] (!%p353_p8)  ;;  %v748_v29 = vld [vmem:[%s1126_s5 + $0x28] sm:$0xff] (!%p353_p8)  ;;  %v754_v30 = vld [vmem:[%s1126_s5 + $0x38] sm:$0xff] (!%p353_p8)  ;;  %s732_s30 = sshll.u32 (!%p353_p8), %s841_s11, 1 }
  0x20   : > { %439 = vperm.xlu1 (!%p353_p8), %808, %v436_v18   ;;  %v406_v21 = vld [vmem:[%s1123_s2] sm:$0xff] (!%p353_p8)  ;;  %v409_v22 = vmul.f32 (!%p353_p8), 0.001953125, %v405_v20  ;;  %v739_v38 = vld [vmem:[%s1126_s5 + $0x10] sm:$0xff] (!%p353_p8)  ;;  %s764_s26 = smul.u32 (!%p353_p8), 144, %s359_s25  ;;  %p1069_p10 = scmp.lt.s32.totalorder (!%p353_p8), %s732_s30, 3 }
  0x21   : > { %v410_v24 = vmul.f32 (!%p353_p8), 0.001953125, %v406_v21  ;;  %v407_v31 = vld [vmem:[%s1124_s3] sm:$0xff] (!%p353_p8)  ;;  %v751_v40 = vld [vmem:[%s1126_s5 + $0x30] sm:$0xff] (!%p353_p8) }
  0x22   : > { %v411_v25 = vmul.f32 (!%p353_p8), %v409_v22, %v409_v22  ;;  %v604_v32 = vld [vmem:[%s1127_s6] sm:$0xff] (!%p353_p8)  ;;  %s1012_s27 = scalar_lea.vmem (!%p353_p8), [#allocation2], %s764_s26 }
  0x23   : > { %v408_v35 = vld [vmem:[%s1125_s4] sm:$0xff] (!%p353_p8)  ;;  %v419_v44 = vld [vmem:[%s1012_s27 + $0x8] sm:$0xff] (!%p353_p8)  ;;  %v735_v46 = vld [vmem:[%s1012_s27 + $0x18] sm:$0xff] (!%p353_p8) }
  0x24   : > { %457 = vperm.xlu1 (!%p353_p8), %808, %v736_v23   ;;  %v412_v26 = vsub.f32 (!%p353_p8), %v410_v24, %v411_v25  ;;  %v745_v39 = vld [vmem:[%s1126_s5 + $0x20] sm:$0xff] (!%p353_p8)  ;;  %v738_v48 = vld [vmem:[%s1012_s27 + $0x28] sm:$0xff] (!%p353_p8)  ;;  %v741_v50 = vld [vmem:[%s1012_s27 + $0x38] sm:$0xff] (!%p353_p8) }
  0x25   : > { %v757_v41 = vld [vmem:[%s1126_s5 + $0x40] sm:$0xff] (!%p353_p8)  ;;  %v744_v53 = vld [vmem:[%s1012_s27 + $0x48] sm:$0xff] (!%p353_p8)  ;;  %v747_v57 = vld [vmem:[%s1012_s27 + $0x58] sm:$0xff] (!%p353_p8) }
  0x26   : > { %v413_v28 = vadd.f32 1e-05, %v412_v26  ;;  %v418_v43 = vld [vmem:[%s1012_s27] sm:$0xff]  ;;  %v734_v45 = vld [vmem:[%s1012_s27 + $0x10] sm:$0xff]  ;;  %v750_v59 = vld [vmem:[%s1012_s27 + $0x68] sm:$0xff]  ;;  %s1139_s30 = smov (!%p1069_p10, %s732_s30), 3 }
  0x27   : > { %v737_v47 = vld [vmem:[%s1012_s27 + $0x20] sm:$0xff]  ;;  %v740_v49 = vld [vmem:[%s1012_s27 + $0x30] sm:$0xff]  ;;  %s733_s29 = sshll.u32 %s1139_s30, 3  ;;  %vm620_vm0 = vcmask (%p614_p9), 7168  }
  0x28   : > { %497 = vperm.xlu1 %808, %v742_v27   ;;  %809 = vrsqrt.f32 %v413_v28  ;;  %v743_v52 = vld [vmem:[%s1012_s27 + $0x40] sm:$0xff]  ;;  %v746_v54 = vld [vmem:[%s1012_s27 + $0x50] sm:$0xff]  ;;  %s402_s18 = scalar_lea.vmem %s1128_s7, %s733_s29 }
  0x29   : > { %v749_v58 = vld [vmem:[%s1012_s27 + $0x60] sm:$0xff] }
  0x2c   : > { %537 = vperm.xlu1 %808, %v748_v29  }
  0x30   : > { %577 = vperm.xlu1 %808, %v754_v30  }
  0x32   : > { %v810_v33 = vpop.eup %809 }
  0x33   : > { %v415_v34 = vmul.f32 %v810_v33, %v407_v31 }
  0x34   : > { %607 = vperm.xlu1 %808, %v604_v32  }
  0x35   : > { %422 = vperm.xlu0 %807, %v415_v34   ;;  %v416_v36 = vmul.f32 %v415_v34, %v409_v22 }
  0x37   : > { %v417_v37 = vsub.f32 %v408_v35, %v416_v36 }
  0x39   : > { %429 = vperm.xlu0 %807, %v417_v37  }
  0x3d   : > { %477 = vperm.xlu0 %807, %v739_v38  }
  0x41   : > { %517 = vperm.xlu0 %807, %v745_v39  }
  0x45   : > { %557 = vperm.xlu0 %807, %v751_v40   ;;  %v752_v40 = vld [vmem:[%s1012_s27 + $0x70] sm:$0xff] }
  0x49   : > { %597 = vperm.xlu0 %807, %v757_v41   ;;  %v753_v41 = vld [vmem:[%s1012_s27 + $0x78] sm:$0xff] }
  0x9f   : > { %v440_v42 = vpop.permute.xlu1 %439 }
  0xa3   : > { %v458_v60 = vpop.permute.xlu1 %457 }
  0xa7   : > { %v498_v22 = vpop.permute.xlu1 %497 }
  0xb4   : > { %v1022_v51 = vpop.permute.xlu0 %422 }
  0xb5   : > { %v425_v55 = vmul.f32 %v1022_v51, %v418_v43  ;;  %v426_v56 = vmul.f32 %v1022_v51, %v419_v44  ;;  %v447_v61 = vmul.f32 %v734_v45, %v1022_v51  ;;  %v448_v62 = vmul.f32 %v735_v46, %v1022_v51 }
  0xb6   : > { %v467_v63 = vmul.f32 %v737_v47, %v1022_v51  ;;  %v468_v0 = vmul.f32 %v738_v48, %v1022_v51  ;;  %v487_v1 = vmul.f32 %v740_v49, %v1022_v51  ;;  %v488_v2 = vmul.f32 %v741_v50, %v1022_v51 }
  0xb7   : > { %v507_v3 = vmul.f32 %v743_v52, %v1022_v51  ;;  %v508_v4 = vmul.f32 %v744_v53, %v1022_v51  ;;  %v527_v6 = vmul.f32 %v746_v54, %v1022_v51  ;;  %v528_v7 = vmul.f32 %v747_v57, %v1022_v51  ;;  %v538_v52 = vpop.permute.xlu1 %537 }
  0xb8   : > { %v1040_v5 = vpop.permute.xlu0 %429  ;;  %v547_v8 = vmul.f32 %v749_v58, %v1022_v51  ;;  %v548_v9 = vmul.f32 %v750_v59, %v1022_v51 }
  0xb9   : > { %v432_v10 = vadd.f32 %v1040_v5, %v425_v55  ;;  %v433_v11 = vadd.f32 %v1040_v5, %v426_v56  ;;  %v449_v12 = vadd.f32 %v447_v61, %v1040_v5  ;;  %v450_v13 = vadd.f32 %v448_v62, %v1040_v5  ;;  %v755_v61 = vld [vmem:[%s1012_s27 + $0x80] sm:$0xff]  ;;  %v756_v62 = vld [vmem:[%s1012_s27 + $0x88] sm:$0xff] }
  0xba   : > { %v469_v14 = vadd.f32 %v467_v63, %v1040_v5  ;;  %v470_v15 = vadd.f32 %v468_v0, %v1040_v5  ;;  %v489_v16 = vadd.f32 %v487_v1, %v1040_v5  ;;  %v490_v17 = vadd.f32 %v488_v2, %v1040_v5 }
  0xbb   : > { %v434_v18 = vmax.f32 %v432_v10, 0.0  ;;  %v435_v19 = vmax.f32 %v433_v11, 0.0  ;;  %v451_v20 = vmax.f32 %v449_v12, 0.0  ;;  %v452_v21 = vmax.f32 %v450_v13, 0.0 }
  0xbc   : > { %v478_v23 = vpop.permute.xlu0 %477  ;;  %v471_v24 = vmax.f32 %v469_v14, 0.0  ;;  %v472_v25 = vmax.f32 %v470_v15, 0.0  ;;  %v491_v26 = vmax.f32 %v489_v16, 0.0  ;;  %v492_v27 = vmax.f32 %v490_v17, 0.0  ;;  %v578_v17 = vpop.permute.xlu1 %577 }
  0xbd   : > { %v442_v28 = vmul.f32 %v440_v42, %v434_v18  ;;  %v443_v29 = vmul.f32 %v440_v42, %v435_v19  ;;  %v460_v30 = vmul.f32 %v458_v60, %v451_v20  ;;  %v461_v31 = vmul.f32 %v458_v60, %v452_v21 }
  0xbe   : > { %v480_v32 = vmul.f32 %v478_v23, %v471_v24  ;;  %v481_v33 = vmul.f32 %v478_v23, %v472_v25  ;;  %v500_v34 = vmul.f32 %v498_v22, %v491_v26  ;;  %v501_v35 = vmul.f32 %v498_v22, %v492_v27 }
  0xbf   : > { %v462_v36 = vadd.f32 %v460_v30, %v442_v28  ;;  %v463_v37 = vadd.f32 %v461_v31, %v443_v29  ;;  %v509_v38 = vadd.f32 %v507_v3, %v1040_v5  ;;  %v510_v39 = vadd.f32 %v508_v4, %v1040_v5 }
  0xc0   : > { %v518_v43 = vpop.permute.xlu0 %517  ;;  %v529_v44 = vadd.f32 %v527_v6, %v1040_v5  ;;  %v530_v42 = vadd.f32 %v528_v7, %v1040_v5  ;;  %v549_v45 = vadd.f32 %v547_v8, %v1040_v5  ;;  %v550_v46 = vadd.f32 %v548_v9, %v1040_v5 }
  0xc1   : > { %v482_v47 = vadd.f32 %v480_v32, %v462_v36  ;;  %v483_v48 = vadd.f32 %v481_v33, %v463_v37  ;;  %v511_v49 = vmax.f32 %v509_v38, 0.0  ;;  %v512_v50 = vmax.f32 %v510_v39, 0.0  ;;  %v608_v32 = vpop.permute.xlu1 %607 }
  0xc2   : > { %v531_v53 = vmax.f32 %v529_v44, 0.0  ;;  %v532_v54 = vmax.f32 %v530_v42, 0.0  ;;  %v567_v55 = vmul.f32 %v752_v40, %v1022_v51  ;;  %v568_v56 = vmul.f32 %v753_v41, %v1022_v51 }
  0xc3   : > { %v502_v57 = vadd.f32 %v500_v34, %v482_v47  ;;  %v503_v58 = vadd.f32 %v501_v35, %v483_v48  ;;  %v520_v59 = vmul.f32 %v518_v43, %v511_v49  ;;  %v521_v60 = vmul.f32 %v518_v43, %v512_v50 }
  0xc4   : > { %v558_v63 = vpop.permute.xlu0 %557  ;;  %v551_v0 = vmax.f32 %v549_v45, 0.0  ;;  %v552_v1 = vmax.f32 %v550_v46, 0.0  ;;  %v569_v2 = vadd.f32 %v567_v55, %v1040_v5  ;;  %v570_v3 = vadd.f32 %v568_v56, %v1040_v5 }
  0xc5   : > { %v522_v4 = vadd.f32 %v520_v59, %v502_v57  ;;  %v523_v6 = vadd.f32 %v521_v60, %v503_v58  ;;  %v540_v7 = vmul.f32 %v538_v52, %v531_v53  ;;  %v541_v8 = vmul.f32 %v538_v52, %v532_v54 }
  0xc6   : > { %v571_v9 = vmax.f32 %v569_v2, 0.0  ;;  %v572_v10 = vmax.f32 %v570_v3, 0.0  ;;  %v587_v11 = vmul.f32 %v755_v61, %v1022_v51  ;;  %v588_v12 = vmul.f32 %v756_v62, %v1022_v51 }
  0xc7   : > { %v542_v13 = vadd.f32 %v540_v7, %v522_v4  ;;  %v543_v14 = vadd.f32 %v541_v8, %v523_v6  ;;  %v560_v15 = vmul.f32 %v558_v63, %v551_v0  ;;  %v561_v16 = vmul.f32 %v558_v63, %v552_v1 }
  0xc8   : > { %v589_v18 = vadd.f32 %v587_v11, %v1040_v5  ;;  %v590_v19 = vadd.f32 %v588_v12, %v1040_v5  ;;  %v598_v22 = vpop.permute.xlu0 %597  ;;  %v580_v23 = vmul.f32 %v578_v17, %v571_v9  ;;  %v581_v24 = vmul.f32 %v578_v17, %v572_v10 }
  0xc9   : > { %v562_v20 = vadd.f32 %v560_v15, %v542_v13  ;;  %v563_v21 = vadd.f32 %v561_v16, %v543_v14  ;;  %v852_v34 = vmov (%p614_p9), 0.0  }
  0xca   : > { %v591_v25 = vmax.f32 %v589_v18, 0.0  ;;  %v592_v26 = vmax.f32 %v590_v19, 0.0  ;;  %621 = vst.msk [vmem:[%s1129_s8] sm:$0xff] (%p614_p9), %vm620_vm0, %v852_v34  ;;  %622 = vst.msk [vmem:[%s1130_s9] sm:$0xff] (%p614_p9), %vm620_vm0, %v852_v34 }
  0xcb   : > { %v582_v51 = vadd.f32 %v580_v23, %v562_v20  ;;  %v583_v27 = vadd.f32 %v581_v24, %v563_v21 }
  0xcc   : > { %v600_v28 = vmul.f32 %v598_v22, %v591_v25  ;;  %v601_v29 = vmul.f32 %v598_v22, %v592_v26  ;;  %619 = sbr.rel (!%p614_p9) target bundleno = 211 (0xd3), region = 75 }
  0xce   : > { %v602_v30 = vadd.f32 %v600_v28, %v582_v51  ;;  %v603_v31 = vadd.f32 %v601_v29, %v583_v27 }
  0xd0   : > { %v610_v5 = vadd.f32 %v608_v32, %v602_v30  ;;  %v611_v33 = vadd.f32 %v608_v32, %v603_v31 }
  0xd2   : > { %612 = vst [vmem:[%s402_s18] sm:$0xff] %v610_v5  ;;  %613 = vst [vmem:[%s402_s18 + $0x8] sm:$0xff] %v611_v33 }
  0xd3 PF: > { %v624_v35 = vadd.f32 %v611_v33, %v610_v5  ;;  %v631_v36 = vmul.f32 %v610_v5, %v610_v5  ;;  %v632_v37 = vmul.f32 %v611_v33, %v611_v33  ;;  %v623_v39 = vld [vmem:[%s1129_s8] sm:$0xff]  ;;  %vm628_vm1 = vcmask 7168  }
  0xd4   : > { %v630_v43 = vld [vmem:[%s1130_s9] sm:$0xff] }
  0xd5   : > { %625 = vadd.xlane.f32.xlu0 %v624_v35  ;;  %v633_v38 = vadd.f32 %v632_v37, %v631_v36 }
  0xd9   : > { %634 = vadd.xlane.f32.xlu0 %v633_v38 }
 0x162   : > { %v626_v40 = vpop.xlane.xlu0 %625 }
 0x163   : > { %v627_v41 = vadd.f32 %v626_v40, %v623_v39 }
 0x165   : > { %629 = vst.msk [vmem:[%s1129_s8] sm:$0xff] %vm628_vm1, %v627_v41 }
 0x166   : > { %v635_v44 = vpop.xlane.xlu0 %634 }
 0x167   : > { %v636_v42 = vadd.f32 %v635_v44, %v630_v43 }
 0x169   : > { %637 = vst.msk [vmem:[%s1130_s9] sm:$0xff] %vm628_vm1, %v636_v42 }
 0x16a PF: > { %s20_s13 = sadd.s32 1, %s849_s13   ;;  %s1132_s30 = smov %s837_s10 }
 0x16b   : > { %p17_p11 = scmp.ge.s32.totalorder %s20_s13, 4   ;;  %s1133_s10 = smov %s938_s17 }
 0x16c   : > { %s1134_s11 = smov %s845_s12  ;;  %s1135_s12 = smov %s1137_s14 }
 0x16d   :  { %19 = sbr.rel (!%p17_p11) target bundleno = 3 (0x3), region = 142 }

// kernel: up_forward.14
= control target key start
LH: loop header
LB: loop body
LE: loop exit
PB: predicated region body
PF: predicated region fallthrough
CT: control target
= control target key end

     0   :  { %s1532_s30 = smov 0   ;;  %s1534_s10 = smov 0   ;;  %s1758_s0 = inlined_call_operand.vmem [shape: f32[9,8,512], index: 0, kind: input, shape index: {}]   ;;  %s1759_s1 = inlined_call_operand.vmem [shape: f32[8,1], index: 1, kind: input, shape index: {}]   ;;  %s1760_s2 = inlined_call_operand.vmem [shape: f32[8,1], index: 2, kind: input, shape index: {}]   ;;  %s1761_s3 = inlined_call_operand.vmem [shape: f32[8,1], index: 3, kind: input, shape index: {}]   ;;  %s1762_s4 = inlined_call_operand.vmem [shape: f32[8,1], index: 4, kind: input, shape index: {}]   ;;  %s1763_s5 = inlined_call_operand.vmem [shape: f32[9,8,8], index: 5, kind: input, shape index: {}]   ;;  %s1764_s6 = inlined_call_operand.vmem [shape: f32[8,1], index: 6, kind: input, shape index: {}]   ;;  %s1765_s7 = inlined_call_operand.vmem [shape: f32[8,512], index: 7, kind: output, shape index: {0}]   ;;  %s1766_s8 = inlined_call_operand.vmem [shape: f32[8,1], index: 8, kind: output, shape index: {1}]   ;;  %s1767_s9 = inlined_call_operand.vmem [shape: f32[8,1], index: 9, kind: output, shape index: {2}]  }
   0x1   :  { %s1536_s11 = smov 0   ;;  %s1538_s12 = smov 0  }
   0x2   :  { %s1540_s13 = smov 0  }
   0x3 LB: > { %s32_s14 = sadd.s32 1, %s1473_s12  ;;  %p48_p1 = scmp.ne.s32.totalorder %s1465_s10, %s1461_s30  ;;  %s1477_s13 = sphi %s1540_s13, %s20_s13   ;;  %s1473_s12 = sphi %s1538_s12, %s1771_s12   ;;  %s1469_s11 = sphi %s1536_s11, %s1770_s11   ;;  %s1465_s10 = sphi %s1534_s10, %s1769_s10   ;;  %s1461_s30 = sphi %s1532_s30, %s1768_s30  }
   0x4   : > { %p34_p0 = scmp.ge.s32.totalorder %s32_s14, 2  ;;  %p49_p2 = scmp.eq.s32.totalorder %s1477_s13, 0 }
   0x5   : > { %s41_s16 = sadd.s32 1, %s1465_s10  ;;  %p1330_p5 = scmp.ge.s32.totalorder %s1477_s13, 2 }
   0x6   : > { %s1773_s14 = smov (%p34_p0, %s32_s14), 0  ;;  %p50_p3 = por %p49_p2, %p48_p1 }
   0x7   : > { %s38_s15 = ssub.s32 %s1473_s12, %s1773_s14  ;;  %288 = sbr.rel (%p1330_p5) target bundleno = 27 (0x1b), region = 40 }
   0x8   : > { %p39_p4 = scmp.eq.s32.totalorder %s38_s15, 0 }
   0xa   : > { %s1567_s17 = scalar_select %p39_p4, %s1465_s10, %s41_s16  }
   0xe   : > { %291 = sbr.rel (!%p50_p3) target bundleno = 27 (0x1b), region = 44  ;;  %s293_s18 = sand.u32 (%p50_p3), 1, %s1465_s10  }
   0xf   : > { %s1372_s19 = sshll.u32 (%p50_p3), %s1473_s12, 4  ;;  %s1390_s20 = smul.u32 (%p50_p3), 144, %s293_s18 }
  0x10   : > { %s1575_s23 = scalar_lea.vmem (%p50_p3), %s1758_s0, %s1372_s19 }
  0x11   : > { %v312_v0 = vld [vmem:[%s1575_s23] sm:$0xff] (%p50_p3)  ;;  %v314_v1 = vld [vmem:[%s1575_s23 + $0x8] sm:$0xff] (%p50_p3)  ;;  %s295_s24 = scalar_lea.vmem (%p50_p3), [#allocation2], %s1390_s20 }
  0x12   : > { %v316_v2 = vld [vmem:[%s1575_s23 + $0x20] sm:$0xff] (%p50_p3)  ;;  %v318_v3 = vld [vmem:[%s1575_s23 + $0x28] sm:$0xff] (%p50_p3)  ;;  %313 = vst [vmem:[%s295_s24] sm:$0xff] (%p50_p3), %v312_v0  ;;  %315 = vst [vmem:[%s295_s24 + $0x8] sm:$0xff] (%p50_p3), %v314_v1 }
  0x13   : > { %v320_v4 = vld [vmem:[%s1575_s23 + $0x40] sm:$0xff] (%p50_p3)  ;;  %v322_v5 = vld [vmem:[%s1575_s23 + $0x48] sm:$0xff] (%p50_p3)  ;;  %317 = vst [vmem:[%s295_s24 + $0x10] sm:$0xff] (%p50_p3), %v316_v2  ;;  %319 = vst [vmem:[%s295_s24 + $0x18] sm:$0xff] (%p50_p3), %v318_v3 }
  0x14   : > { %321 = vst [vmem:[%s295_s24 + $0x20] sm:$0xff] (%p50_p3), %v320_v4  ;;  %323 = vst [vmem:[%s295_s24 + $0x28] sm:$0xff] (%p50_p3), %v322_v5  ;;  %v324_v6 = vld [vmem:[%s1575_s23 + $0x60] sm:$0xff] (%p50_p3)  ;;  %v326_v7 = vld [vmem:[%s1575_s23 + $0x68] sm:$0xff] (%p50_p3) }
  0x15   : > { %v328_v8 = vld [vmem:[%s1575_s23 + $0x80] sm:$0xff]  ;;  %325 = vst [vmem:[%s295_s24 + $0x30] sm:$0xff] %v324_v6  ;;  %327 = vst [vmem:[%s295_s24 + $0x38] sm:$0xff] %v326_v7  ;;  %v330_v9 = vld [vmem:[%s1575_s23 + $0x88] sm:$0xff] }
  0x16   : > { %329 = vst [vmem:[%s295_s24 + $0x40] sm:$0xff] %v328_v8  ;;  %v332_v10 = vld [vmem:[%s1575_s23 + $0xa0] sm:$0xff]  ;;  %v334_v11 = vld [vmem:[%s1575_s23 + $0xa8] sm:$0xff]  ;;  %331 = vst [vmem:[%s295_s24 + $0x48] sm:$0xff] %v330_v9 }
  0x17   : > { %333 = vst [vmem:[%s295_s24 + $0x50] sm:$0xff] %v332_v10  ;;  %335 = vst [vmem:[%s295_s24 + $0x58] sm:$0xff] %v334_v11  ;;  %v336_v12 = vld [vmem:[%s1575_s23 + $0xc0] sm:$0xff]  ;;  %v338_v13 = vld [vmem:[%s1575_s23 + $0xc8] sm:$0xff] }
  0x18   : > { %v340_v14 = vld [vmem:[%s1575_s23 + $0xe0] sm:$0xff]  ;;  %337 = vst [vmem:[%s295_s24 + $0x60] sm:$0xff] %v336_v12  ;;  %339 = vst [vmem:[%s295_s24 + $0x68] sm:$0xff] %v338_v13  ;;  %v342_v15 = vld [vmem:[%s1575_s23 + $0xe8] sm:$0xff] }
  0x19   : > { %341 = vst [vmem:[%s295_s24 + $0x70] sm:$0xff] %v340_v14  ;;  %v344_v16 = vld [vmem:[%s1575_s23 + $0x100] sm:$0xff]  ;;  %v346_v17 = vld [vmem:[%s1575_s23 + $0x108] sm:$0xff]  ;;  %343 = vst [vmem:[%s295_s24 + $0x78] sm:$0xff] %v342_v15 }
  0x1a   : > { %345 = vst [vmem:[%s295_s24 + $0x80] sm:$0xff] %v344_v16  ;;  %347 = vst [vmem:[%s295_s24 + $0x88] sm:$0xff] %v346_v17 }
  0x1b PF: > { %p1333_p6 = scmp.ge.s32.totalorder %s1477_s13, 1  ;;  %p352_p7 = scmp.lt.s32.totalorder %s1477_s13, 3 }
  0x1d   : > { %p353_p8 = pnand %p1333_p6, %p352_p7 }
  0x1e   : > { %v405_v18 = vld [vmem:[%s1759_s1] sm:$0xff] (!%p353_p8)  ;;  %v1479_v20 = vmov (!%p353_p8), 0   ;;  %v1480_v32 = vmov (!%p353_p8), 0.0   ;;  %s359_s21 = sand.u32 (!%p353_p8), 1, %s1461_s30   ;;  %v1338_v4 = vld [vmem:[%s1763_s5 + $0x8] sm:$0xff] (!%p353_p8)  ;;  %vm448_vm0 = vcmask (!%p353_p8), 64512  }
  0x1f   : > { %356 = sbr.rel (%p353_p8) target bundleno = 592 (0x250), region = 67  ;;  %v406_v19 = vld [vmem:[%s1760_s2] sm:$0xff] (!%p353_p8)  ;;  %1435 = vset.pattern.permute.xlu0 (!%p353_p8), %v1479_v20  ;;  %v409_v21 = vmul.f32 (!%p353_p8), 0.001953125, %v405_v18  ;;  %1436 = vset.pattern.permute.xlu1 (!%p353_p8), %v1479_v20  ;;  %p1216_p9 = scmp.eq.s32.totalorder (!%p353_p8), %s1469_s11, 0 }
  0x20   : > { %v410_v22 = vmul.f32 (!%p353_p8), 0.001953125, %v406_v19  ;;  %v407_v26 = vld [vmem:[%s1761_s3] sm:$0xff] (!%p353_p8)  ;;  %516 = vmatprep.mubr.f32.mxu1 (!%p353_p8), %v1480_v32  ;;  %849 = vmatprep.mubr.f32.mxu0 (!%p353_p8), %v1480_v32  ;;  %s1391_s22 = smul.u32 (!%p353_p8), 144, %s359_s21  ;;  %s1334_s26 = sshll.u32 (!%p353_p8), %s1469_s11, 1 }
  0x21   : > { %v411_v23 = vmul.f32 (!%p353_p8), %v409_v21, %v409_v21  ;;  %v408_v29 = vld [vmem:[%s1762_s4] sm:$0xff] (!%p353_p8)  ;;  %p399_p10 = scmp.lt.s32.totalorder (!%p353_p8), %s1334_s26, 3 }
  0x22   : > { %v1206_v33 = vld [vmem:[%s1764_s6] sm:$0xff] (!%p353_p8)  ;;  %s1615_s23 = scalar_lea.vmem (!%p353_p8), [#allocation2], %s1391_s22 }
  0x23   : > { %v412_v24 = vsub.f32 (!%p353_p8), %v410_v22, %v411_v23  ;;  %1209 = vperm.xlu1 (!%p353_p8), %1436, %v1206_v33   ;;  %v1337_v34 = vld [vmem:[%s1615_s23 + $0x18] sm:$0xff] (!%p353_p8)  ;;  %v1350_v35 = vld [vmem:[%s1615_s23 + $0x48] sm:$0xff] (!%p353_p8)  ;;  %v1336_v36 = vld [vmem:[%s1615_s23 + $0x10] sm:$0xff] (!%p353_p8) }
  0x24   : > { %v1349_v37 = vld [vmem:[%s1615_s23 + $0x40] sm:$0xff] (!%p353_p8)  ;;  %v419_v39 = vld [vmem:[%s1615_s23 + $0x8] sm:$0xff] (!%p353_p8)  ;;  %v1354_v40 = vld [vmem:[%s1615_s23 + $0x58] sm:$0xff] (!%p353_p8) }
  0x25   : > { %v413_v25 = vadd.f32 (!%p353_p8), 1e-05, %v412_v24  ;;  %v418_v41 = vld [vmem:[%s1615_s23] sm:$0xff] (!%p353_p8)  ;;  %v1353_v42 = vld [vmem:[%s1615_s23 + $0x50] sm:$0xff] (!%p353_p8)  ;;  %v1342_v43 = vld [vmem:[%s1615_s23 + $0x28] sm:$0xff] (!%p353_p8) }
  0x26   : > { %v1358_v44 = vld [vmem:[%s1615_s23 + $0x68] sm:$0xff]  ;;  %v1351_v6 = vld [vmem:[%s1763_s5 + $0x20] sm:$0xff]  ;;  %v1346_v12 = vld [vmem:[%s1615_s23 + $0x38] sm:$0xff]  ;;  %s1775_s26 = smov (!%p399_p10, %s1334_s26), 3  ;;  %vm1222_vm1 = vcmask (%p1216_p9), 7168  }
  0x27   : > { %1437 = vrsqrt.f32 %v413_v25  ;;  %v1341_v9 = vld [vmem:[%s1615_s23 + $0x20] sm:$0xff]  ;;  %v1362_v15 = vld [vmem:[%s1615_s23 + $0x78] sm:$0xff]  ;;  %s1335_s27 = sshll.u32 %s1775_s26, 3 }
  0x28   : > { %v1357_v11 = vld [vmem:[%s1615_s23 + $0x60] sm:$0xff]  ;;  %s402_s15 = scalar_lea.vmem %s1765_s7, %s1335_s27 }
  0x29   : > { %v436_v25 = vld [vmem:[%s1763_s5] sm:$0xff] }
  0x31   : > { %v1438_v27 = vpop.eup %1437 }
  0x32   : > { %v415_v28 = vmul.f32 %v1438_v27, %v407_v26  ;;  %v1355_v27 = vld [vmem:[%s1763_s5 + $0x28] sm:$0xff] }
  0x34   : > { %422 = vperm.xlu0 %1435, %v415_v28   ;;  %v416_v30 = vmul.f32 %v415_v28, %v409_v21  ;;  %v1345_v28 = vld [vmem:[%s1615_s23 + $0x30] sm:$0xff] }
  0x36   : > { %v417_v31 = vsub.f32 %v408_v29, %v416_v30  ;;  %v1361_v30 = vld [vmem:[%s1615_s23 + $0x70] sm:$0xff] }
  0x38   : > { %429 = vperm.xlu0 %1435, %v417_v31  }
  0xb3   : > { %v1621_v38 = vpop.permute.xlu0 %422 }
  0xb4   : > { %v441_v45 = vmul.f32 %v1337_v34, %v1621_v38  ;;  %v775_v46 = vmul.f32 %v1350_v35, %v1621_v38  ;;  %v440_v47 = vmul.f32 %v1336_v36, %v1621_v38  ;;  %v774_v48 = vmul.f32 %v1349_v37, %v1621_v38  ;;  %v1366_v34 = vld [vmem:[%s1615_s23 + $0x88] sm:$0xff] }
  0xb5   : > { %v426_v49 = vmul.f32 %v1621_v38, %v419_v39  ;;  %v862_v50 = vmul.f32 %v1354_v40, %v1621_v38  ;;  %v425_v52 = vmul.f32 %v1621_v38, %v418_v41  ;;  %v861_v53 = vmul.f32 %v1353_v42, %v1621_v38  ;;  %v1343_v42 = vld [vmem:[%s1763_s5 + $0x10] sm:$0xff] }
  0xb6   : > { %v601_v54 = vmul.f32 %v1342_v43, %v1621_v38  ;;  %v949_v55 = vmul.f32 %v1358_v44, %v1621_v38  ;;  %v600_v18 = vmul.f32 %v1341_v9, %v1621_v38  ;;  %v948_v19 = vmul.f32 %v1357_v11, %v1621_v38  ;;  %v1359_v44 = vld [vmem:[%s1763_s5 + $0x30] sm:$0xff] }
  0xb7   : > { %v1635_v51 = vpop.permute.xlu0 %429  ;;  %v688_v20 = vmul.f32 %v1346_v12, %v1621_v38  ;;  %v1036_v22 = vmul.f32 %v1362_v15, %v1621_v38  ;;  %v687_v36 = vmul.f32 %v1345_v28, %v1621_v38  ;;  %v1035_v37 = vmul.f32 %v1361_v30, %v1621_v38 }
  0xb8   : > { %v443_v56 = vadd.f32 %v441_v45, %v1635_v51  ;;  %v777_v57 = vadd.f32 %v775_v46, %v1635_v51  ;;  %v442_v58 = vadd.f32 %v440_v47, %v1635_v51  ;;  %v776_v59 = vadd.f32 %v774_v48, %v1635_v51  ;;  %v1365_v46 = vld [vmem:[%s1615_s23 + $0x80] sm:$0xff] }
  0xb9   : > { %v433_v60 = vadd.f32 %v1635_v51, %v426_v49  ;;  %v864_v61 = vadd.f32 %v862_v50, %v1635_v51  ;;  %v432_v62 = vadd.f32 %v1635_v51, %v425_v52  ;;  %v863_v63 = vadd.f32 %v861_v53, %v1635_v51  ;;  %v1347_v52 = vld [vmem:[%s1763_s5 + $0x18] sm:$0xff] }
  0xba   : > { %v445_v0 = vmax.f32 %v443_v56, 0.0  ;;  %v779_v1 = vmax.f32 %v777_v57, 0.0  ;;  %v444_v2 = vmax.f32 %v442_v58, 0.0  ;;  %v778_v3 = vmax.f32 %v776_v59, 0.0  ;;  %v1363_v53 = vld [vmem:[%s1763_s5 + $0x38] sm:$0xff]  ;;  %v1210_v57 = vpop.permute.xlu1 %1209 }
  0xbb   : > { %v435_v5 = vmax.f32 %v433_v60, 0.0  ;;  %v603_v7 = vadd.f32 %v601_v54, %v1635_v51  ;;  %v951_v8 = vadd.f32 %v949_v55, %v1635_v51  ;;  %v866_v10 = vmax.f32 %v864_v61, 0.0 }
  0xbc   : > { %452 = vmatprep.subr.mxu1 %v445_v0  ;;  %785 = vmatprep.subr.mxu0 %v779_v1  ;;  %v434_v13 = vmax.f32 %v432_v62, 0.0  ;;  %v865_v14 = vmax.f32 %v863_v63, 0.0  ;;  %v602_v21 = vadd.f32 %v600_v18, %v1635_v51  ;;  %v950_v23 = vadd.f32 %v948_v19, %v1635_v51 }
  0xbd   : > { %453 = vmatpush1.msra.mxu1 %v444_v2  ;;  %786 = vmatpush1.msra.mxu0 %v778_v3  ;;  %v605_v16 = vmax.f32 %v603_v7, 0.0  ;;  %v953_v17 = vmax.f32 %v951_v8, 0.0  ;;  %v690_v24 = vadd.f32 %v688_v20, %v1635_v51  ;;  %v1038_v26 = vadd.f32 %v1036_v22, %v1635_v51 }
  0xbe   : > { %1339 = vmatmul.mubr.msk.f32.vlgmr.msra.gmra.mrb[0].mxu1 %vm448_vm0, %v1338_v4  ;;  %526 = vmatprep.subr.mxu1 %v435_v5  ;;  %v604_v29 = vmax.f32 %v602_v21, 0.0  ;;  %v952_v31 = vmax.f32 %v950_v23, 0.0  ;;  %v689_v39 = vadd.f32 %v687_v36, %v1635_v51  ;;  %v1123_v40 = vmul.f32 %v1366_v34, %v1621_v38 }
  0xbf   : > { %1352 = vmatmul.mubr.msk.f32.vlgmr.msra.gmra.mrb[0].mxu0 %vm448_vm0, %v1351_v6  ;;  %872 = vmatprep.subr.mxu0 %v866_v10  ;;  %v692_v33 = vmax.f32 %v690_v24, 0.0  ;;  %v1040_v35 = vmax.f32 %v1038_v26, 0.0  ;;  %v1037_v41 = vadd.f32 %v1035_v37, %v1635_v51  ;;  %v1122_v49 = vmul.f32 %v1365_v46, %v1621_v38  ;;  %v1367_v38 = vld [vmem:[%s1763_s5 + $0x40] sm:$0xff] }
  0xc0   : > { %527 = vmatpush1.msra.mxu1 %v434_v13  ;;  %873 = vmatpush1.msra.mxu0 %v865_v14  ;;  %v1125_v43 = vadd.f32 %v1123_v40, %v1635_v51  ;;  %v691_v45 = vmax.f32 %v689_v39, 0.0  ;;  %v1481_v62 = vmov (%p1216_p9), 0.0  }
  0xc1   : > { %611 = vmatprep.subr.mxu1 %v605_v16  ;;  %959 = vmatprep.subr.mxu0 %v953_v17  ;;  %v1039_v47 = vmax.f32 %v1037_v41, 0.0  ;;  %v1124_v50 = vadd.f32 %v1122_v49, %v1635_v51  ;;  %1223 = vst.msk [vmem:[%s1766_s8] sm:$0xff] (%p1216_p9), %vm1222_vm1, %v1481_v62  ;;  %1224 = vst.msk [vmem:[%s1767_s9] sm:$0xff] (%p1216_p9), %vm1222_vm1, %v1481_v62 }
  0xc2   : > { %590 = vmatprep.mubr.f32.mxu1 %v1480_v32  ;;  %936 = vmatprep.mubr.f32.mxu0 %v1480_v32  ;;  %v1127_v48 = vmax.f32 %v1125_v43, 0.0 }
  0xc3   : > { %v1126_v54 = vmax.f32 %v1124_v50, 0.0 }
  0xc6   : > { %1340 = vmatmul.mubr.msk.f32.vlgmr.msra.gmra.mrb[0].mxu1 %vm448_vm0, %v436_v25 }
  0xc7   : > { %612 = vmatpush1.msra.mxu1 %v604_v29  ;;  %1356 = vmatmul.mubr.msk.f32.vlgmr.msra.gmra.mrb[0].mxu0 %vm448_vm0, %v1355_v27 }
  0xc8   : > { %960 = vmatpush1.msra.mxu0 %v952_v31  ;;  %698 = vmatprep.subr.mxu1 %v692_v33 }
  0xc9   : > { %1046 = vmatprep.subr.mxu0 %v1040_v35  ;;  %675 = vmatprep.mubr.f32.mxu1 %v1480_v32 }
  0xca   : > { %1023 = vmatprep.mubr.f32.mxu0 %v1480_v32 }
  0xce   : > { %1344 = vmatmul.mubr.msk.f32.vlgmr.msra.gmra.mrb[0].mxu1 %vm448_vm0, %v1343_v42 }
  0xcf   : > { %699 = vmatpush1.msra.mxu1 %v691_v45  ;;  %1360 = vmatmul.mubr.msk.f32.vlgmr.msra.gmra.mrb[0].mxu0 %vm448_vm0, %v1359_v44 }
  0xd0   : > { %1047 = vmatpush1.msra.mxu0 %v1039_v47  ;;  %762 = vmatprep.mubr.f32.mxu1 %v1480_v32 }
  0xd1   : > { %1133 = vmatprep.subr.mxu0 %v1127_v48  ;;  %1110 = vmatprep.mubr.f32.mxu0 %v1480_v32 }
  0xd6   : > { %1348 = vmatmul.mubr.msk.f32.vlgmr.msra.gmra.mrb[0].mxu1 %vm448_vm0, %v1347_v52 }
  0xd7   : > { %1364 = vmatmul.mubr.msk.f32.vlgmr.msra.gmra.mrb[0].mxu0 %vm448_vm0, %v1363_v53 }
  0xd8   : > { %1134 = vmatpush1.msra.mxu0 %v1126_v54  ;;  %1197 = vmatprep.mubr.f32.mxu0 %v1480_v32 }
  0xdf   : > { %1368 = vmatmul.mubr.msk.f32.vlgmr.msra.gmra.mrb[0].mxu0 %vm448_vm0, %v1367_v38 }
 0x1a9   : > { %v764_v51 = vpop.f32.mrb[0].mxu1 }
 0x1aa   : > { %v766_v55 = vpop.f32.mrb[1].mxu1 }
 0x1b2   : > { %v1199_v56 = vpop.f32.mrb[0].mxu0  ;;  %1221 = sbr.rel (!%p1216_p9) target bundleno = 441 (0x1b9), region = 75 }
 0x1b3   : > { %v1374_v58 = vadd.f32 %v1199_v56, %v764_v51  ;;  %v1201_v59 = vpop.f32.mrb[1].mxu0 }
 0x1b4   : > { %v1375_v60 = vadd.f32 %v1201_v59, %v766_v55 }
 0x1b5   : > { %v1212_v32 = vadd.f32 %v1374_v58, %v1210_v57 }
 0x1b6   : > { %v1213_v61 = vadd.f32 %v1375_v60, %v1210_v57 }
 0x1b7   : > { %1214 = vst [vmem:[%s402_s15] sm:$0xff] %v1212_v32 }
 0x1b8   : > { %1215 = vst [vmem:[%s402_s15 + $0x8] sm:$0xff] %v1213_v61 }
 0x1b9 PF: > { %v1226_v63 = vadd.f32 %v1213_v61, %v1212_v32  ;;  %v1233_v0 = vmul.f32 %v1212_v32, %v1212_v32  ;;  %v1234_v1 = vmul.f32 %v1213_v61, %v1213_v61  ;;  %v1225_v3 = vld [vmem:[%s1766_s8] sm:$0xff]  ;;  %vm1230_vm2 = vcmask 7168  }
 0x1ba   : > { %v1232_v6 = vld [vmem:[%s1767_s9] sm:$0xff] }
 0x1bb   : > { %1227 = vadd.xlane.f32.xlu0 %v1226_v63  ;;  %v1235_v2 = vadd.f32 %v1234_v1, %v1233_v0 }
 0x1bf   : > { %1236 = vadd.xlane.f32.xlu0 %v1235_v2 }
 0x248   : > { %v1228_v4 = vpop.xlane.xlu0 %1227 }
 0x249   : > { %v1229_v5 = vadd.f32 %v1228_v4, %v1225_v3 }
 0x24b   : > { %1231 = vst.msk [vmem:[%s1766_s8] sm:$0xff] %vm1230_vm2, %v1229_v5 }
 0x24c   : > { %v1237_v7 = vpop.xlane.xlu0 %1236 }
 0x24d   : > { %v1238_v8 = vadd.f32 %v1237_v7, %v1232_v6 }
 0x24f   : > { %1239 = vst.msk [vmem:[%s1767_s9] sm:$0xff] %vm1230_vm2, %v1238_v8 }
 0x250 PF: > { %s20_s13 = sadd.s32 1, %s1477_s13   ;;  %s1768_s30 = smov %s1465_s10 }
 0x251   : > { %p17_p11 = scmp.ge.s32.totalorder %s20_s13, 4   ;;  %s1769_s10 = smov %s1567_s17 }
 0x252   : > { %s1770_s11 = smov %s1473_s12  ;;  %s1771_s12 = smov %s1773_s14 }
 0x253   :  { %19 = sbr.rel (!%p17_p11) target bundleno = 3 (0x3), region = 142 }

// kernel: up_forward.16
= control target key start
LH: loop header
LB: loop body
LE: loop exit
PB: predicated region body
PF: predicated region fallthrough
CT: control target
= control target key end

     0   :  { %s766_s13 = smov 0   ;;  %s768_s14 = smov 0   ;;  %s844_s0 = inlined_call_operand.vmem [shape: f32[1,8,512], index: 0, kind: input, shape index: {}]   ;;  %s845_s1 = inlined_call_operand.vmem [shape: f32[8,1], index: 1, kind: input, shape index: {}]   ;;  %s846_s2 = inlined_call_operand.vmem [shape: f32[8,1], index: 2, kind: input, shape index: {}]   ;;  %s847_s3 = inlined_call_operand.vmem [shape: f32[8,1], index: 3, kind: input, shape index: {}]   ;;  %s848_s4 = inlined_call_operand.vmem [shape: f32[8,1], index: 4, kind: input, shape index: {}]   ;;  %s849_s5 = inlined_call_operand.vmem [shape: f32[2,8,1], index: 5, kind: input, shape index: {}]   ;;  %s850_s6 = inlined_call_operand.vmem [shape: f32[1,8,8], index: 6, kind: input, shape index: {}]   ;;  %s851_s7 = inlined_call_operand.vmem [shape: f32[8,1], index: 7, kind: input, shape index: {}]   ;;  %s852_s8 = inlined_call_operand.vmem [shape: f32[8,512], index: 8, kind: output, shape index: {0}]   ;;  %s853_s9 = inlined_call_operand.vmem [shape: f32[8,1], index: 9, kind: output, shape index: {1}]   ;;  %s854_s10 = inlined_call_operand.vmem [shape: f32[8,1], index: 10, kind: output, shape index: {2}]  }
   0x1   :  { %s770_s15 = smov 0  }
   0x2 LB: > { %s33_s16 = sadd.s32 1, %s702_s14  ;;  %p642_p0 = scmp.ge.s32.totalorder %s706_s15, 1  ;;  %s706_s15 = sphi %s770_s15, %s21_s15   ;;  %s702_s14 = sphi %s768_s14, %s856_s14   ;;  %s698_s13 = sphi %s766_s13, %s855_s13  }
   0x3   : > { %p35_p1 = scmp.ge.s32.totalorder %s33_s16, 2  ;;  %p335_p2 = scmp.lt.s32.totalorder %s706_s15, 3 }
   0x5   : > { %s858_s16 = smov (%p35_p1, %s33_s16), 0  ;;  %p336_p3 = pnand %p642_p0, %p335_p2 }
   0x6   : > { %v399_v0 = vld [vmem:[%s845_s1] sm:$0xff] (!%p336_p3)  ;;  %p387_p4 = scmp.lt.s32.totalorder (!%p336_p3), %s698_s13, 1  ;;  %v708_v2 = vmov (!%p336_p3), 0   ;;  %v709_v16 = vmov (!%p336_p3), 0.0   ;;  %s643_s12 = sshll.u32 (!%p336_p3), %s698_s13, 1  ;;  %vm445_vm0 = vcmask (!%p336_p3), 64512  }
   0x7   : > { %339 = sbr.rel (%p336_p3) target bundleno = 535 (0x217), region = 52  ;;  %v400_v1 = vld [vmem:[%s846_s2] sm:$0xff] (!%p336_p3)  ;;  %680 = vset.pattern.permute.xlu0 (!%p336_p3), %v708_v2  ;;  %v403_v3 = vmul.f32 (!%p336_p3), 0.001953125, %v399_v0  ;;  %681 = vset.pattern.permute.xlu1 (!%p336_p3), %v708_v2  ;;  %p381_p5 = scmp.lt.s32.totalorder (!%p336_p3), %s643_s12, 3 }
   0x8   : > { %v404_v4 = vmul.f32 (!%p336_p3), 0.001953125, %v400_v1  ;;  %v439_v9 = vld [vmem:[%s851_s7] sm:$0xff] (!%p336_p3)  ;;  %513 = vmatprep.mubr.f32.mxu0 (!%p336_p3), %v709_v16  ;;  %p522_p6 = scmp.eq.s32.totalorder (!%p336_p3), %s698_s13, 0 }
   0x9   : > { %v405_v5 = vmul.f32 (!%p336_p3), %v403_v3, %v403_v3  ;;  %v401_v10 = vld [vmem:[%s847_s3] sm:$0xff] (!%p336_p3) }
   0xa   : > { %v402_v13 = vld [vmem:[%s848_s4] sm:$0xff] (!%p336_p3) }
   0xb   : > { %v406_v6 = vsub.f32 (!%p336_p3), %v404_v4, %v405_v5  ;;  %v438_v30 = vld [vmem:[%s850_s6] sm:$0xff] (!%p336_p3) }
   0xd   : > { %v407_v8 = vadd.f32 (!%p336_p3), 1e-05, %v406_v6 }
   0xe   : > { %s388_s21 = scalar_select %p387_p4, %s698_s13, 1 }
   0xf   : > { %682 = vrsqrt.f32 %v407_v8  ;;  %s860_s12 = smov (!%p381_p5, %s643_s12), 3  ;;  %vm528_vm1 = vcmask (%p522_p6), 7168   ;;  %v710_v36 = vmov (%p522_p6), 0.0  }
  0x10   : > { %s645_s22 = sshll.u32 %s388_s21, 3  ;;  %s644_s17 = sshll.u32 %s860_s12, 3  ;;  %529 = vst.msk [vmem:[%s853_s9] sm:$0xff] (%p522_p6), %vm528_vm1, %v710_v36  ;;  %530 = vst.msk [vmem:[%s854_s10] sm:$0xff] (%p522_p6), %vm528_vm1, %v710_v36 }
  0x11   : > { %s390_s25 = scalar_lea.vmem %s849_s5, %s645_s22  ;;  %s384_s20 = scalar_lea.vmem %s844_s0, %s644_s17 }
  0x12   : > { %v430_v7 = vld [vmem:[%s390_s25] sm:$0xff]  ;;  %v413_v19 = vld [vmem:[%s384_s20 + $0x8] sm:$0xff]  ;;  %s396_s25 = scalar_lea.vmem %s852_s8, %s644_s17 }
  0x13   : > { %433 = vperm.xlu1 %681, %v430_v7   ;;  %v412_v18 = vld [vmem:[%s384_s20] sm:$0xff] }
  0x17   : > { %442 = vperm.xlu1 %681, %v439_v9  }
  0x19   : > { %v683_v11 = vpop.eup %682 }
  0x1a   : > { %v409_v12 = vmul.f32 %v683_v11, %v401_v10 }
  0x1c   : > { %416 = vperm.xlu0 %680, %v409_v12   ;;  %v410_v14 = vmul.f32 %v409_v12, %v403_v3 }
  0x1e   : > { %v411_v15 = vsub.f32 %v402_v13, %v410_v14 }
  0x20   : > { %423 = vperm.xlu0 %680, %v411_v15  }
  0x92   : > { %v434_v27 = vpop.permute.xlu1 %433 }
  0x96   : > { %v443_v31 = vpop.permute.xlu1 %442 }
  0x9b   : > { %v417_v17 = vpop.permute.xlu0 %416 }
  0x9c   : > { %v419_v20 = vmul.f32 %v417_v17, %v412_v18  ;;  %v420_v21 = vmul.f32 %v417_v17, %v413_v19 }
  0x9f   : > { %v424_v22 = vpop.permute.xlu0 %423 }
  0xa0   : > { %v426_v23 = vadd.f32 %v424_v22, %v419_v20  ;;  %v427_v24 = vadd.f32 %v424_v22, %v420_v21 }
  0xa2   : > { %v428_v25 = vmax.f32 %v426_v23, 0.0  ;;  %v429_v26 = vmax.f32 %v427_v24, 0.0 }
  0xa4   : > { %v437_v28 = vmul.f32 %v434_v27, %v429_v26  ;;  %v436_v29 = vmul.f32 %v434_v27, %v428_v25 }
  0xa6   : > { %449 = vmatprep.subr.mxu0 %v437_v28 }
  0xa7   : > { %450 = vmatpush1.msra.mxu0 %v436_v29 }
  0xa8   : > { %648 = vmatmul.mubr.msk.f32.vlgmr.msra.gmra.mrb[0].mxu0 %vm445_vm0, %v438_v30 }
 0x179   : > { %527 = sbr.rel (!%p522_p6) target bundleno = 384 (0x180), region = 56 }
 0x17b   : > { %v515_v32 = vpop.f32.mrb[0].mxu0 }
 0x17c   : > { %v516_v33 = vadd.f32 %v515_v32, %v443_v31  ;;  %v517_v34 = vpop.f32.mrb[1].mxu0 }
 0x17d   : > { %v518_v35 = vadd.f32 %v517_v34, %v443_v31 }
 0x17e   : > { %520 = vst [vmem:[%s396_s25] sm:$0xff] %v516_v33 }
 0x17f   : > { %521 = vst [vmem:[%s396_s25 + $0x8] sm:$0xff] %v518_v35 }
 0x180 PF: > { %v532_v37 = vadd.f32 %v518_v35, %v516_v33  ;;  %v539_v38 = vmul.f32 %v516_v33, %v516_v33  ;;  %v540_v39 = vmul.f32 %v518_v35, %v518_v35  ;;  %v531_v41 = vld [vmem:[%s853_s9] sm:$0xff]  ;;  %vm536_vm2 = vcmask 7168  }
 0x181   : > { %v538_v44 = vld [vmem:[%s854_s10] sm:$0xff] }
 0x182   : > { %533 = vadd.xlane.f32.xlu0 %v532_v37  ;;  %v541_v40 = vadd.f32 %v540_v39, %v539_v38 }
 0x186   : > { %542 = vadd.xlane.f32.xlu0 %v541_v40 }
 0x20f   : > { %v534_v42 = vpop.xlane.xlu0 %533 }
 0x210   : > { %v535_v43 = vadd.f32 %v534_v42, %v531_v41 }
 0x212   : > { %537 = vst.msk [vmem:[%s853_s9] sm:$0xff] %vm536_vm2, %v535_v43 }
 0x213   : > { %v543_v45 = vpop.xlane.xlu0 %542 }
 0x214   : > { %v544_v46 = vadd.f32 %v543_v45, %v538_v44 }
 0x216   : > { %545 = vst.msk [vmem:[%s854_s10] sm:$0xff] %vm536_vm2, %v544_v46 }
 0x217 PF: > { %s21_s15 = sadd.s32 1, %s706_s15   ;;  %s855_s13 = smov %s702_s14 }
 0x218   : > { %p18_p7 = scmp.ge.s32.totalorder %s21_s15, 4   ;;  %s856_s14 = smov %s858_s16 }
 0x21a   :  { %20 = sbr.rel (!%p18_p7) target bundleno = 2 (0x2), region = 105 }

// kernel: up_forward.17
= control target key start
LH: loop header
LB: loop body
LE: loop exit
PB: predicated region body
PF: predicated region fallthrough
CT: control target
= control target key end

     0   :  { %s914_s21 = smov 0   ;;  %s985_s0 = inlined_call_operand.vmem [shape: f32[8,512], index: 0, kind: input, shape index: {}]   ;;  %s986_s1 = inlined_call_operand.vmem [shape: f32[8,1], index: 1, kind: input, shape index: {}]   ;;  %s987_s2 = inlined_call_operand.vmem [shape: f32[8,1], index: 2, kind: input, shape index: {}]   ;;  %s988_s3 = inlined_call_operand.vmem [shape: f32[8,1], index: 3, kind: input, shape index: {}]   ;;  %s989_s4 = inlined_call_operand.vmem [shape: f32[8,1], index: 4, kind: input, shape index: {}]   ;;  %s990_s5 = inlined_call_operand.vmem [shape: f32[8,512], index: 5, kind: input, shape index: {}]   ;;  %s991_s6 = inlined_call_operand.vmem [shape: f32[8,512], index: 6, kind: input, shape index: {}]   ;;  %s992_s7 = inlined_call_operand.vmem [shape: f32[8,1], index: 7, kind: input, shape index: {}]   ;;  %s993_s8 = inlined_call_operand.vmem [shape: f32[8,1], index: 8, kind: input, shape index: {}]   ;;  %s994_s9 = inlined_call_operand.vmem [shape: f32[8,1], index: 9, kind: input, shape index: {}]   ;;  %s995_s10 = inlined_call_operand.vmem [shape: f32[8,1], index: 10, kind: input, shape index: {}]   ;;  %s996_s11 = inlined_call_operand.vmem [shape: f32[8,512], index: 11, kind: input, shape index: {}]   ;;  %s997_s12 = inlined_call_operand.vmem [shape: f32[8,1], index: 12, kind: input, shape index: {}]   ;;  %s998_s13 = inlined_call_operand.vmem [shape: f32[8,1], index: 13, kind: input, shape index: {}]   ;;  %s999_s14 = inlined_call_operand.vmem [shape: f32[8,1], index: 14, kind: input, shape index: {}]   ;;  %s1000_s15 = inlined_call_operand.vmem [shape: f32[8,1], index: 15, kind: input, shape index: {}]   ;;  %s1001_s16 = inlined_call_operand.vmem [shape: f32[8,512], index: 16, kind: output, shape index: {}]  }
   0x1   :  { %1002 = sst [smem:[#allocation2_spill]] %s985_s0 }
   0x2 LB: > { %s786_s22 = sadd.s32 4294967295, %s826_s21   ;;  %p790_p0 = scmp.ge.s32.totalorder %s826_s21, 1  ;;  %s826_s21 = sphi %s914_s21, %s26_s21  }
   0x3   : > { %p496_p1 = scmp.lt.s32.totalorder %s826_s21, 3 }
   0x5   : > { %p497_p2 = pnand %p790_p0, %p496_p1 }
   0x6   : > { %v593_v0 = vld [vmem:[%s986_s1] sm:$0xff] (!%p497_p2)  ;;  %v828_v2 = vmov (!%p497_p2), 0   ;;  %s791_s19 = sshll.u32 (!%p497_p2), %s786_s22, 1  ;;  %s1003_s25 = sld [smem:[#allocation2_spill]] (!%p497_p2) }
   0x7   : > { %500 = sbr.rel (%p497_p2) target bundleno = 177 (0xb1), region = 84  ;;  %v594_v1 = vld [vmem:[%s987_s2] sm:$0xff] (!%p497_p2)  ;;  %812 = vset.pattern.permute.xlu0 (!%p497_p2), %v828_v2  ;;  %v597_v3 = vmul.f32 (!%p497_p2), 0.001953125, %v593_v0  ;;  %813 = vset.pattern.permute.xlu1 (!%p497_p2), %v828_v2  ;;  %p562_p3 = scmp.lt.s32.totalorder (!%p497_p2), %s791_s19, 3 }
   0x8   : > { %v598_v4 = vmul.f32 (!%p497_p2), 0.001953125, %v594_v1  ;;  %v622_v5 = vld [vmem:[%s992_s7] sm:$0xff] (!%p497_p2) }
   0x9   : > { %v623_v6 = vld [vmem:[%s993_s8] sm:$0xff] (!%p497_p2)  ;;  %v626_v7 = vmul.f32 (!%p497_p2), 0.001953125, %v622_v5  ;;  %v599_v11 = vmul.f32 (!%p497_p2), %v597_v3, %v597_v3 }
   0xa   : > { %v627_v8 = vmul.f32 (!%p497_p2), 0.001953125, %v623_v6  ;;  %v653_v9 = vld [vmem:[%s997_s12] sm:$0xff] (!%p497_p2) }
   0xb   : > { %v654_v10 = vld [vmem:[%s998_s13] sm:$0xff] (!%p497_p2)  ;;  %v657_v12 = vmul.f32 (!%p497_p2), 0.001953125, %v653_v9  ;;  %v628_v14 = vmul.f32 (!%p497_p2), %v626_v7, %v626_v7  ;;  %v600_v15 = vsub.f32 (!%p497_p2), %v598_v4, %v599_v11 }
   0xc   : > { %v658_v13 = vmul.f32 (!%p497_p2), 0.001953125, %v654_v10  ;;  %v595_v22 = vld [vmem:[%s988_s3] sm:$0xff] (!%p497_p2) }
   0xd   : > { %v659_v16 = vmul.f32 (!%p497_p2), %v657_v12, %v657_v12  ;;  %v629_v17 = vsub.f32 (!%p497_p2), %v627_v8, %v628_v14  ;;  %v601_v18 = vadd.f32 (!%p497_p2), 1e-05, %v600_v15  ;;  %v624_v23 = vld [vmem:[%s994_s9] sm:$0xff] (!%p497_p2) }
   0xe   : > { %v655_v25 = vld [vmem:[%s999_s14] sm:$0xff]  ;;  %s1005_s19 = smov (!%p562_p3, %s791_s19), 3 }
   0xf   : > { %v660_v19 = vsub.f32 %v658_v13, %v659_v16  ;;  %v630_v20 = vadd.f32 1e-05, %v629_v17  ;;  %814 = vrsqrt.f32 %v601_v18  ;;  %v596_v30 = vld [vmem:[%s989_s4] sm:$0xff]  ;;  %s960_s20 = sshll.u32 %s1005_s19, 3 }
  0x10   : > { %v625_v33 = vld [vmem:[%s995_s10] sm:$0xff]  ;;  %s565_s26 = scalar_lea.vmem %s1003_s25, %s960_s20  ;;  %s577_s29 = scalar_lea.vmem %s991_s6, %s960_s20 }
  0x11   : > { %v661_v21 = vadd.f32 1e-05, %v660_v19  ;;  %816 = vrsqrt.f32 %v630_v20  ;;  %v656_v38 = vld [vmem:[%s1000_s15] sm:$0xff]  ;;  %v592_v42 = vld [vmem:[%s565_s26 + $0x8] sm:$0xff]  ;;  %s583_s0 = scalar_lea.vmem %s996_s11, %s960_s20  ;;  %s571_s19 = scalar_lea.vmem %s990_s5, %s960_s20 }
  0x12   : > { %v591_v41 = vld [vmem:[%s565_s26] sm:$0xff]  ;;  %v621_v45 = vld [vmem:[%s577_s29 + $0x8] sm:$0xff]  ;;  %s589_s25 = scalar_lea.vmem %s1001_s16, %s960_s20 }
  0x13   : > { %818 = vrsqrt.f32 %v661_v21  ;;  %v620_v44 = vld [vmem:[%s577_s29] sm:$0xff]  ;;  %v652_v53 = vld [vmem:[%s583_s0 + $0x8] sm:$0xff] }
  0x14   : > { %v651_v52 = vld [vmem:[%s583_s0] sm:$0xff]  ;;  %v683_v60 = vld [vmem:[%s571_s19 + $0x8] sm:$0xff] }
  0x15   : > { %v682_v59 = vld [vmem:[%s571_s19] sm:$0xff] }
  0x19   : > { %v815_v24 = vpop.eup %814 }
  0x1a   : > { %v603_v27 = vmul.f32 %v815_v24, %v595_v22 }
  0x1b   : > { %v817_v26 = vpop.eup %816 }
  0x1c   : > { %v632_v29 = vmul.f32 %v817_v26, %v624_v23  ;;  %608 = vperm.xlu0 %812, %v603_v27   ;;  %v604_v31 = vmul.f32 %v603_v27, %v597_v3 }
  0x1d   : > { %v819_v28 = vpop.eup %818 }
  0x1e   : > { %v663_v32 = vmul.f32 %v819_v28, %v655_v25  ;;  %v633_v34 = vmul.f32 %v632_v29, %v626_v7  ;;  %v605_v35 = vsub.f32 %v596_v30, %v604_v31 }
  0x20   : > { %637 = vperm.xlu0 %812, %v632_v29   ;;  %615 = vperm.xlu1 %813, %v605_v35   ;;  %v634_v36 = vsub.f32 %v625_v33, %v633_v34  ;;  %v664_v37 = vmul.f32 %v663_v32, %v657_v12 }
  0x22   : > { %v665_v39 = vsub.f32 %v656_v38, %v664_v37 }
  0x24   : > { %668 = vperm.xlu0 %812, %v663_v32   ;;  %644 = vperm.xlu1 %813, %v634_v36  }
  0x28   : > { %675 = vperm.xlu1 %813, %v665_v39  }
  0x9b   : > { %v609_v40 = vpop.permute.xlu0 %608 }
  0x9c   : > { %v611_v47 = vmul.f32 %v609_v40, %v591_v41  ;;  %v612_v48 = vmul.f32 %v609_v40, %v592_v42 }
  0x9f   : > { %v638_v43 = vpop.permute.xlu0 %637  ;;  %v616_v46 = vpop.permute.xlu1 %615 }
  0xa0   : > { %v640_v49 = vmul.f32 %v638_v43, %v620_v44  ;;  %v641_v50 = vmul.f32 %v638_v43, %v621_v45  ;;  %v618_v55 = vadd.f32 %v616_v46, %v611_v47  ;;  %v619_v56 = vadd.f32 %v616_v46, %v612_v48 }
  0xa2   : > { %v684_v2 = vadd.f32 %v682_v59, %v618_v55  ;;  %v685_v3 = vadd.f32 %v683_v60, %v619_v56 }
  0xa3   : > { %v669_v51 = vpop.permute.xlu0 %668  ;;  %v645_v54 = vpop.permute.xlu1 %644 }
  0xa4   : > { %v647_v57 = vadd.f32 %v645_v54, %v640_v49  ;;  %v648_v58 = vadd.f32 %v645_v54, %v641_v50  ;;  %v671_v61 = vmul.f32 %v669_v51, %v651_v52  ;;  %v672_v62 = vmul.f32 %v669_v51, %v652_v53 }
  0xa6   : > { %v649_v63 = vmax.f32 %v647_v57, 0.0  ;;  %v650_v0 = vmax.f32 %v648_v58, 0.0 }
  0xa7   : > { %v676_v1 = vpop.permute.xlu1 %675 }
  0xa8   : > { %v678_v4 = vadd.f32 %v676_v1, %v671_v61  ;;  %v679_v5 = vadd.f32 %v676_v1, %v672_v62  ;;  %v686_v6 = vadd.f32 %v684_v2, %v649_v63  ;;  %v687_v7 = vadd.f32 %v685_v3, %v650_v0 }
  0xaa   : > { %v680_v8 = vmax.f32 %v678_v4, 0.0  ;;  %v681_v9 = vmax.f32 %v679_v5, 0.0 }
  0xac   : > { %v688_v10 = vadd.f32 %v686_v6, %v680_v8  ;;  %v689_v11 = vadd.f32 %v687_v7, %v681_v9 }
  0xae   : > { %v690_v12 = vmax.f32 %v688_v10, 0.0  ;;  %v691_v13 = vmax.f32 %v689_v11, 0.0 }
  0xb0   : > { %692 = vst [vmem:[%s589_s25] sm:$0xff] %v690_v12  ;;  %693 = vst [vmem:[%s589_s25 + $0x8] sm:$0xff] %v691_v13 }
  0xb1 PF: > { %s26_s21 = sadd.s32 1, %s826_s21  }
  0xb2   : > { %p23_p4 = scmp.ge.s32.totalorder %s26_s21, 4  }
  0xb4   :  { %25 = sbr.rel (!%p23_p4) target bundleno = 2 (0x2), region = 123 }

</bundles_post_ra>
